<compile_context>
chip_gen: v7x
topology: tpu7x:2x2x1
jax: 0.10.0
libtpu: 0.0.40
codegen_flags: <defaults>
</compile_context>

<pallas_src>
import numpy as np
import jax
import jax.numpy as jnp
from jax.experimental import pallas as pl
from jax.experimental.pallas import tpu as pltpu

# (in_dim, out_dim) per layer, matching the PyTorch module's __init__.
BRANCH1_DIMS = [(540, 200), (200, 100), (100, 256), (256, 384), (384, 384),
                (384, 256), (256, 250), (250, 250), (250, 200)]
BRANCH2_DIMS = [(3, 6), (6, 12), (12, 24), (24, 48), (48, 64),
                (64, 72), (72, 96), (96, 96), (96, 100)]
OUT_IN = 300          # concat(200, 100) -> fc_out_1 input
OUT_TRUE = 540        # true fc_out_1 output width
OUT_PAD = 640         # lane-dense (multiple of 128) padded output width
N_LAYERS = len(BRANCH1_DIMS)   # 9 layers per branch


def fwd_kernel(x1_ref, x2_ref, *refs):
    """refs = [W/b pairs for branch1 (9), branch2 (9), out layer, out_ref]."""
    out_ref = refs[-1]
    p = refs[:-1]
    b1 = p[:2 * N_LAYERS]
    b2 = p[2 * N_LAYERS:4 * N_LAYERS]
    w_out_ref, b_out_ref = p[4 * N_LAYERS], p[4 * N_LAYERS + 1]

    def linear_relu(x, w_ref, b_ref):
        # bf16 x bf16 MXU matmul with f32 accumulation; bias-add + ReLU in f32,
        # cast back to bf16 for the next layer's matmul.
        y = jnp.dot(x, w_ref[...], preferred_element_type=jnp.float32) + b_ref[...]
        return jnp.maximum(y, 0.0).astype(jnp.bfloat16)

    h1 = x1_ref[...].astype(jnp.bfloat16)
    h2 = x2_ref[...].astype(jnp.bfloat16)
    # Interleave the two independent serial chains (hides MRF pop latency of
    # one branch's tiny matmul under the other branch's pushes).
    for l in range(N_LAYERS):
        h1 = linear_relu(h1, b1[2 * l], b1[2 * l + 1])
        h2 = linear_relu(h2, b2[2 * l], b2[2 * l + 1])

    # torch.cat((latent1, latent2), 1) @ W_out.T + b
    #   == latent1 @ W_out[:, :200].T + latent2 @ W_out[:, 200:].T + b
    # (split-matmul form is identical and avoids an in-kernel concat).
    out = (jnp.dot(h1, w_out_ref[:200, :], preferred_element_type=jnp.float32)
           + jnp.dot(h2, w_out_ref[200:, :], preferred_element_type=jnp.float32)
           + b_out_ref[...])
    out_ref[...] = out   # no final ReLU (matches the module); lane-dense 640-wide store


def init_linear(key, in_dim, out_dim):
    """Deterministic PyTorch-style uniform(-1/sqrt(in), 1/sqrt(in)) init."""
    kw, kb = jax.random.split(key)
    bound = 1.0 / np.sqrt(in_dim)
    w = jax.random.uniform(kw, (in_dim, out_dim), jnp.float32, -bound, bound)
    b = jax.random.uniform(kb, (1, out_dim), jnp.float32, -bound, bound)
    return w, b


def build_params(seed=0):
    key = jax.random.PRNGKey(seed)
    all_dims = BRANCH1_DIMS + BRANCH2_DIMS + [(OUT_IN, OUT_TRUE)]
    keys = jax.random.split(key, len(all_dims))
    flat = []
    for i, (k, (din, dout)) in enumerate(zip(keys, all_dims)):
        w, b = init_linear(k, din, dout)
        if i == len(all_dims) - 1:
            # Zero-pad the final output-feature axis 540 -> 640 (lane-dense store;
            # padded columns produce zeros that the wrapper slices away).
            w = jnp.pad(w, ((0, 0), (0, OUT_PAD - OUT_TRUE)))
            b = jnp.pad(b, ((0, 0), (0, OUT_PAD - OUT_TRUE)))
        # Weights in bf16 (half the HBM/VMEM traffic), biases kept in f32.
        flat.extend([w.astype(jnp.bfloat16), b.astype(jnp.float32)])
    return flat


def _round_up(x, m):
    return (x + m - 1) // m * m


def fwd_model(x1, x2, flat_params, batch_tile=256):
    batch = x1.shape[0]
    # Batch tile: big enough to fill the MXU M dim (256 on v6e/v7x), never
    # larger than the (8-aligned) batch itself.
    bt = min(batch_tile, _round_up(batch, 8))
    padded = _round_up(batch, bt)
    if padded != batch:
        x1 = jnp.pad(x1, ((0, padded - batch), (0, 0)))
        x2 = jnp.pad(x2, ((0, padded - batch), (0, 0)))
    grid = (padded // bt,)

    # Resident-weight specs: constant index_map -> each weight/bias is DMA'd to
    # VMEM once and reused across all batch tiles.
    const_map = lambda i: (0, 0)
    w_specs = [pl.BlockSpec(p.shape, const_map) for p in flat_params]

    out = pl.pallas_call(
        fwd_kernel,
        out_shape=jax.ShapeDtypeStruct((padded, OUT_PAD), jnp.float32),
        grid=grid,
        in_specs=[pl.BlockSpec((bt, x1.shape[1]), lambda i: (i, 0)),
                  pl.BlockSpec((bt, x2.shape[1]), lambda i: (i, 0))] + w_specs,
        out_specs=pl.BlockSpec((bt, OUT_PAD), lambda i: (i, 0)),
        compiler_params=pltpu.CompilerParams(
            dimension_semantics=("parallel",)),
    )(x1, x2, *flat_params)
    return out[:batch, :OUT_TRUE]


def _reference(x1, x2, flat):
    """Pure-JAX reference at the same precision recipe (bf16 weights/acts, f32 acc)."""
    b1 = flat[:2 * N_LAYERS]
    b2 = flat[2 * N_LAYERS:4 * N_LAYERS]
    w_o, b_o = flat[4 * N_LAYERS], flat[4 * N_LAYERS + 1]
    h1 = x1.astype(jnp.bfloat16)
    h2 = x2.astype(jnp.bfloat16)
    for l in range(N_LAYERS):
        h1 = jnp.maximum(
            jnp.dot(h1, b1[2 * l], preferred_element_type=jnp.float32) + b1[2 * l + 1],
            0.0).astype(jnp.bfloat16)
        h2 = jnp.maximum(
            jnp.dot(h2, b2[2 * l], preferred_element_type=jnp.float32) + b2[2 * l + 1],
            0.0).astype(jnp.bfloat16)
    o = (jnp.dot(h1, w_o[:200, :], preferred_element_type=jnp.float32)
         + jnp.dot(h2, w_o[200:, :], preferred_element_type=jnp.float32) + b_o)
    return o[:, :OUT_TRUE]


if __name__ == "__main__":
    key = jax.random.PRNGKey(0)
    k1, k2 = jax.random.split(key)
    batch = 8
    x1 = jax.random.normal(k1, (batch, 540), jnp.float32)  # state input to fc1
    x2 = jax.random.normal(k2, (batch, 3), jnp.float32)    # action input to fc1_1

    params = build_params(seed=0)

    out = jax.block_until_ready(jax.jit(fwd_model)(x1, x2, params))
    assert out.shape == (batch, OUT_TRUE) and out.dtype == jnp.float32

    expected = jax.block_until_ready(jax.jit(_reference)(x1, x2, params))
    assert jnp.allclose(out, expected, atol=1e-1, rtol=1e-1), \
        f"max abs diff {float(jnp.max(jnp.abs(out - expected)))}"
    print("KERNEL_OK")
</pallas_src>

<mosaic_0001>
module attributes {stable_mosaic.version = 11 : i64} {
  func.func @fwd_kernel(%arg0: i32, %arg1: memref<8x540xf32, #tpu.memory_space<vmem>>, %arg2: memref<8x3xf32, #tpu.memory_space<vmem>>, %arg3: memref<540x200xbf16, #tpu.memory_space<vmem>>, %arg4: memref<1x200xf32, #tpu.memory_space<vmem>>, %arg5: memref<200x100xbf16, #tpu.memory_space<vmem>>, %arg6: memref<1x100xf32, #tpu.memory_space<vmem>>, %arg7: memref<100x256xbf16, #tpu.memory_space<vmem>>, %arg8: memref<1x256xf32, #tpu.memory_space<vmem>>, %arg9: memref<256x384xbf16, #tpu.memory_space<vmem>>, %arg10: memref<1x384xf32, #tpu.memory_space<vmem>>, %arg11: memref<384x384xbf16, #tpu.memory_space<vmem>>, %arg12: memref<1x384xf32, #tpu.memory_space<vmem>>, %arg13: memref<384x256xbf16, #tpu.memory_space<vmem>>, %arg14: memref<1x256xf32, #tpu.memory_space<vmem>>, %arg15: memref<256x250xbf16, #tpu.memory_space<vmem>>, %arg16: memref<1x250xf32, #tpu.memory_space<vmem>>, %arg17: memref<250x250xbf16, #tpu.memory_space<vmem>>, %arg18: memref<1x250xf32, #tpu.memory_space<vmem>>, %arg19: memref<250x200xbf16, #tpu.memory_space<vmem>>, %arg20: memref<1x200xf32, #tpu.memory_space<vmem>>, %arg21: memref<3x6xbf16, #tpu.memory_space<vmem>>, %arg22: memref<1x6xf32, #tpu.memory_space<vmem>>, %arg23: memref<6x12xbf16, #tpu.memory_space<vmem>>, %arg24: memref<1x12xf32, #tpu.memory_space<vmem>>, %arg25: memref<12x24xbf16, #tpu.memory_space<vmem>>, %arg26: memref<1x24xf32, #tpu.memory_space<vmem>>, %arg27: memref<24x48xbf16, #tpu.memory_space<vmem>>, %arg28: memref<1x48xf32, #tpu.memory_space<vmem>>, %arg29: memref<48x64xbf16, #tpu.memory_space<vmem>>, %arg30: memref<1x64xf32, #tpu.memory_space<vmem>>, %arg31: memref<64x72xbf16, #tpu.memory_space<vmem>>, %arg32: memref<1x72xf32, #tpu.memory_space<vmem>>, %arg33: memref<72x96xbf16, #tpu.memory_space<vmem>>, %arg34: memref<1x96xf32, #tpu.memory_space<vmem>>, %arg35: memref<96x96xbf16, #tpu.memory_space<vmem>>, %arg36: memref<1x96xf32, #tpu.memory_space<vmem>>, %arg37: memref<96x100xbf16, #tpu.memory_space<vmem>>, %arg38: memref<1x100xf32, #tpu.memory_space<vmem>>, %arg39: memref<300x640xbf16, #tpu.memory_space<vmem>>, %arg40: memref<1x640xf32, #tpu.memory_space<vmem>>, %arg41: memref<8x640xf32, #tpu.memory_space<vmem>>) attributes {dimension_semantics = [#tpu.dimension_semantics<parallel>], iteration_bounds = array<i64: 1>, scalar_prefetch = 0 : i64, scratch_operands = 0 : i64, tpu.core_type = #tpu.core_type<tc>, window_params = [{transform_indices = @transform_0, window_bounds = array<i64: 8, 540>}, {transform_indices = @transform_1, window_bounds = array<i64: 8, 3>}, {pipeline_mode = #tpu.pipeline_mode<synchronous>, transform_indices = @transform_2, window_bounds = array<i64: 540, 200>}, {pipeline_mode = #tpu.pipeline_mode<synchronous>, transform_indices = @transform_3, window_bounds = array<i64: 1, 200>}, {pipeline_mode = #tpu.pipeline_mode<synchronous>, transform_indices = @transform_4, window_bounds = array<i64: 200, 100>}, {pipeline_mode = #tpu.pipeline_mode<synchronous>, transform_indices = @transform_5, window_bounds = array<i64: 1, 100>}, {pipeline_mode = #tpu.pipeline_mode<synchronous>, transform_indices = @transform_6, window_bounds = array<i64: 100, 256>}, {pipeline_mode = #tpu.pipeline_mode<synchronous>, transform_indices = @transform_7, window_bounds = array<i64: 1, 256>}, {pipeline_mode = #tpu.pipeline_mode<synchronous>, transform_indices = @transform_8, window_bounds = array<i64: 256, 384>}, {pipeline_mode = #tpu.pipeline_mode<synchronous>, transform_indices = @transform_9, window_bounds = array<i64: 1, 384>}, {pipeline_mode = #tpu.pipeline_mode<synchronous>, transform_indices = @transform_10, window_bounds = array<i64: 384, 384>}, {pipeline_mode = #tpu.pipeline_mode<synchronous>, transform_indices = @transform_11, window_bounds = array<i64: 1, 384>}, {pipeline_mode = #tpu.pipeline_mode<synchronous>, transform_indices = @transform_12, window_bounds = array<i64: 384, 256>}, {pipeline_mode = #tpu.pipeline_mode<synchronous>, transform_indices = @transform_13, window_bounds = array<i64: 1, 256>}, {pipeline_mode = #tpu.pipeline_mode<synchronous>, transform_indices = @transform_14, window_bounds = array<i64: 256, 250>}, {pipeline_mode = #tpu.pipeline_mode<synchronous>, transform_indices = @transform_15, window_bounds = array<i64: 1, 250>}, {pipeline_mode = #tpu.pipeline_mode<synchronous>, transform_indices = @transform_16, window_bounds = array<i64: 250, 250>}, {pipeline_mode = #tpu.pipeline_mode<synchronous>, transform_indices = @transform_17, window_bounds = array<i64: 1, 250>}, {pipeline_mode = #tpu.pipeline_mode<synchronous>, transform_indices = @transform_18, window_bounds = array<i64: 250, 200>}, {pipeline_mode = #tpu.pipeline_mode<synchronous>, transform_indices = @transform_19, window_bounds = array<i64: 1, 200>}, {pipeline_mode = #tpu.pipeline_mode<synchronous>, transform_indices = @transform_20, window_bounds = array<i64: 3, 6>}, {pipeline_mode = #tpu.pipeline_mode<synchronous>, transform_indices = @transform_21, window_bounds = array<i64: 1, 6>}, {pipeline_mode = #tpu.pipeline_mode<synchronous>, transform_indices = @transform_22, window_bounds = array<i64: 6, 12>}, {pipeline_mode = #tpu.pipeline_mode<synchronous>, transform_indices = @transform_23, window_bounds = array<i64: 1, 12>}, {pipeline_mode = #tpu.pipeline_mode<synchronous>, transform_indices = @transform_24, window_bounds = array<i64: 12, 24>}, {pipeline_mode = #tpu.pipeline_mode<synchronous>, transform_indices = @transform_25, window_bounds = array<i64: 1, 24>}, {pipeline_mode = #tpu.pipeline_mode<synchronous>, transform_indices = @transform_26, window_bounds = array<i64: 24, 48>}, {pipeline_mode = #tpu.pipeline_mode<synchronous>, transform_indices = @transform_27, window_bounds = array<i64: 1, 48>}, {pipeline_mode = #tpu.pipeline_mode<synchronous>, transform_indices = @transform_28, window_bounds = array<i64: 48, 64>}, {pipeline_mode = #tpu.pipeline_mode<synchronous>, transform_indices = @transform_29, window_bounds = array<i64: 1, 64>}, {pipeline_mode = #tpu.pipeline_mode<synchronous>, transform_indices = @transform_30, window_bounds = array<i64: 64, 72>}, {pipeline_mode = #tpu.pipeline_mode<synchronous>, transform_indices = @transform_31, window_bounds = array<i64: 1, 72>}, {pipeline_mode = #tpu.pipeline_mode<synchronous>, transform_indices = @transform_32, window_bounds = array<i64: 72, 96>}, {pipeline_mode = #tpu.pipeline_mode<synchronous>, transform_indices = @transform_33, window_bounds = array<i64: 1, 96>}, {pipeline_mode = #tpu.pipeline_mode<synchronous>, transform_indices = @transform_34, window_bounds = array<i64: 96, 96>}, {pipeline_mode = #tpu.pipeline_mode<synchronous>, transform_indices = @transform_35, window_bounds = array<i64: 1, 96>}, {pipeline_mode = #tpu.pipeline_mode<synchronous>, transform_indices = @transform_36, window_bounds = array<i64: 96, 100>}, {pipeline_mode = #tpu.pipeline_mode<synchronous>, transform_indices = @transform_37, window_bounds = array<i64: 1, 100>}, {pipeline_mode = #tpu.pipeline_mode<synchronous>, transform_indices = @transform_38, window_bounds = array<i64: 300, 640>}, {pipeline_mode = #tpu.pipeline_mode<synchronous>, transform_indices = @transform_39, window_bounds = array<i64: 1, 640>}, {transform_indices = @transform_40, window_bounds = array<i64: 8, 640>}]} {
    %c0 = arith.constant 0 : index
    %c0_0 = arith.constant 0 : index
    %0 = vector.load %arg1[%c0, %c0_0] : memref<8x540xf32, #tpu.memory_space<vmem>>, vector<8x540xf32>
    %1 = arith.truncf %0 : vector<8x540xf32> to vector<8x540xbf16>
    %c0_1 = arith.constant 0 : index
    %c0_2 = arith.constant 0 : index
    %2 = vector.load %arg2[%c0_1, %c0_2] : memref<8x3xf32, #tpu.memory_space<vmem>>, vector<8x3xf32>
    %3 = arith.truncf %2 : vector<8x3xf32> to vector<8x3xbf16>
    %c0_3 = arith.constant 0 : index
    %c0_4 = arith.constant 0 : index
    %4 = vector.load %arg3[%c0_3, %c0_4] : memref<540x200xbf16, #tpu.memory_space<vmem>>, vector<540x200xbf16>
    %cst = arith.constant dense<0.000000e+00> : vector<8x200xf32>
    %5 = tpu.matmul %1, %4, %cst {dimension_numbers = #tpu.dot_dimension_numbers<[1], [0], [0], [1], [0, 0, 1, 1], [], []>} : vector<8x540xbf16>, vector<540x200xbf16>, vector<8x200xf32> -> vector<8x200xf32>
    %c0_5 = arith.constant 0 : index
    %c0_6 = arith.constant 0 : index
    %6 = vector.load %arg4[%c0_5, %c0_6] : memref<1x200xf32, #tpu.memory_space<vmem>>, vector<1x200xf32>
    %7 = vector.broadcast %6 : vector<1x200xf32> to vector<8x200xf32>
    %8 = arith.addf %5, %7 : vector<8x200xf32>
    %cst_7 = arith.constant 0.000000e+00 : f32
    %9 = vector.broadcast %cst_7 : f32 to vector<8x200xf32>
    %10 = arith.maximumf %8, %9 : vector<8x200xf32>
    %11 = arith.truncf %10 : vector<8x200xf32> to vector<8x200xbf16>
    %c0_8 = arith.constant 0 : index
    %c0_9 = arith.constant 0 : index
    %12 = vector.load %arg21[%c0_8, %c0_9] : memref<3x6xbf16, #tpu.memory_space<vmem>>, vector<3x6xbf16>
    %cst_10 = arith.constant dense<0.000000e+00> : vector<8x6xf32>
    %13 = tpu.matmul %3, %12, %cst_10 {dimension_numbers = #tpu.dot_dimension_numbers<[1], [0], [0], [1], [0, 0, 1, 1], [], []>} : vector<8x3xbf16>, vector<3x6xbf16>, vector<8x6xf32> -> vector<8x6xf32>
    %c0_11 = arith.constant 0 : index
    %c0_12 = arith.constant 0 : index
    %14 = vector.load %arg22[%c0_11, %c0_12] : memref<1x6xf32, #tpu.memory_space<vmem>>, vector<1x6xf32>
    %15 = vector.broadcast %14 : vector<1x6xf32> to vector<8x6xf32>
    %16 = arith.addf %13, %15 : vector<8x6xf32>
    %cst_13 = arith.constant 0.000000e+00 : f32
    %17 = vector.broadcast %cst_13 : f32 to vector<8x6xf32>
    %18 = arith.maximumf %16, %17 : vector<8x6xf32>
    %19 = arith.truncf %18 : vector<8x6xf32> to vector<8x6xbf16>
    %c0_14 = arith.constant 0 : index
    %c0_15 = arith.constant 0 : index
    %20 = vector.load %arg5[%c0_14, %c0_15] : memref<200x100xbf16, #tpu.memory_space<vmem>>, vector<200x100xbf16>
    %cst_16 = arith.constant dense<0.000000e+00> : vector<8x100xf32>
    %21 = tpu.matmul %11, %20, %cst_16 {dimension_numbers = #tpu.dot_dimension_numbers<[1], [0], [0], [1], [0, 0, 1, 1], [], []>} : vector<8x200xbf16>, vector<200x100xbf16>, vector<8x100xf32> -> vector<8x100xf32>
    %c0_17 = arith.constant 0 : index
    %c0_18 = arith.constant 0 : index
    %22 = vector.load %arg6[%c0_17, %c0_18] : memref<1x100xf32, #tpu.memory_space<vmem>>, vector<1x100xf32>
    %23 = vector.broadcast %22 : vector<1x100xf32> to vector<8x100xf32>
    %24 = arith.addf %21, %23 : vector<8x100xf32>
    %cst_19 = arith.constant 0.000000e+00 : f32
    %25 = vector.broadcast %cst_19 : f32 to vector<8x100xf32>
    %26 = arith.maximumf %24, %25 : vector<8x100xf32>
    %27 = arith.truncf %26 : vector<8x100xf32> to vector<8x100xbf16>
    %c0_20 = arith.constant 0 : index
    %c0_21 = arith.constant 0 : index
    %28 = vector.load %arg23[%c0_20, %c0_21] : memref<6x12xbf16, #tpu.memory_space<vmem>>, vector<6x12xbf16>
    %cst_22 = arith.constant dense<0.000000e+00> : vector<8x12xf32>
    %29 = tpu.matmul %19, %28, %cst_22 {dimension_numbers = #tpu.dot_dimension_numbers<[1], [0], [0], [1], [0, 0, 1, 1], [], []>} : vector<8x6xbf16>, vector<6x12xbf16>, vector<8x12xf32> -> vector<8x12xf32>
    %c0_23 = arith.constant 0 : index
    %c0_24 = arith.constant 0 : index
    %30 = vector.load %arg24[%c0_23, %c0_24] : memref<1x12xf32, #tpu.memory_space<vmem>>, vector<1x12xf32>
    %31 = vector.broadcast %30 : vector<1x12xf32> to vector<8x12xf32>
    %32 = arith.addf %29, %31 : vector<8x12xf32>
    %cst_25 = arith.constant 0.000000e+00 : f32
    %33 = vector.broadcast %cst_25 : f32 to vector<8x12xf32>
    %34 = arith.maximumf %32, %33 : vector<8x12xf32>
    %35 = arith.truncf %34 : vector<8x12xf32> to vector<8x12xbf16>
    %c0_26 = arith.constant 0 : index
    %c0_27 = arith.constant 0 : index
    %36 = vector.load %arg7[%c0_26, %c0_27] : memref<100x256xbf16, #tpu.memory_space<vmem>>, vector<100x256xbf16>
    %cst_28 = arith.constant dense<0.000000e+00> : vector<8x256xf32>
    %37 = tpu.matmul %27, %36, %cst_28 {dimension_numbers = #tpu.dot_dimension_numbers<[1], [0], [0], [1], [0, 0, 1, 1], [], []>} : vector<8x100xbf16>, vector<100x256xbf16>, vector<8x256xf32> -> vector<8x256xf32>
    %c0_29 = arith.constant 0 : index
    %c0_30 = arith.constant 0 : index
    %38 = vector.load %arg8[%c0_29, %c0_30] : memref<1x256xf32, #tpu.memory_space<vmem>>, vector<1x256xf32>
    %39 = vector.broadcast %38 : vector<1x256xf32> to vector<8x256xf32>
    %40 = arith.addf %37, %39 : vector<8x256xf32>
    %cst_31 = arith.constant 0.000000e+00 : f32
    %41 = vector.broadcast %cst_31 : f32 to vector<8x256xf32>
    %42 = arith.maximumf %40, %41 : vector<8x256xf32>
    %43 = arith.truncf %42 : vector<8x256xf32> to vector<8x256xbf16>
    %c0_32 = arith.constant 0 : index
    %c0_33 = arith.constant 0 : index
    %44 = vector.load %arg25[%c0_32, %c0_33] : memref<12x24xbf16, #tpu.memory_space<vmem>>, vector<12x24xbf16>
    %cst_34 = arith.constant dense<0.000000e+00> : vector<8x24xf32>
    %45 = tpu.matmul %35, %44, %cst_34 {dimension_numbers = #tpu.dot_dimension_numbers<[1], [0], [0], [1], [0, 0, 1, 1], [], []>} : vector<8x12xbf16>, vector<12x24xbf16>, vector<8x24xf32> -> vector<8x24xf32>
    %c0_35 = arith.constant 0 : index
    %c0_36 = arith.constant 0 : index
    %46 = vector.load %arg26[%c0_35, %c0_36] : memref<1x24xf32, #tpu.memory_space<vmem>>, vector<1x24xf32>
    %47 = vector.broadcast %46 : vector<1x24xf32> to vector<8x24xf32>
    %48 = arith.addf %45, %47 : vector<8x24xf32>
    %cst_37 = arith.constant 0.000000e+00 : f32
    %49 = vector.broadcast %cst_37 : f32 to vector<8x24xf32>
    %50 = arith.maximumf %48, %49 : vector<8x24xf32>
    %51 = arith.truncf %50 : vector<8x24xf32> to vector<8x24xbf16>
    %c0_38 = arith.constant 0 : index
    %c0_39 = arith.constant 0 : index
    %52 = vector.load %arg9[%c0_38, %c0_39] : memref<256x384xbf16, #tpu.memory_space<vmem>>, vector<256x384xbf16>
    %cst_40 = arith.constant dense<0.000000e+00> : vector<8x384xf32>
    %53 = tpu.matmul %43, %52, %cst_40 {dimension_numbers = #tpu.dot_dimension_numbers<[1], [0], [0], [1], [0, 0, 1, 1], [], []>} : vector<8x256xbf16>, vector<256x384xbf16>, vector<8x384xf32> -> vector<8x384xf32>
    %c0_41 = arith.constant 0 : index
    %c0_42 = arith.constant 0 : index
    %54 = vector.load %arg10[%c0_41, %c0_42] : memref<1x384xf32, #tpu.memory_space<vmem>>, vector<1x384xf32>
    %55 = vector.broadcast %54 : vector<1x384xf32> to vector<8x384xf32>
    %56 = arith.addf %53, %55 : vector<8x384xf32>
    %cst_43 = arith.constant 0.000000e+00 : f32
    %57 = vector.broadcast %cst_43 : f32 to vector<8x384xf32>
    %58 = arith.maximumf %56, %57 : vector<8x384xf32>
    %59 = arith.truncf %58 : vector<8x384xf32> to vector<8x384xbf16>
    %c0_44 = arith.constant 0 : index
    %c0_45 = arith.constant 0 : index
    %60 = vector.load %arg27[%c0_44, %c0_45] : memref<24x48xbf16, #tpu.memory_space<vmem>>, vector<24x48xbf16>
    %cst_46 = arith.constant dense<0.000000e+00> : vector<8x48xf32>
    %61 = tpu.matmul %51, %60, %cst_46 {dimension_numbers = #tpu.dot_dimension_numbers<[1], [0], [0], [1], [0, 0, 1, 1], [], []>} : vector<8x24xbf16>, vector<24x48xbf16>, vector<8x48xf32> -> vector<8x48xf32>
    %c0_47 = arith.constant 0 : index
    %c0_48 = arith.constant 0 : index
    %62 = vector.load %arg28[%c0_47, %c0_48] : memref<1x48xf32, #tpu.memory_space<vmem>>, vector<1x48xf32>
    %63 = vector.broadcast %62 : vector<1x48xf32> to vector<8x48xf32>
    %64 = arith.addf %61, %63 : vector<8x48xf32>
    %cst_49 = arith.constant 0.000000e+00 : f32
    %65 = vector.broadcast %cst_49 : f32 to vector<8x48xf32>
    %66 = arith.maximumf %64, %65 : vector<8x48xf32>
    %67 = arith.truncf %66 : vector<8x48xf32> to vector<8x48xbf16>
    %c0_50 = arith.constant 0 : index
    %c0_51 = arith.constant 0 : index
    %68 = vector.load %arg11[%c0_50, %c0_51] : memref<384x384xbf16, #tpu.memory_space<vmem>>, vector<384x384xbf16>
    %cst_52 = arith.constant dense<0.000000e+00> : vector<8x384xf32>
    %69 = tpu.matmul %59, %68, %cst_52 {dimension_numbers = #tpu.dot_dimension_numbers<[1], [0], [0], [1], [0, 0, 1, 1], [], []>} : vector<8x384xbf16>, vector<384x384xbf16>, vector<8x384xf32> -> vector<8x384xf32>
    %c0_53 = arith.constant 0 : index
    %c0_54 = arith.constant 0 : index
    %70 = vector.load %arg12[%c0_53, %c0_54] : memref<1x384xf32, #tpu.memory_space<vmem>>, vector<1x384xf32>
    %71 = vector.broadcast %70 : vector<1x384xf32> to vector<8x384xf32>
    %72 = arith.addf %69, %71 : vector<8x384xf32>
    %cst_55 = arith.constant 0.000000e+00 : f32
    %73 = vector.broadcast %cst_55 : f32 to vector<8x384xf32>
    %74 = arith.maximumf %72, %73 : vector<8x384xf32>
    %75 = arith.truncf %74 : vector<8x384xf32> to vector<8x384xbf16>
    %c0_56 = arith.constant 0 : index
    %c0_57 = arith.constant 0 : index
    %76 = vector.load %arg29[%c0_56, %c0_57] : memref<48x64xbf16, #tpu.memory_space<vmem>>, vector<48x64xbf16>
    %cst_58 = arith.constant dense<0.000000e+00> : vector<8x64xf32>
    %77 = tpu.matmul %67, %76, %cst_58 {dimension_numbers = #tpu.dot_dimension_numbers<[1], [0], [0], [1], [0, 0, 1, 1], [], []>} : vector<8x48xbf16>, vector<48x64xbf16>, vector<8x64xf32> -> vector<8x64xf32>
    %c0_59 = arith.constant 0 : index
    %c0_60 = arith.constant 0 : index
    %78 = vector.load %arg30[%c0_59, %c0_60] : memref<1x64xf32, #tpu.memory_space<vmem>>, vector<1x64xf32>
    %79 = vector.broadcast %78 : vector<1x64xf32> to vector<8x64xf32>
    %80 = arith.addf %77, %79 : vector<8x64xf32>
    %cst_61 = arith.constant 0.000000e+00 : f32
    %81 = vector.broadcast %cst_61 : f32 to vector<8x64xf32>
    %82 = arith.maximumf %80, %81 : vector<8x64xf32>
    %83 = arith.truncf %82 : vector<8x64xf32> to vector<8x64xbf16>
    %c0_62 = arith.constant 0 : index
    %c0_63 = arith.constant 0 : index
    %84 = vector.load %arg13[%c0_62, %c0_63] : memref<384x256xbf16, #tpu.memory_space<vmem>>, vector<384x256xbf16>
    %cst_64 = arith.constant dense<0.000000e+00> : vector<8x256xf32>
    %85 = tpu.matmul %75, %84, %cst_64 {dimension_numbers = #tpu.dot_dimension_numbers<[1], [0], [0], [1], [0, 0, 1, 1], [], []>} : vector<8x384xbf16>, vector<384x256xbf16>, vector<8x256xf32> -> vector<8x256xf32>
    %c0_65 = arith.constant 0 : index
    %c0_66 = arith.constant 0 : index
    %86 = vector.load %arg14[%c0_65, %c0_66] : memref<1x256xf32, #tpu.memory_space<vmem>>, vector<1x256xf32>
    %87 = vector.broadcast %86 : vector<1x256xf32> to vector<8x256xf32>
    %88 = arith.addf %85, %87 : vector<8x256xf32>
    %cst_67 = arith.constant 0.000000e+00 : f32
    %89 = vector.broadcast %cst_67 : f32 to vector<8x256xf32>
    %90 = arith.maximumf %88, %89 : vector<8x256xf32>
    %91 = arith.truncf %90 : vector<8x256xf32> to vector<8x256xbf16>
    %c0_68 = arith.constant 0 : index
    %c0_69 = arith.constant 0 : index
    %92 = vector.load %arg31[%c0_68, %c0_69] : memref<64x72xbf16, #tpu.memory_space<vmem>>, vector<64x72xbf16>
    %cst_70 = arith.constant dense<0.000000e+00> : vector<8x72xf32>
    %93 = tpu.matmul %83, %92, %cst_70 {dimension_numbers = #tpu.dot_dimension_numbers<[1], [0], [0], [1], [0, 0, 1, 1], [], []>} : vector<8x64xbf16>, vector<64x72xbf16>, vector<8x72xf32> -> vector<8x72xf32>
    %c0_71 = arith.constant 0 : index
    %c0_72 = arith.constant 0 : index
    %94 = vector.load %arg32[%c0_71, %c0_72] : memref<1x72xf32, #tpu.memory_space<vmem>>, vector<1x72xf32>
    %95 = vector.broadcast %94 : vector<1x72xf32> to vector<8x72xf32>
    %96 = arith.addf %93, %95 : vector<8x72xf32>
    %cst_73 = arith.constant 0.000000e+00 : f32
    %97 = vector.broadcast %cst_73 : f32 to vector<8x72xf32>
    %98 = arith.maximumf %96, %97 : vector<8x72xf32>
    %99 = arith.truncf %98 : vector<8x72xf32> to vector<8x72xbf16>
    %c0_74 = arith.constant 0 : index
    %c0_75 = arith.constant 0 : index
    %100 = vector.load %arg15[%c0_74, %c0_75] : memref<256x250xbf16, #tpu.memory_space<vmem>>, vector<256x250xbf16>
    %cst_76 = arith.constant dense<0.000000e+00> : vector<8x250xf32>
    %101 = tpu.matmul %91, %100, %cst_76 {dimension_numbers = #tpu.dot_dimension_numbers<[1], [0], [0], [1], [0, 0, 1, 1], [], []>} : vector<8x256xbf16>, vector<256x250xbf16>, vector<8x250xf32> -> vector<8x250xf32>
    %c0_77 = arith.constant 0 : index
    %c0_78 = arith.constant 0 : index
    %102 = vector.load %arg16[%c0_77, %c0_78] : memref<1x250xf32, #tpu.memory_space<vmem>>, vector<1x250xf32>
    %103 = vector.broadcast %102 : vector<1x250xf32> to vector<8x250xf32>
    %104 = arith.addf %101, %103 : vector<8x250xf32>
    %cst_79 = arith.constant 0.000000e+00 : f32
    %105 = vector.broadcast %cst_79 : f32 to vector<8x250xf32>
    %106 = arith.maximumf %104, %105 : vector<8x250xf32>
    %107 = arith.truncf %106 : vector<8x250xf32> to vector<8x250xbf16>
    %c0_80 = arith.constant 0 : index
    %c0_81 = arith.constant 0 : index
    %108 = vector.load %arg33[%c0_80, %c0_81] : memref<72x96xbf16, #tpu.memory_space<vmem>>, vector<72x96xbf16>
    %cst_82 = arith.constant dense<0.000000e+00> : vector<8x96xf32>
    %109 = tpu.matmul %99, %108, %cst_82 {dimension_numbers = #tpu.dot_dimension_numbers<[1], [0], [0], [1], [0, 0, 1, 1], [], []>} : vector<8x72xbf16>, vector<72x96xbf16>, vector<8x96xf32> -> vector<8x96xf32>
    %c0_83 = arith.constant 0 : index
    %c0_84 = arith.constant 0 : index
    %110 = vector.load %arg34[%c0_83, %c0_84] : memref<1x96xf32, #tpu.memory_space<vmem>>, vector<1x96xf32>
    %111 = vector.broadcast %110 : vector<1x96xf32> to vector<8x96xf32>
    %112 = arith.addf %109, %111 : vector<8x96xf32>
    %cst_85 = arith.constant 0.000000e+00 : f32
    %113 = vector.broadcast %cst_85 : f32 to vector<8x96xf32>
    %114 = arith.maximumf %112, %113 : vector<8x96xf32>
    %115 = arith.truncf %114 : vector<8x96xf32> to vector<8x96xbf16>
    %c0_86 = arith.constant 0 : index
    %c0_87 = arith.constant 0 : index
    %116 = vector.load %arg17[%c0_86, %c0_87] : memref<250x250xbf16, #tpu.memory_space<vmem>>, vector<250x250xbf16>
    %cst_88 = arith.constant dense<0.000000e+00> : vector<8x250xf32>
    %117 = tpu.matmul %107, %116, %cst_88 {dimension_numbers = #tpu.dot_dimension_numbers<[1], [0], [0], [1], [0, 0, 1, 1], [], []>} : vector<8x250xbf16>, vector<250x250xbf16>, vector<8x250xf32> -> vector<8x250xf32>
    %c0_89 = arith.constant 0 : index
    %c0_90 = arith.constant 0 : index
    %118 = vector.load %arg18[%c0_89, %c0_90] : memref<1x250xf32, #tpu.memory_space<vmem>>, vector<1x250xf32>
    %119 = vector.broadcast %118 : vector<1x250xf32> to vector<8x250xf32>
    %120 = arith.addf %117, %119 : vector<8x250xf32>
    %cst_91 = arith.constant 0.000000e+00 : f32
    %121 = vector.broadcast %cst_91 : f32 to vector<8x250xf32>
    %122 = arith.maximumf %120, %121 : vector<8x250xf32>
    %123 = arith.truncf %122 : vector<8x250xf32> to vector<8x250xbf16>
    %c0_92 = arith.constant 0 : index
    %c0_93 = arith.constant 0 : index
    %124 = vector.load %arg35[%c0_92, %c0_93] : memref<96x96xbf16, #tpu.memory_space<vmem>>, vector<96x96xbf16>
    %cst_94 = arith.constant dense<0.000000e+00> : vector<8x96xf32>
    %125 = tpu.matmul %115, %124, %cst_94 {dimension_numbers = #tpu.dot_dimension_numbers<[1], [0], [0], [1], [0, 0, 1, 1], [], []>} : vector<8x96xbf16>, vector<96x96xbf16>, vector<8x96xf32> -> vector<8x96xf32>
    %c0_95 = arith.constant 0 : index
    %c0_96 = arith.constant 0 : index
    %126 = vector.load %arg36[%c0_95, %c0_96] : memref<1x96xf32, #tpu.memory_space<vmem>>, vector<1x96xf32>
    %127 = vector.broadcast %126 : vector<1x96xf32> to vector<8x96xf32>
    %128 = arith.addf %125, %127 : vector<8x96xf32>
    %cst_97 = arith.constant 0.000000e+00 : f32
    %129 = vector.broadcast %cst_97 : f32 to vector<8x96xf32>
    %130 = arith.maximumf %128, %129 : vector<8x96xf32>
    %131 = arith.truncf %130 : vector<8x96xf32> to vector<8x96xbf16>
    %c0_98 = arith.constant 0 : index
    %c0_99 = arith.constant 0 : index
    %132 = vector.load %arg19[%c0_98, %c0_99] : memref<250x200xbf16, #tpu.memory_space<vmem>>, vector<250x200xbf16>
    %cst_100 = arith.constant dense<0.000000e+00> : vector<8x200xf32>
    %133 = tpu.matmul %123, %132, %cst_100 {dimension_numbers = #tpu.dot_dimension_numbers<[1], [0], [0], [1], [0, 0, 1, 1], [], []>} : vector<8x250xbf16>, vector<250x200xbf16>, vector<8x200xf32> -> vector<8x200xf32>
    %c0_101 = arith.constant 0 : index
    %c0_102 = arith.constant 0 : index
    %134 = vector.load %arg20[%c0_101, %c0_102] : memref<1x200xf32, #tpu.memory_space<vmem>>, vector<1x200xf32>
    %135 = vector.broadcast %134 : vector<1x200xf32> to vector<8x200xf32>
    %136 = arith.addf %133, %135 : vector<8x200xf32>
    %cst_103 = arith.constant 0.000000e+00 : f32
    %137 = vector.broadcast %cst_103 : f32 to vector<8x200xf32>
    %138 = arith.maximumf %136, %137 : vector<8x200xf32>
    %139 = arith.truncf %138 : vector<8x200xf32> to vector<8x200xbf16>
    %c0_104 = arith.constant 0 : index
    %c0_105 = arith.constant 0 : index
    %140 = vector.load %arg37[%c0_104, %c0_105] : memref<96x100xbf16, #tpu.memory_space<vmem>>, vector<96x100xbf16>
    %cst_106 = arith.constant dense<0.000000e+00> : vector<8x100xf32>
    %141 = tpu.matmul %131, %140, %cst_106 {dimension_numbers = #tpu.dot_dimension_numbers<[1], [0], [0], [1], [0, 0, 1, 1], [], []>} : vector<8x96xbf16>, vector<96x100xbf16>, vector<8x100xf32> -> vector<8x100xf32>
    %c0_107 = arith.constant 0 : index
    %c0_108 = arith.constant 0 : index
    %142 = vector.load %arg38[%c0_107, %c0_108] : memref<1x100xf32, #tpu.memory_space<vmem>>, vector<1x100xf32>
    %143 = vector.broadcast %142 : vector<1x100xf32> to vector<8x100xf32>
    %144 = arith.addf %141, %143 : vector<8x100xf32>
    %cst_109 = arith.constant 0.000000e+00 : f32
    %145 = vector.broadcast %cst_109 : f32 to vector<8x100xf32>
    %146 = arith.maximumf %144, %145 : vector<8x100xf32>
    %147 = arith.truncf %146 : vector<8x100xf32> to vector<8x100xbf16>
    %c0_110 = arith.constant 0 : index
    %c0_111 = arith.constant 0 : index
    %148 = vector.load %arg39[%c0_110, %c0_111] : memref<300x640xbf16, #tpu.memory_space<vmem>>, vector<200x640xbf16>
    %cst_112 = arith.constant dense<0.000000e+00> : vector<8x640xf32>
    %149 = tpu.matmul %139, %148, %cst_112 {dimension_numbers = #tpu.dot_dimension_numbers<[1], [0], [0], [1], [0, 0, 1, 1], [], []>} : vector<8x200xbf16>, vector<200x640xbf16>, vector<8x640xf32> -> vector<8x640xf32>
    %c200 = arith.constant 200 : index
    %c0_113 = arith.constant 0 : index
    %150 = vector.load %arg39[%c200, %c0_113] : memref<300x640xbf16, #tpu.memory_space<vmem>>, vector<100x640xbf16>
    %cst_114 = arith.constant dense<0.000000e+00> : vector<8x640xf32>
    %151 = tpu.matmul %147, %150, %cst_114 {dimension_numbers = #tpu.dot_dimension_numbers<[1], [0], [0], [1], [0, 0, 1, 1], [], []>} : vector<8x100xbf16>, vector<100x640xbf16>, vector<8x640xf32> -> vector<8x640xf32>
    %152 = arith.addf %149, %151 : vector<8x640xf32>
    %c0_115 = arith.constant 0 : index
    %c0_116 = arith.constant 0 : index
    %153 = vector.load %arg40[%c0_115, %c0_116] : memref<1x640xf32, #tpu.memory_space<vmem>>, vector<1x640xf32>
    %154 = vector.broadcast %153 : vector<1x640xf32> to vector<8x640xf32>
    %155 = arith.addf %152, %154 : vector<8x640xf32>
    %c0_117 = arith.constant 0 : index
    %c0_118 = arith.constant 0 : index
    %156 = vector.load %arg41[%c0_117, %c0_118] : memref<8x640xf32, #tpu.memory_space<vmem>>, vector<8x640xf32>
    tpu.vector_store %arg41[%c0_117, %c0_118], %155 {strides = array<i32>} : memref<8x640xf32, #tpu.memory_space<vmem>>, vector<8x640xf32>,
    return
  }
  func.func @transform_0(%arg0: i32) -> (i32, i32) {
    %c0_i32 = arith.constant 0 : i32
    %c0_i32_0 = arith.constant 0 : i32
    return %arg0, %c0_i32 : i32, i32
  }
  func.func @transform_1(%arg0: i32) -> (i32, i32) {
    %c0_i32 = arith.constant 0 : i32
    %c0_i32_0 = arith.constant 0 : i32
    return %arg0, %c0_i32 : i32, i32
  }
  func.func @transform_2(%arg0: i32) -> (i32, i32) {
    %c0_i32 = arith.constant 0 : i32
    %c0_i32_0 = arith.constant 0 : i32
    %c0_i32_1 = arith.constant 0 : i32
    return %c0_i32, %c0_i32_0 : i32, i32
  }
  func.func @transform_3(%arg0: i32) -> (i32, i32) {
    %c0_i32 = arith.constant 0 : i32
    %c0_i32_0 = arith.constant 0 : i32
    %c0_i32_1 = arith.constant 0 : i32
    return %c0_i32, %c0_i32_0 : i32, i32
  }
  func.func @transform_4(%arg0: i32) -> (i32, i32) {
    %c0_i32 = arith.constant 0 : i32
    %c0_i32_0 = arith.constant 0 : i32
    %c0_i32_1 = arith.constant 0 : i32
    return %c0_i32, %c0_i32_0 : i32, i32
  }
  func.func @transform_5(%arg0: i32) -> (i32, i32) {
    %c0_i32 = arith.constant 0 : i32
    %c0_i32_0 = arith.constant 0 : i32
    %c0_i32_1 = arith.constant 0 : i32
    return %c0_i32, %c0_i32_0 : i32, i32
  }
  func.func @transform_6(%arg0: i32) -> (i32, i32) {
    %c0_i32 = arith.constant 0 : i32
    %c0_i32_0 = arith.constant 0 : i32
    %c0_i32_1 = arith.constant 0 : i32
    return %c0_i32, %c0_i32_0 : i32, i32
  }
  func.func @transform_7(%arg0: i32) -> (i32, i32) {
    %c0_i32 = arith.constant 0 : i32
    %c0_i32_0 = arith.constant 0 : i32
    %c0_i32_1 = arith.constant 0 : i32
    return %c0_i32, %c0_i32_0 : i32, i32
  }
  func.func @transform_8(%arg0: i32) -> (i32, i32) {
    %c0_i32 = arith.constant 0 : i32
    %c0_i32_0 = arith.constant 0 : i32
    %c0_i32_1 = arith.constant 0 : i32
    return %c0_i32, %c0_i32_0 : i32, i32
  }
  func.func @transform_9(%arg0: i32) -> (i32, i32) {
    %c0_i32 = arith.constant 0 : i32
    %c0_i32_0 = arith.constant 0 : i32
    %c0_i32_1 = arith.constant 0 : i32
    return %c0_i32, %c0_i32_0 : i32, i32
  }
  func.func @transform_10(%arg0: i32) -> (i32, i32) {
    %c0_i32 = arith.constant 0 : i32
    %c0_i32_0 = arith.constant 0 : i32
    %c0_i32_1 = arith.constant 0 : i32
    return %c0_i32, %c0_i32_0 : i32, i32
  }
  func.func @transform_11(%arg0: i32) -> (i32, i32) {
    %c0_i32 = arith.constant 0 : i32
    %c0_i32_0 = arith.constant 0 : i32
    %c0_i32_1 = arith.constant 0 : i32
    return %c0_i32, %c0_i32_0 : i32, i32
  }
  func.func @transform_12(%arg0: i32) -> (i32, i32) {
    %c0_i32 = arith.constant 0 : i32
    %c0_i32_0 = arith.constant 0 : i32
    %c0_i32_1 = arith.constant 0 : i32
    return %c0_i32, %c0_i32_0 : i32, i32
  }
  func.func @transform_13(%arg0: i32) -> (i32, i32) {
    %c0_i32 = arith.constant 0 : i32
    %c0_i32_0 = arith.constant 0 : i32
    %c0_i32_1 = arith.constant 0 : i32
    return %c0_i32, %c0_i32_0 : i32, i32
  }
  func.func @transform_14(%arg0: i32) -> (i32, i32) {
    %c0_i32 = arith.constant 0 : i32
    %c0_i32_0 = arith.constant 0 : i32
    %c0_i32_1 = arith.constant 0 : i32
    return %c0_i32, %c0_i32_0 : i32, i32
  }
  func.func @transform_15(%arg0: i32) -> (i32, i32) {
    %c0_i32 = arith.constant 0 : i32
    %c0_i32_0 = arith.constant 0 : i32
    %c0_i32_1 = arith.constant 0 : i32
    return %c0_i32, %c0_i32_0 : i32, i32
  }
  func.func @transform_16(%arg0: i32) -> (i32, i32) {
    %c0_i32 = arith.constant 0 : i32
    %c0_i32_0 = arith.constant 0 : i32
    %c0_i32_1 = arith.constant 0 : i32
    return %c0_i32, %c0_i32_0 : i32, i32
  }
  func.func @transform_17(%arg0: i32) -> (i32, i32) {
    %c0_i32 = arith.constant 0 : i32
    %c0_i32_0 = arith.constant 0 : i32
    %c0_i32_1 = arith.constant 0 : i32
    return %c0_i32, %c0_i32_0 : i32, i32
  }
  func.func @transform_18(%arg0: i32) -> (i32, i32) {
    %c0_i32 = arith.constant 0 : i32
    %c0_i32_0 = arith.constant 0 : i32
    %c0_i32_1 = arith.constant 0 : i32
    return %c0_i32, %c0_i32_0 : i32, i32
  }
  func.func @transform_19(%arg0: i32) -> (i32, i32) {
    %c0_i32 = arith.constant 0 : i32
    %c0_i32_0 = arith.constant 0 : i32
    %c0_i32_1 = arith.constant 0 : i32
    return %c0_i32, %c0_i32_0 : i32, i32
  }
  func.func @transform_20(%arg0: i32) -> (i32, i32) {
    %c0_i32 = arith.constant 0 : i32
    %c0_i32_0 = arith.constant 0 : i32
    %c0_i32_1 = arith.constant 0 : i32
    return %c0_i32, %c0_i32_0 : i32, i32
  }
  func.func @transform_21(%arg0: i32) -> (i32, i32) {
    %c0_i32 = arith.constant 0 : i32
    %c0_i32_0 = arith.constant 0 : i32
    %c0_i32_1 = arith.constant 0 : i32
    return %c0_i32, %c0_i32_0 : i32, i32
  }
  func.func @transform_22(%arg0: i32) -> (i32, i32) {
    %c0_i32 = arith.constant 0 : i32
    %c0_i32_0 = arith.constant 0 : i32
    %c0_i32_1 = arith.constant 0 : i32
    return %c0_i32, %c0_i32_0 : i32, i32
  }
  func.func @transform_23(%arg0: i32) -> (i32, i32) {
    %c0_i32 = arith.constant 0 : i32
    %c0_i32_0 = arith.constant 0 : i32
    %c0_i32_1 = arith.constant 0 : i32
    return %c0_i32, %c0_i32_0 : i32, i32
  }
  func.func @transform_24(%arg0: i32) -> (i32, i32) {
    %c0_i32 = arith.constant 0 : i32
    %c0_i32_0 = arith.constant 0 : i32
    %c0_i32_1 = arith.constant 0 : i32
    return %c0_i32, %c0_i32_0 : i32, i32
  }
  func.func @transform_25(%arg0: i32) -> (i32, i32) {
    %c0_i32 = arith.constant 0 : i32
    %c0_i32_0 = arith.constant 0 : i32
    %c0_i32_1 = arith.constant 0 : i32
    return %c0_i32, %c0_i32_0 : i32, i32
  }
  func.func @transform_26(%arg0: i32) -> (i32, i32) {
    %c0_i32 = arith.constant 0 : i32
    %c0_i32_0 = arith.constant 0 : i32
    %c0_i32_1 = arith.constant 0 : i32
    return %c0_i32, %c0_i32_0 : i32, i32
  }
  func.func @transform_27(%arg0: i32) -> (i32, i32) {
    %c0_i32 = arith.constant 0 : i32
    %c0_i32_0 = arith.constant 0 : i32
    %c0_i32_1 = arith.constant 0 : i32
    return %c0_i32, %c0_i32_0 : i32, i32
  }
  func.func @transform_28(%arg0: i32) -> (i32, i32) {
    %c0_i32 = arith.constant 0 : i32
    %c0_i32_0 = arith.constant 0 : i32
    %c0_i32_1 = arith.constant 0 : i32
    return %c0_i32, %c0_i32_0 : i32, i32
  }
  func.func @transform_29(%arg0: i32) -> (i32, i32) {
    %c0_i32 = arith.constant 0 : i32
    %c0_i32_0 = arith.constant 0 : i32
    %c0_i32_1 = arith.constant 0 : i32
    return %c0_i32, %c0_i32_0 : i32, i32
  }
  func.func @transform_30(%arg0: i32) -> (i32, i32) {
    %c0_i32 = arith.constant 0 : i32
    %c0_i32_0 = arith.constant 0 : i32
    %c0_i32_1 = arith.constant 0 : i32
    return %c0_i32, %c0_i32_0 : i32, i32
  }
  func.func @transform_31(%arg0: i32) -> (i32, i32) {
    %c0_i32 = arith.constant 0 : i32
    %c0_i32_0 = arith.constant 0 : i32
    %c0_i32_1 = arith.constant 0 : i32
    return %c0_i32, %c0_i32_0 : i32, i32
  }
  func.func @transform_32(%arg0: i32) -> (i32, i32) {
    %c0_i32 = arith.constant 0 : i32
    %c0_i32_0 = arith.constant 0 : i32
    %c0_i32_1 = arith.constant 0 : i32
    return %c0_i32, %c0_i32_0 : i32, i32
  }
  func.func @transform_33(%arg0: i32) -> (i32, i32) {
    %c0_i32 = arith.constant 0 : i32
    %c0_i32_0 = arith.constant 0 : i32
    %c0_i32_1 = arith.constant 0 : i32
    return %c0_i32, %c0_i32_0 : i32, i32
  }
  func.func @transform_34(%arg0: i32) -> (i32, i32) {
    %c0_i32 = arith.constant 0 : i32
    %c0_i32_0 = arith.constant 0 : i32
    %c0_i32_1 = arith.constant 0 : i32
    return %c0_i32, %c0_i32_0 : i32, i32
  }
  func.func @transform_35(%arg0: i32) -> (i32, i32) {
    %c0_i32 = arith.constant 0 : i32
    %c0_i32_0 = arith.constant 0 : i32
    %c0_i32_1 = arith.constant 0 : i32
    return %c0_i32, %c0_i32_0 : i32, i32
  }
  func.func @transform_36(%arg0: i32) -> (i32, i32) {
    %c0_i32 = arith.constant 0 : i32
    %c0_i32_0 = arith.constant 0 : i32
    %c0_i32_1 = arith.constant 0 : i32
    return %c0_i32, %c0_i32_0 : i32, i32
  }
  func.func @transform_37(%arg0: i32) -> (i32, i32) {
    %c0_i32 = arith.constant 0 : i32
    %c0_i32_0 = arith.constant 0 : i32
    %c0_i32_1 = arith.constant 0 : i32
    return %c0_i32, %c0_i32_0 : i32, i32
  }
  func.func @transform_38(%arg0: i32) -> (i32, i32) {
    %c0_i32 = arith.constant 0 : i32
    %c0_i32_0 = arith.constant 0 : i32
    %c0_i32_1 = arith.constant 0 : i32
    return %c0_i32, %c0_i32_0 : i32, i32
  }
  func.func @transform_39(%arg0: i32) -> (i32, i32) {
    %c0_i32 = arith.constant 0 : i32
    %c0_i32_0 = arith.constant 0 : i32
    %c0_i32_1 = arith.constant 0 : i32
    return %c0_i32, %c0_i32_0 : i32, i32
  }
  func.func @transform_40(%arg0: i32) -> (i32, i32) {
    %c0_i32 = arith.constant 0 : i32
    %c0_i32_0 = arith.constant 0 : i32
    return %arg0, %c0_i32 : i32, i32
  }
}

</mosaic_0001>

<bundles_post_ra>
// kernel: fwd_model.1
= control target key start
LH: loop header
LB: loop body
LE: loop exit
PB: predicated region body
PF: predicated region fallthrough
CT: control target
= control target key end

     0   :  { %s7367_s6 = smov 1   ;;  %s7368_s10 = smov 2   ;;  %s8296_s0 = inlined_call_operand.smem [shape: u32[41], index: -1, kind: input, shape index: {}] }
   0x1   :  { %s7450_s5 = sld [smem:[%s8296_s0]]   ;;  %s7369_s14 = smov 3  }
   0x2   :  { %s7455_s9 = sld [smem:[%s8296_s0 + %s7367_s6]]   ;;  %s7370_s18 = smov 4  }
   0x3   :  { %s7460_s13 = sld [smem:[%s8296_s0 + %s7368_s10]]   ;;  %s7371_s22 = smov 5  }
   0x4   :  { %s7465_s17 = sld [smem:[%s8296_s0 + %s7369_s14]]   ;;  %s7372_s26 = smov 6  }
   0x5   :  { %s7470_s21 = sld [smem:[%s8296_s0 + %s7370_s18]]   ;;  %s7373_s30 = smov 7  }
   0x6   :  { %s7475_s25 = sld [smem:[%s8296_s0 + %s7371_s22]]   ;;  %s7374_s4 = smov 8  }
   0x7   :  { %s7480_s29 = sld [smem:[%s8296_s0 + %s7372_s26]]   ;;  %s7375_s10 = smov 9  }
   0x8   :  { %8315 = sst [smem:[#allocation55_spill]] %s7455_s9  ;;  %s7376_s15 = smov 10  }
   0x9   :  { %8316 = sst [smem:[#allocation56_spill]] %s7460_s13  ;;  %s7377_s20 = smov 11  }
   0xa   :  { %8317 = sst [smem:[#allocation57_spill]] %s7465_s17  ;;  %s7378_s26 = smov 12  }
   0xb   :  { %s7485_s3 = sld [smem:[%s8296_s0 + %s7373_s30]]   ;;  %s7379_s1 = smov 13  }
   0xc   :  { %s7490_s8 = sld [smem:[%s8296_s0 + %s7374_s4]]   ;;  %s7380_s7 = smov 14  }
   0xd   :  { %8318 = sst [smem:[#allocation58_spill]] %s7480_s29  ;;  %s7382_s22 = smov 16  }
   0xe   :  { %s7495_s14 = sld [smem:[%s8296_s0 + %s7375_s10]]   ;;  %s7383_s28 = smov 17  }
   0xf   :  { %s7500_s19 = sld [smem:[%s8296_s0 + %s7376_s15]]   ;;  %s7381_s15 = smov 15  }
  0x10   :  { %s7505_s24 = sld [smem:[%s8296_s0 + %s7377_s20]]  }
  0x11   :  { %s7510_s30 = sld [smem:[%s8296_s0 + %s7378_s26]]  }
  0x12   :  { %s7515_s6 = sld [smem:[%s8296_s0 + %s7379_s1]]  }
  0x13   :  { %s7520_s12 = sld [smem:[%s8296_s0 + %s7380_s7]]   ;;  %s7384_s7 = smov 18  }
  0x14   :  { %s7525_s20 = sld [smem:[%s8296_s0 + %s7381_s15]]   ;;  %s7385_s15 = smov 19  }
  0x15   :  { %8319 = sst [smem:[#allocation59_spill]] %s7500_s19 }
  0x16   :  { %8320 = sst [smem:[#allocation60_spill]] %s7505_s24 }
  0x17   :  { %s7530_s27 = sld [smem:[%s8296_s0 + %s7382_s22]]   ;;  %s7386_s22 = smov 20  }
  0x18   :  { %8321 = sst [smem:[#allocation61_spill]] %s7515_s6 }
  0x19   :  { %s7535_s4 = sld [smem:[%s8296_s0 + %s7383_s28]]   ;;  %s7387_s28 = smov 21  }
  0x1a   :  { %8322 = sst [smem:[#allocation62_spill]] %s7525_s20 }
  0x1b   :  { %s7540_s19 = sld [smem:[%s8296_s0 + %s7384_s7]]   ;;  %s7388_s7 = smov 22  }
  0x1c   :  { %s7545_s29 = sld [smem:[%s8296_s0 + %s7385_s15]]   ;;  %s7389_s15 = smov 23  }
  0x1d   :  { %s7550_s17 = sld [smem:[%s8296_s0 + %s7386_s22]]   ;;  %s7390_s22 = smov 24  }
  0x1e   :  { %s7555_s9 = sld [smem:[%s8296_s0 + %s7387_s28]]   ;;  %s7391_s28 = smov 25  }
  0x1f   :  { %8323 = sst [smem:[#allocation63_spill]] %s7535_s4 }
  0x20   :  { %s7565_s13 = sld [smem:[%s8296_s0 + %s7389_s15]]   ;;  %s7393_s15 = smov 27  }
  0x21   :  { %8324 = sst [smem:[#allocation64_spill]] %s7540_s19 }
  0x22   :  { %s7560_s19 = sld [smem:[%s8296_s0 + %s7388_s7]]   ;;  %s7392_s7 = smov 26  }
  0x23   :  { %8325 = sst [smem:[#allocation65_spill]] %s7550_s17 }
  0x24   :  { %s7570_s17 = sld [smem:[%s8296_s0 + %s7390_s22]]   ;;  %s7394_s22 = smov 28  }
  0x25   :  { %s7575_s4 = sld [smem:[%s8296_s0 + %s7391_s28]]   ;;  %s7395_s28 = smov 29  }
  0x26   :  { %s7585_s20 = sld [smem:[%s8296_s0 + %s7393_s15]]   ;;  %s7397_s15 = smov 31  }
  0x28   :  { %8326 = sst [smem:[#allocation66_spill]] %s7560_s19 }
  0x29   :  { %s7580_s19 = sld [smem:[%s8296_s0 + %s7392_s7]]   ;;  %s7396_s7 = smov 30  }
  0x2a   :  { %8327 = sst [smem:[#allocation67_spill]] %s7570_s17 }
  0x2b   :  { %8328 = sst [smem:[#allocation68_spill]] %s7575_s4 }
  0x2c   :  { %8329 = sst [smem:[#allocation69_spill]] %s7585_s20 }
  0x2d   :  { %s7590_s17 = sld [smem:[%s8296_s0 + %s7394_s22]]   ;;  %s7398_s22 = smov 32  }
  0x2e   :  { %s7595_s4 = sld [smem:[%s8296_s0 + %s7395_s28]]   ;;  %s7399_s28 = smov 33  }
  0x2f   :  { %s7600_s6 = sld [smem:[%s8296_s0 + %s7396_s7]]   ;;  %s7400_s7 = smov 34  }
  0x30   :  { %s7605_s20 = sld [smem:[%s8296_s0 + %s7397_s15]]   ;;  %s7401_s15 = smov 35  }
  0x31   :  { %s7610_s24 = sld [smem:[%s8296_s0 + %s7398_s22]]   ;;  %s7402_s22 = smov 36  }
  0x34   :  { %8330 = sst [smem:[#allocation70_spill]] %s7595_s4 }
  0x35   :  { %8331 = sst [smem:[#allocation71_spill]] %s7600_s6 }
  0x36   :  { %8332 = sst [smem:[#allocation72_spill]] %s7605_s20 }
  0x37   :  { %8333 = sst [smem:[#allocation73_spill]] %s7610_s24 }
  0x38   :  { %s7615_s4 = sld [smem:[%s8296_s0 + %s7399_s28]]   ;;  %s7403_s28 = smov 37  }
  0x39   :  { %s7620_s6 = sld [smem:[%s8296_s0 + %s7400_s7]]   ;;  %s7404_s7 = smov 38  }
  0x3a   :  { %s7625_s20 = sld [smem:[%s8296_s0 + %s7401_s15]]   ;;  %s7405_s15 = smov 39  }
  0x3b   :  { %s7630_s24 = sld [smem:[%s8296_s0 + %s7402_s22]]   ;;  %s7406_s22 = smov 40  }
  0x3e   :  { %8334 = sst [smem:[#allocation74_spill]] %s7615_s4 }
  0x3f   :  { %8335 = sst [smem:[#allocation75_spill]] %s7620_s6 }
  0x40   :  { %8336 = sst [smem:[#allocation76_spill]] %s7625_s20 }
  0x41   :  { %8337 = sst [smem:[#allocation77_spill]] %s7630_s24 }
  0x42   :  { %s7635_s4 = sld [smem:[%s8296_s0 + %s7403_s28]]  }
  0x43   :  { %s7640_s6 = sld [smem:[%s8296_s0 + %s7404_s7]]  }
  0x44   :  { %s7645_s20 = sld [smem:[%s8296_s0 + %s7405_s15]]  }
  0x45   :  { %s7650_s24 = sld [smem:[%s8296_s0 + %s7406_s22]]  }
  0x46   :  { %86 = vsyncpa [#allocation3], 0 }
  0x47   :  { %87 = vsyncpa [#allocation6], 0 }
  0x48   :  { %88 = vsyncpa [#allocation9], 0 }
  0x49   :  { %89 = vsyncpa [#allocation12], 0 }
  0x4a   :  { %90 = vsyncpa [#allocation15], 0 }
  0x4b   :  { %91 = vsyncpa [#allocation18], 0 }
  0x4c   :  { %92 = vsyncpa [#allocation21], 0 }
  0x4d   :  { %93 = vsyncpa [#allocation24], 0 }
  0x4e   :  { %94 = vsyncpa [#allocation27], 0 }
  0x4f   :  { %95 = vsyncpa [#allocation30], 0 }
  0x50   :  { %96 = vsyncpa [#allocation33], 0 }
  0x51   :  { %97 = vsyncpa [#allocation36], 0 }
  0x52   :  { %98 = vsyncpa [#allocation39], 0 }
  0x53   :  { %99 = vsyncpa [#allocation4], 0  ;;  %s7407_s28 = smov [#allocation5]   ;;  %s6789_s1 = scalar_lea.hbm %s7470_s21, 1600 }
  0x54   :  { %s121_s0 = sshll.u32 %s7407_s28, 4  ;;  %p6790_p0 = scmp.ne.s32.totalorder %s7470_s21, %s6789_s1  ;;  %s122_s0 = int_to_ptr.vmem [resolvable:$true] %s121_s0 }
  0x55   :  { %p6793_p1 = scmp.lt.u32.totalorder %s6789_s1, %s7470_s21 }
  0x57   :  { %p6795_p2 = pnand %p6793_p1, %p6790_p0 }
  0x59   :  { %6798 = shalt.err (!%p6795_p2)
}
  0x5a   :  { %s6799_s2 = scalar_lea.vmem %s122_s0, 1600  ;;  %p6804_p4 = scmp.lt.s32.totalorder %s122_s0, %s122_s0 }
  0x5b   :  { %p6800_p3 = scmp.ne.s32.totalorder %s122_s0, %s6799_s2  ;;  %p6805_p5 = scmp.lt.s32.totalorder %s6799_s2, %s6799_s2 }
  0x5d   :  { %p6806_p6 = por %p6805_p5, %p6804_p4 }
  0x5f   :  { %p6807_p7 = pnand %p6806_p6, %p6800_p3 }
  0x61   :  { %6810 = shalt.err (!%p6807_p7)
}
  0x62   :  { %s7408_s7 = smov 64   ;;  %s7409_s10 = smov 4  }
  0x63   :  { %127 = dma.hbm_to_vmem [thread:$0]  %s7470_s21, 1600, %s122_s0, [#allocation6], %s7408_s7, %s7408_s7, %s7409_s10  }
  0x64   :  { %s7410_s11 = smov [#allocation8]   ;;  %s7411_s16 = smov [#allocation11]  }
  0x65   :  { %s146_s15 = sshll.u32 %s7410_s11, 4  ;;  %s168_s18 = sshll.u32 %s7411_s16, 4  ;;  %s147_s15 = int_to_ptr.vmem [resolvable:$true] %s146_s15  ;;  %s169_s18 = int_to_ptr.vmem [resolvable:$true] %s168_s18 }
  0x66   :  { %s6811_s22 = scalar_lea.hbm %s7485_s3, 32 }
  0x67   :  { %p6812_p8 = scmp.ne.s32.totalorder %s7485_s3, %s6811_s22  ;;  %p6815_p9 = scmp.lt.u32.totalorder %s6811_s22, %s7485_s3 }
  0x69   :  { %p6817_p10 = pnand %p6815_p9, %p6812_p8 }
  0x6b   :  { %6820 = shalt.err (!%p6817_p10)
}
  0x6c   :  { %s6821_s23 = scalar_lea.vmem %s147_s15, 32  ;;  %p6826_p12 = scmp.lt.s32.totalorder %s147_s15, %s147_s15 }
  0x6d   :  { %p6822_p11 = scmp.ne.s32.totalorder %s147_s15, %s6821_s23  ;;  %p6827_p13 = scmp.lt.s32.totalorder %s6821_s23, %s6821_s23 }
  0x6f   :  { %p6828_p0 = por %p6827_p13, %p6826_p12 }
  0x71   :  { %p6829_p1 = pnand %p6828_p0, %p6822_p11 }
  0x73   :  { %6832 = shalt.err (!%p6829_p1)
}
  0x74   :  { %149 = dma.hbm_to_vmem [thread:$0]  %s7485_s3, 32, %s147_s15, [#allocation9]  }
  0x75   :  { %s6833_s21 = scalar_lea.hbm %s7495_s14, 48 }
  0x76   :  { %p6834_p2 = scmp.ne.s32.totalorder %s7495_s14, %s6833_s21  ;;  %p6837_p3 = scmp.lt.u32.totalorder %s6833_s21, %s7495_s14 }
  0x78   :  { %p6839_p4 = pnand %p6837_p3, %p6834_p2 }
  0x7a   :  { %6842 = shalt.err (!%p6839_p4)
}
  0x7b   :  { %s6843_s26 = scalar_lea.vmem %s169_s18, 48  ;;  %s6847_s28 = scalar_lea.vmem %s169_s18, 64 }
  0x7c   :  { %p6844_p5 = scmp.ne.s32.totalorder %s169_s18, %s6843_s26  ;;  %p6848_p6 = scmp.lt.s32.totalorder %s169_s18, %s169_s18 }
  0x7d   :  { %p6849_p7 = scmp.lt.s32.totalorder %s6847_s28, %s6843_s26 }
  0x7f   :  { %p6850_p8 = por %p6849_p7, %p6848_p6 }
  0x81   :  { %p6851_p9 = pnand %p6850_p8, %p6844_p5 }
  0x83   :  { %6854 = shalt.err (!%p6851_p9)
}
  0x84   :  { %171 = dma.hbm_to_vmem [thread:$0]  %s7495_s14, 48, %s169_s18, [#allocation12]  }
  0x85   :  { %s7412_s3 = smov [#allocation14]   ;;  %s6855_s1 = scalar_lea.hbm %s7510_s30, 6144 }
  0x86   :  { %s189_s0 = sshll.u32 %s7412_s3, 4  ;;  %p6856_p10 = scmp.ne.s32.totalorder %s7510_s30, %s6855_s1  ;;  %s190_s0 = int_to_ptr.vmem [resolvable:$true] %s189_s0 }
  0x87   :  { %p6859_p11 = scmp.lt.u32.totalorder %s6855_s1, %s7510_s30 }
  0x89   :  { %p6861_p12 = pnand %p6859_p11, %p6856_p10 }
  0x8b   :  { %6864 = shalt.err (!%p6861_p12)
}
  0x8c   :  { %s6865_s2 = scalar_lea.vmem %s190_s0, 6144  ;;  %p6870_p0 = scmp.lt.s32.totalorder %s190_s0, %s190_s0 }
  0x8d   :  { %p6866_p13 = scmp.ne.s32.totalorder %s190_s0, %s6865_s2  ;;  %p6871_p1 = scmp.lt.s32.totalorder %s6865_s2, %s6865_s2 }
  0x8f   :  { %p6872_p2 = por %p6871_p1, %p6870_p0 }
  0x91   :  { %p6873_p3 = pnand %p6872_p2, %p6866_p13 }
  0x93   :  { %6876 = shalt.err (!%p6873_p3)
}
  0x94   :  { %s7413_s11 = smov 128   ;;  %s7414_s14 = smov 8  }
  0x95   :  { %195 = dma.hbm_to_vmem [thread:$0]  %s7510_s30, 6144, %s190_s0, [#allocation15], %s7413_s11, %s7413_s11, %s7414_s14  }
  0x96   :  { %s7415_s15 = smov [#allocation17]   ;;  %s7416_s18 = smov [#allocation20]  }
  0x97   :  { %s211_s16 = sshll.u32 %s7415_s15, 4  ;;  %s233_s22 = sshll.u32 %s7416_s18, 4  ;;  %s212_s16 = int_to_ptr.vmem [resolvable:$true] %s211_s16  ;;  %s7674_s22 = int_to_ptr.vmem [resolvable:$true] %s233_s22 }
  0x98   :  { %s6877_s23 = scalar_lea.hbm %s7520_s12, 4096 }
  0x99   :  { %p6878_p4 = scmp.ne.s32.totalorder %s7520_s12, %s6877_s23  ;;  %p6881_p5 = scmp.lt.u32.totalorder %s6877_s23, %s7520_s12 }
  0x9b   :  { %p6883_p6 = pnand %p6881_p5, %p6878_p4 }
  0x9d   :  { %6886 = shalt.err (!%p6883_p6)
}
  0x9e   :  { %s6887_s21 = scalar_lea.vmem %s212_s16, 4096  ;;  %p6892_p8 = scmp.lt.s32.totalorder %s212_s16, %s212_s16 }
  0x9f   :  { %p6888_p7 = scmp.ne.s32.totalorder %s212_s16, %s6887_s21  ;;  %p6893_p9 = scmp.lt.s32.totalorder %s6887_s21, %s6887_s21 }
  0xa1   :  { %p6894_p10 = por %p6893_p9, %p6892_p8 }
  0xa3   :  { %p6895_p11 = pnand %p6894_p10, %p6888_p7 }
  0xa5   :  { %6898 = shalt.err (!%p6895_p11)
}
  0xa6   :  { %217 = dma.hbm_to_vmem [thread:$0]  %s7520_s12, 4096, %s212_s16, [#allocation18], %s7413_s11, %s7413_s11, %s7414_s14  }
  0xa7   :  { %s6899_s30 = scalar_lea.hbm %s7530_s27, 4096 }
  0xa8   :  { %p6900_p12 = scmp.ne.s32.totalorder %s7530_s27, %s6899_s30  ;;  %p6903_p13 = scmp.lt.u32.totalorder %s6899_s30, %s7530_s27 }
  0xaa   :  { %p6905_p0 = pnand %p6903_p13, %p6900_p12 }
  0xac   :  { %6908 = shalt.err (!%p6905_p0)
}
  0xad   :  { %s6909_s26 = scalar_lea.vmem %s7674_s22, 4096  ;;  %p6914_p2 = scmp.lt.s32.totalorder %s7674_s22, %s7674_s22 }
  0xae   :  { %p6910_p1 = scmp.ne.s32.totalorder %s7674_s22, %s6909_s26  ;;  %p6915_p3 = scmp.lt.s32.totalorder %s6909_s26, %s6909_s26 }
  0xb0   :  { %p6916_p4 = por %p6915_p3, %p6914_p2 }
  0xb2   :  { %p6917_p5 = pnand %p6916_p4, %p6910_p1 }
  0xb4   :  { %6920 = shalt.err (!%p6917_p5)
}
  0xb5   :  { %239 = dma.hbm_to_vmem [thread:$0]  %s7530_s27, 4096, %s7674_s22, [#allocation21], %s7413_s11, %s7413_s11, %s7414_s14  }
  0xb6   :  { %s7417_s12 = smov [#allocation23]   ;;  %s7418_s3 = smov [#allocation26]  }
  0xb7   :  { %s258_s28 = sshll.u32 %s7417_s12, 4  ;;  %s278_s0 = sshll.u32 %s7418_s3, 4  ;;  %s259_s28 = int_to_ptr.vmem [resolvable:$true] %s258_s28  ;;  %s279_s0 = int_to_ptr.vmem [resolvable:$true] %s278_s0 }
  0xb8   :  { %s6921_s1 = scalar_lea.hbm %s7545_s29, 32 }
  0xb9   :  { %p6922_p6 = scmp.ne.s32.totalorder %s7545_s29, %s6921_s1  ;;  %p6925_p7 = scmp.lt.u32.totalorder %s6921_s1, %s7545_s29 }
  0xbb   :  { %p6927_p8 = pnand %p6925_p7, %p6922_p6 }
  0xbd   :  { %6930 = shalt.err (!%p6927_p8)
}
  0xbe   :  { %s6931_s2 = scalar_lea.vmem %s259_s28, 32  ;;  %p6936_p10 = scmp.lt.s32.totalorder %s259_s28, %s259_s28 }
  0xbf   :  { %p6932_p9 = scmp.ne.s32.totalorder %s259_s28, %s6931_s2  ;;  %p6937_p11 = scmp.lt.s32.totalorder %s6931_s2, %s6931_s2 }
  0xc1   :  { %p6938_p12 = por %p6937_p11, %p6936_p10 }
  0xc3   :  { %p6939_p13 = pnand %p6938_p12, %p6932_p9 }
  0xc5   :  { %6942 = shalt.err (!%p6939_p13)
}
  0xc6   :  { %261 = dma.hbm_to_vmem [thread:$0]  %s7545_s29, 32, %s259_s28, [#allocation24]  }
  0xc7   :  { %s6943_s27 = scalar_lea.hbm %s7555_s9, 16 }
  0xc8   :  { %p6944_p0 = scmp.ne.s32.totalorder %s7555_s9, %s6943_s27  ;;  %p6947_p1 = scmp.lt.u32.totalorder %s6943_s27, %s7555_s9 }
  0xca   :  { %p6949_p2 = pnand %p6947_p1, %p6944_p0 }
  0xcc   :  { %6952 = shalt.err (!%p6949_p2)
}
  0xcd   :  { %s6953_s11 = scalar_lea.vmem %s279_s0, 16  ;;  %s6957_s14 = scalar_lea.vmem %s279_s0, 32 }
  0xce   :  { %p6954_p3 = scmp.ne.s32.totalorder %s279_s0, %s6953_s11  ;;  %p6958_p4 = scmp.lt.s32.totalorder %s279_s0, %s279_s0 }
  0xcf   :  { %p6959_p5 = scmp.lt.s32.totalorder %s6957_s14, %s6953_s11 }
  0xd1   :  { %p6960_p6 = por %p6959_p5, %p6958_p4 }
  0xd3   :  { %p6961_p7 = pnand %p6960_p6, %p6954_p3 }
  0xd5   :  { %6964 = shalt.err (!%p6961_p7)
}
  0xd6   :  { %281 = dma.hbm_to_vmem [thread:$0]  %s7555_s9, 16, %s279_s0, [#allocation27]  }
  0xd7   :  { %s7419_s15 = smov [#allocation29]   ;;  %s7420_s16 = smov [#allocation32]  }
  0xd8   :  { %s298_s29 = sshll.u32 %s7419_s15, 4  ;;  %s319_s18 = sshll.u32 %s7420_s16, 4  ;;  %s299_s29 = int_to_ptr.vmem [resolvable:$true] %s298_s29  ;;  %s7703_s18 = int_to_ptr.vmem [resolvable:$true] %s319_s18 }
  0xd9   :  { %s6965_s22 = scalar_lea.hbm %s7565_s13, 16 }
  0xda   :  { %p6966_p8 = scmp.ne.s32.totalorder %s7565_s13, %s6965_s22  ;;  %p6969_p9 = scmp.lt.u32.totalorder %s6965_s22, %s7565_s13 }
  0xdc   :  { %p6971_p10 = pnand %p6969_p9, %p6966_p8 }
  0xde   :  { %6974 = shalt.err (!%p6971_p10)
}
  0xdf   :  { %s6975_s23 = scalar_lea.vmem %s299_s29, 16  ;;  %s6979_s21 = scalar_lea.vmem %s299_s29, 32 }
  0xe0   :  { %p6976_p11 = scmp.ne.s32.totalorder %s299_s29, %s6975_s23  ;;  %p6980_p12 = scmp.lt.s32.totalorder %s299_s29, %s299_s29 }
  0xe1   :  { %p6981_p13 = scmp.lt.s32.totalorder %s6979_s21, %s6975_s23 }
  0xe3   :  { %p6982_p0 = por %p6981_p13, %p6980_p12 }
  0xe5   :  { %p6983_p1 = pnand %p6982_p0, %p6976_p11 }
  0xe7   :  { %6986 = shalt.err (!%p6983_p1)
}
  0xe8   :  { %301 = dma.hbm_to_vmem [thread:$0]  %s7565_s13, 16, %s299_s29, [#allocation30]  }
  0xe9   :  { %s6987_s9 = scalar_lea.hbm %s7580_s19, 192 }
  0xea   :  { %p6988_p2 = scmp.ne.s32.totalorder %s7580_s19, %s6987_s9  ;;  %p6991_p3 = scmp.lt.u32.totalorder %s6987_s9, %s7580_s19 }
  0xec   :  { %p6993_p4 = pnand %p6991_p3, %p6988_p2 }
  0xee   :  { %6996 = shalt.err (!%p6993_p4)
}
  0xef   :  { %s6997_s30 = scalar_lea.vmem %s7703_s18, 192  ;;  %p7002_p6 = scmp.lt.s32.totalorder %s7703_s18, %s7703_s18 }
  0xf0   :  { %p6998_p5 = scmp.ne.s32.totalorder %s7703_s18, %s6997_s30  ;;  %p7003_p7 = scmp.lt.s32.totalorder %s6997_s30, %s6997_s30 }
  0xf2   :  { %p7004_p8 = por %p7003_p7, %p7002_p6 }
  0xf4   :  { %p7005_p9 = pnand %p7004_p8, %p6998_p5 }
  0xf6   :  { %7008 = shalt.err (!%p7005_p9)
}
  0xf7   :  { %325 = dma.hbm_to_vmem [thread:$0]  %s7580_s19, 192, %s7703_s18, [#allocation33], %s7408_s7, %s7408_s7, %s7409_s10  }
  0xf8   :  { %s7421_s13 = smov [#allocation35]   ;;  %s7422_s12 = smov [#allocation2]  }
  0xf9   :  { %s341_s26 = sshll.u32 %s7421_s13, 4  ;;  %s106_s28 = sshll.u32 %s7422_s12, 4  ;;  %s342_s26 = int_to_ptr.vmem [resolvable:$true] %s341_s26  ;;  %s107_s28 = int_to_ptr.vmem [resolvable:$true] %s106_s28 }
  0xfa   :  { %s7009_s3 = scalar_lea.hbm %s7590_s17, 384 }
  0xfb   :  { %p7010_p10 = scmp.ne.s32.totalorder %s7590_s17, %s7009_s3  ;;  %p7013_p11 = scmp.lt.u32.totalorder %s7009_s3, %s7590_s17 }
  0xfd   :  { %p7015_p12 = pnand %p7013_p11, %p7010_p10 }
  0xff   :  { %7018 = shalt.err (!%p7015_p12)
}
 0x100   :  { %s7019_s0 = scalar_lea.vmem %s342_s26, 384  ;;  %p7024_p0 = scmp.lt.s32.totalorder %s342_s26, %s342_s26 }
 0x101   :  { %p7020_p13 = scmp.ne.s32.totalorder %s342_s26, %s7019_s0  ;;  %p7025_p1 = scmp.lt.s32.totalorder %s7019_s0, %s7019_s0 }
 0x103   :  { %p7026_p2 = por %p7025_p1, %p7024_p0 }
 0x105   :  { %p7027_p3 = pnand %p7026_p2, %p7020_p13 }
 0x107   :  { %7030 = shalt.err (!%p7027_p3)
}
 0x108   :  { %347 = dma.hbm_to_vmem [thread:$0]  %s7590_s17, 384, %s342_s26, [#allocation36], %s7408_s7, %s7408_s7, %s7409_s10  }
 0x109   :  { %s7031_s19 = scalar_lea.hbm %s7450_s5, 640 }
 0x10a   :  { %p7032_p4 = scmp.ne.s32.totalorder %s7450_s5, %s7031_s19  ;;  %p7035_p5 = scmp.lt.u32.totalorder %s7031_s19, %s7450_s5 }
 0x10c   :  { %p7037_p6 = pnand %p7035_p5, %p7032_p4 }
 0x10e   :  { %7040 = shalt.err (!%p7037_p6)
}
 0x10f   :  { %s7041_s1 = scalar_lea.vmem %s107_s28, 640  ;;  %p7046_p8 = scmp.lt.s32.totalorder %s107_s28, %s107_s28 }
 0x110   :  { %p7042_p7 = scmp.ne.s32.totalorder %s107_s28, %s7041_s1  ;;  %p7047_p9 = scmp.lt.s32.totalorder %s7041_s1, %s7041_s1 }
 0x112   :  { %p7048_p10 = por %p7047_p9, %p7046_p8 }
 0x114   :  { %p7049_p11 = pnand %p7048_p10, %p7042_p7 }
 0x116   :  { %7052 = shalt.err (!%p7049_p11)
}
 0x117   :  { %109 = dma.hbm_to_vmem [thread:$0]  %s7450_s5, 640, %s107_s28, [#allocation3]  }
 0x118   :  { %s7423_s2 = smov [#allocation7]   ;;  %s7424_s17 = smov [#allocation10]  }
 0x119   :  { %s134_s27 = sshll.u32 %s7423_s2, 4  ;;  %s155_s7 = sshll.u32 %s7424_s17, 4  ;;  %s135_s27 = int_to_ptr.vmem [resolvable:$true] %s134_s27  ;;  %s7732_s7 = int_to_ptr.vmem [resolvable:$true] %s155_s7 }
 0x11a   :  { %s7053_s10 = scalar_lea.hbm %s7475_s25, 16 }
 0x11b   :  { %p7054_p12 = scmp.ne.s32.totalorder %s7475_s25, %s7053_s10  ;;  %p7057_p13 = scmp.lt.u32.totalorder %s7053_s10, %s7475_s25 }
 0x11d   :  { %p7059_p0 = pnand %p7057_p13, %p7054_p12 }
 0x11f   :  { %7062 = shalt.err (!%p7059_p0)
}
 0x120   :  { %s7063_s11 = scalar_lea.vmem %s135_s27, 16  ;;  %s7067_s14 = scalar_lea.vmem %s135_s27, 32 }
 0x121   :  { %p7064_p1 = scmp.ne.s32.totalorder %s135_s27, %s7063_s11  ;;  %p7068_p2 = scmp.lt.s32.totalorder %s135_s27, %s135_s27 }
 0x122   :  { %p7069_p3 = scmp.lt.s32.totalorder %s7067_s14, %s7063_s11 }
 0x124   :  { %p7070_p4 = por %p7069_p3, %p7068_p2 }
 0x126   :  { %p7071_p5 = pnand %p7070_p4, %p7064_p1 }
 0x128   :  { %7074 = shalt.err (!%p7071_p5)
}
 0x129   :  { %137 = dma.hbm_to_vmem [thread:$0]  %s7475_s25, 16, %s135_s27, [#allocation6]  }
 0x12a   :  { %s7075_s5 = scalar_lea.hbm %s7490_s8, 6144 }
 0x12b   :  { %p7076_p6 = scmp.ne.s32.totalorder %s7490_s8, %s7075_s5  ;;  %p7079_p7 = scmp.lt.u32.totalorder %s7075_s5, %s7490_s8 }
 0x12d   :  { %p7081_p8 = pnand %p7079_p7, %p7076_p6 }
 0x12f   :  { %7084 = shalt.err (!%p7081_p8)
}
 0x130   :  { %s7085_s15 = scalar_lea.vmem %s7732_s7, 6144  ;;  %p7090_p10 = scmp.lt.s32.totalorder %s7732_s7, %s7732_s7 }
 0x131   :  { %p7086_p9 = scmp.ne.s32.totalorder %s7732_s7, %s7085_s15  ;;  %p7091_p11 = scmp.lt.s32.totalorder %s7085_s15, %s7085_s15 }
 0x133   :  { %p7092_p12 = por %p7091_p11, %p7090_p10 }
 0x135   :  { %p7093_p13 = pnand %p7092_p12, %p7086_p9 }
 0x137   :  { %7096 = shalt.err (!%p7093_p13)
}
 0x138   :  { %s7425_s29 = smov 192   ;;  %s8338_s25 = sld [smem:[#allocation60_spill]] }
 0x139   :  { %s7426_s16 = smov 12   ;;  %s7427_s18 = smov [#allocation13]  }
 0x13a   :  { %161 = dma.hbm_to_vmem [thread:$0]  %s7490_s8, 6144, %s7732_s7, [#allocation9], %s7425_s29, %s7425_s29, %s7426_s16  }
 0x13b   :  { %s180_s22 = sshll.u32 %s7427_s18, 4  ;;  %s7428_s23 = smov [#allocation16]   ;;  %s181_s22 = int_to_ptr.vmem [resolvable:$true] %s180_s22 }
 0x13c   :  { %s202_s21 = sshll.u32 %s7428_s23, 4  ;;  %s203_s21 = int_to_ptr.vmem [resolvable:$true] %s202_s21 }
 0x13e   :  { %s7097_s9 = scalar_lea.hbm %s8338_s25, 48 }
 0x13f   :  { %p7098_p0 = scmp.ne.s32.totalorder %s8338_s25, %s7097_s9  ;;  %p7101_p1 = scmp.lt.u32.totalorder %s7097_s9, %s8338_s25 }
 0x141   :  { %p7103_p2 = pnand %p7101_p1, %p7098_p0 }
 0x143   :  { %7106 = shalt.err (!%p7103_p2)
}
 0x144   :  { %s7107_s30 = scalar_lea.vmem %s181_s22, 48  ;;  %s7111_s13 = scalar_lea.vmem %s181_s22, 64 }
 0x145   :  { %p7108_p3 = scmp.ne.s32.totalorder %s181_s22, %s7107_s30  ;;  %p7112_p4 = scmp.lt.s32.totalorder %s181_s22, %s181_s22 }
 0x146   :  { %p7113_p5 = scmp.lt.s32.totalorder %s7111_s13, %s7107_s30 }
 0x148   :  { %p7114_p6 = por %p7113_p5, %p7112_p4 }
 0x14a   :  { %p7115_p7 = pnand %p7114_p6, %p7108_p3 }
 0x14c   :  { %7118 = shalt.err (!%p7115_p7)
}
 0x14d   :  { %s8339_s8 = sld [smem:[#allocation61_spill]] }
 0x14e   :  { %183 = dma.hbm_to_vmem [thread:$0]  %s8338_s25, 48, %s181_s22, [#allocation12]  }
 0x153   :  { %s7119_s26 = scalar_lea.hbm %s8339_s8, 32 }
 0x154   :  { %p7120_p8 = scmp.ne.s32.totalorder %s8339_s8, %s7119_s26  ;;  %p7123_p9 = scmp.lt.u32.totalorder %s7119_s26, %s8339_s8 }
 0x156   :  { %p7125_p10 = pnand %p7123_p9, %p7120_p8 }
 0x158   :  { %7128 = shalt.err (!%p7125_p10)
}
 0x159   :  { %s7129_s12 = scalar_lea.vmem %s203_s21, 32  ;;  %p7134_p12 = scmp.lt.s32.totalorder %s203_s21, %s203_s21 }
 0x15a   :  { %p7130_p11 = scmp.ne.s32.totalorder %s203_s21, %s7129_s12  ;;  %p7135_p13 = scmp.lt.s32.totalorder %s7129_s12, %s7129_s12 }
 0x15c   :  { %p7136_p0 = por %p7135_p13, %p7134_p12 }
 0x15e   :  { %p7137_p1 = pnand %p7136_p0, %p7130_p11 }
 0x160   :  { %7140 = shalt.err (!%p7137_p1)
}
 0x161   :  { %s8340_s28 = sld [smem:[#allocation62_spill]]  ;;  %s7429_s3 = smov [#allocation19]  }
 0x162   :  { %205 = dma.hbm_to_vmem [thread:$0]  %s8339_s8, 32, %s203_s21, [#allocation15]  }
 0x163   :  { %s224_s0 = sshll.u32 %s7429_s3, 4  ;;  %s7430_s19 = smov [#allocation22]   ;;  %s225_s0 = int_to_ptr.vmem [resolvable:$true] %s224_s0 }
 0x164   :  { %s246_s1 = sshll.u32 %s7430_s19, 4  ;;  %s247_s1 = int_to_ptr.vmem [resolvable:$true] %s246_s1 }
 0x167   :  { %s7141_s2 = scalar_lea.hbm %s8340_s28, 32 }
 0x168   :  { %p7142_p2 = scmp.ne.s32.totalorder %s8340_s28, %s7141_s2  ;;  %p7145_p3 = scmp.lt.u32.totalorder %s7141_s2, %s8340_s28 }
 0x16a   :  { %p7147_p4 = pnand %p7145_p3, %p7142_p2 }
 0x16c   :  { %7150 = shalt.err (!%p7147_p4)
}
 0x16d   :  { %s7151_s27 = scalar_lea.vmem %s225_s0, 32  ;;  %p7156_p6 = scmp.lt.s32.totalorder %s225_s0, %s225_s0 }
 0x16e   :  { %p7152_p5 = scmp.ne.s32.totalorder %s225_s0, %s7151_s27  ;;  %p7157_p7 = scmp.lt.s32.totalorder %s7151_s27, %s7151_s27 }
 0x170   :  { %p7158_p8 = por %p7157_p7, %p7156_p6 }
 0x172   :  { %p7159_p9 = pnand %p7158_p8, %p7152_p5 }
 0x174   :  { %7162 = shalt.err (!%p7159_p9)
}
 0x175   :  { %s8341_s17 = sld [smem:[#allocation63_spill]] }
 0x176   :  { %227 = dma.hbm_to_vmem [thread:$0]  %s8340_s28, 32, %s225_s0, [#allocation18]  }
 0x17b   :  { %s7163_s7 = scalar_lea.hbm %s8341_s17, 32 }
 0x17c   :  { %p7164_p10 = scmp.ne.s32.totalorder %s8341_s17, %s7163_s7  ;;  %p7167_p11 = scmp.lt.u32.totalorder %s7163_s7, %s8341_s17 }
 0x17e   :  { %p7169_p12 = pnand %p7167_p11, %p7164_p10 }
 0x180   :  { %7172 = shalt.err (!%p7169_p12)
}
 0x181   :  { %s7173_s10 = scalar_lea.vmem %s247_s1, 32  ;;  %p7178_p0 = scmp.lt.s32.totalorder %s247_s1, %s247_s1 }
 0x182   :  { %p7174_p13 = scmp.ne.s32.totalorder %s247_s1, %s7173_s10  ;;  %p7179_p1 = scmp.lt.s32.totalorder %s7173_s10, %s7173_s10 }
 0x184   :  { %p7180_p2 = por %p7179_p1, %p7178_p0 }
 0x186   :  { %p7181_p3 = pnand %p7180_p2, %p7174_p13 }
 0x188   :  { %7184 = shalt.err (!%p7181_p3)
}
 0x189   :  { %s8342_s11 = sld [smem:[#allocation65_spill]]  ;;  %s7431_s14 = smov [#allocation25]  }
 0x18a   :  { %249 = dma.hbm_to_vmem [thread:$0]  %s8341_s17, 32, %s247_s1, [#allocation21]  }
 0x18b   :  { %s268_s5 = sshll.u32 %s7431_s14, 4  ;;  %s7432_s15 = smov [#allocation28]   ;;  %s269_s5 = int_to_ptr.vmem [resolvable:$true] %s268_s5 }
 0x18c   :  { %s288_s29 = sshll.u32 %s7432_s15, 4  ;;  %s289_s29 = int_to_ptr.vmem [resolvable:$true] %s288_s29 }
 0x18f   :  { %s7185_s25 = scalar_lea.hbm %s8342_s11, 32 }
 0x190   :  { %p7186_p4 = scmp.ne.s32.totalorder %s8342_s11, %s7185_s25  ;;  %p7189_p5 = scmp.lt.u32.totalorder %s7185_s25, %s8342_s11 }
 0x192   :  { %p7191_p6 = pnand %p7189_p5, %p7186_p4 }
 0x194   :  { %7194 = shalt.err (!%p7191_p6)
}
 0x195   :  { %s7195_s16 = scalar_lea.vmem %s269_s5, 32  ;;  %p7200_p8 = scmp.lt.s32.totalorder %s269_s5, %s269_s5 }
 0x196   :  { %p7196_p7 = scmp.ne.s32.totalorder %s269_s5, %s7195_s16  ;;  %p7201_p9 = scmp.lt.s32.totalorder %s7195_s16, %s7195_s16 }
 0x198   :  { %p7202_p10 = por %p7201_p9, %p7200_p8 }
 0x19a   :  { %p7203_p11 = pnand %p7202_p10, %p7196_p7 }
 0x19c   :  { %7206 = shalt.err (!%p7203_p11)
}
 0x19d   :  { %s8343_s18 = sld [smem:[#allocation66_spill]] }
 0x19e   :  { %271 = dma.hbm_to_vmem [thread:$0]  %s8342_s11, 32, %s269_s5, [#allocation24]  }
 0x1a3   :  { %s7207_s22 = scalar_lea.hbm %s8343_s18, 64 }
 0x1a4   :  { %p7208_p12 = scmp.ne.s32.totalorder %s8343_s18, %s7207_s22  ;;  %p7211_p13 = scmp.lt.u32.totalorder %s7207_s22, %s8343_s18 }
 0x1a6   :  { %p7213_p0 = pnand %p7211_p13, %p7208_p12 }
 0x1a8   :  { %7216 = shalt.err (!%p7213_p0)
}
 0x1a9   :  { %s7217_s23 = scalar_lea.vmem %s289_s29, 64  ;;  %p7222_p2 = scmp.lt.s32.totalorder %s289_s29, %s289_s29 }
 0x1aa   :  { %p7218_p1 = scmp.ne.s32.totalorder %s289_s29, %s7217_s23  ;;  %p7223_p3 = scmp.lt.s32.totalorder %s7217_s23, %s7217_s23 }
 0x1ac   :  { %p7224_p4 = por %p7223_p3, %p7222_p2 }
 0x1ae   :  { %p7225_p5 = pnand %p7224_p4, %p7218_p1 }
 0x1b0   :  { %7228 = shalt.err (!%p7225_p5)
}
 0x1b1   :  { %s8344_s21 = sld [smem:[#allocation68_spill]]  ;;  %s7433_s9 = smov [#allocation31]  }
 0x1b2   :  { %291 = dma.hbm_to_vmem [thread:$0]  %s8343_s18, 64, %s289_s29, [#allocation27]  }
 0x1b3   :  { %s310_s30 = sshll.u32 %s7433_s9, 4  ;;  %s7434_s13 = smov [#allocation34]   ;;  %s311_s30 = int_to_ptr.vmem [resolvable:$true] %s310_s30 }
 0x1b4   :  { %s332_s8 = sshll.u32 %s7434_s13, 4  ;;  %s333_s8 = int_to_ptr.vmem [resolvable:$true] %s332_s8 }
 0x1b7   :  { %s7229_s26 = scalar_lea.hbm %s8344_s21, 16 }
 0x1b8   :  { %p7230_p6 = scmp.ne.s32.totalorder %s8344_s21, %s7229_s26  ;;  %p7233_p7 = scmp.lt.u32.totalorder %s7229_s26, %s8344_s21 }
 0x1ba   :  { %p7235_p8 = pnand %p7233_p7, %p7230_p6 }
 0x1bc   :  { %7238 = shalt.err (!%p7235_p8)
}
 0x1bd   :  { %s7239_s12 = scalar_lea.vmem %s311_s30, 16  ;;  %s7243_s28 = scalar_lea.vmem %s311_s30, 32 }
 0x1be   :  { %p7240_p9 = scmp.ne.s32.totalorder %s311_s30, %s7239_s12  ;;  %p7244_p10 = scmp.lt.s32.totalorder %s311_s30, %s311_s30 }
 0x1bf   :  { %p7245_p11 = scmp.lt.s32.totalorder %s7243_s28, %s7239_s12 }
 0x1c1   :  { %p7246_p12 = por %p7245_p11, %p7244_p10 }
 0x1c3   :  { %p7247_p13 = pnand %p7246_p12, %p7240_p9 }
 0x1c5   :  { %7250 = shalt.err (!%p7247_p13)
}
 0x1c6   :  { %s8345_s3 = sld [smem:[#allocation69_spill]] }
 0x1c7   :  { %313 = dma.hbm_to_vmem [thread:$0]  %s8344_s21, 16, %s311_s30, [#allocation30]  }
 0x1cc   :  { %s7251_s0 = scalar_lea.hbm %s8345_s3, 16 }
 0x1cd   :  { %p7252_p0 = scmp.ne.s32.totalorder %s8345_s3, %s7251_s0  ;;  %p7255_p1 = scmp.lt.u32.totalorder %s7251_s0, %s8345_s3 }
 0x1cf   :  { %p7257_p2 = pnand %p7255_p1, %p7252_p0 }
 0x1d1   :  { %7260 = shalt.err (!%p7257_p2)
}
 0x1d2   :  { %s7261_s19 = scalar_lea.vmem %s333_s8, 16  ;;  %s7265_s1 = scalar_lea.vmem %s333_s8, 32 }
 0x1d3   :  { %p7262_p3 = scmp.ne.s32.totalorder %s333_s8, %s7261_s19  ;;  %p7266_p4 = scmp.lt.s32.totalorder %s333_s8, %s333_s8 }
 0x1d4   :  { %p7267_p5 = scmp.lt.s32.totalorder %s7265_s1, %s7261_s19 }
 0x1d6   :  { %p7268_p6 = por %p7267_p5, %p7266_p4 }
 0x1d8   :  { %p7269_p7 = pnand %p7268_p6, %p7262_p3 }
 0x1da   :  { %7272 = shalt.err (!%p7269_p7)
}
 0x1db   :  { %s8346_s2 = sld [smem:[#allocation70_spill]]  ;;  %s7435_s27 = smov [#allocation37]  }
 0x1dc   :  { %335 = dma.hbm_to_vmem [thread:$0]  %s8345_s3, 16, %s333_s8, [#allocation33]  }
 0x1dd   :  { %s354_s17 = sshll.u32 %s7435_s27, 4  ;;  %s7436_s7 = smov [#allocation38]   ;;  %s355_s17 = int_to_ptr.vmem [resolvable:$true] %s354_s17 }
 0x1de   :  { %s366_s10 = sshll.u32 %s7436_s7, 4  ;;  %s367_s10 = int_to_ptr.vmem [resolvable:$true] %s366_s10 }
 0x1e1   :  { %s7273_s11 = scalar_lea.hbm %s8346_s2, 16 }
 0x1e2   :  { %p7274_p8 = scmp.ne.s32.totalorder %s8346_s2, %s7273_s11  ;;  %p7277_p9 = scmp.lt.u32.totalorder %s7273_s11, %s8346_s2 }
 0x1e4   :  { %p7279_p10 = pnand %p7277_p9, %p7274_p8 }
 0x1e6   :  { %7282 = shalt.err (!%p7279_p10)
}
 0x1e7   :  { %s7283_s14 = scalar_lea.vmem %s355_s17, 16  ;;  %s7287_s5 = scalar_lea.vmem %s355_s17, 32 }
 0x1e8   :  { %p7284_p11 = scmp.ne.s32.totalorder %s355_s17, %s7283_s14  ;;  %p7288_p12 = scmp.lt.s32.totalorder %s355_s17, %s355_s17 }
 0x1e9   :  { %p7289_p13 = scmp.lt.s32.totalorder %s7287_s5, %s7283_s14 }
 0x1eb   :  { %p7290_p0 = por %p7289_p13, %p7288_p12 }
 0x1ed   :  { %p7291_p1 = pnand %p7290_p0, %p7284_p11 }
 0x1ef   :  { %7294 = shalt.err (!%p7291_p1)
}
 0x1f0   :  { %s8347_s15 = sld [smem:[#allocation72_spill]] }
 0x1f1   :  { %357 = dma.hbm_to_vmem [thread:$0]  %s8346_s2, 16, %s355_s17, [#allocation36]  }
 0x1f6   :  { %s7295_s29 = scalar_lea.hbm %s8347_s15, 16 }
 0x1f7   :  { %p7296_p2 = scmp.ne.s32.totalorder %s8347_s15, %s7295_s29  ;;  %p7299_p3 = scmp.lt.u32.totalorder %s7295_s29, %s8347_s15 }
 0x1f9   :  { %p7301_p4 = pnand %p7299_p3, %p7296_p2 }
 0x1fb   :  { %7304 = shalt.err (!%p7301_p4)
}
 0x1fc   :  { %s7305_s25 = scalar_lea.vmem %s367_s10, 16  ;;  %s7309_s16 = scalar_lea.vmem %s367_s10, 32 }
 0x1fd   :  { %p7306_p5 = scmp.ne.s32.totalorder %s367_s10, %s7305_s25  ;;  %p7310_p6 = scmp.lt.s32.totalorder %s367_s10, %s367_s10 }
 0x1fe   :  { %p7311_p7 = scmp.lt.s32.totalorder %s7309_s16, %s7305_s25 }
 0x200   :  { %p7312_p8 = por %p7311_p7, %p7310_p6 }
 0x202   :  { %p7313_p9 = pnand %p7312_p8, %p7306_p5 }
 0x204   :  { %7316 = shalt.err (!%p7313_p9)
}
 0x205   :  { %369 = dma.hbm_to_vmem [thread:$0]  %s8347_s15, 16, %s367_s10, [#allocation39]  }
 0x206   :  { %7339 = dma.done.wait [#allocation3], 640  }
 0x207   :  { %7340 = vsyncadd [#allocation3], 4294966656 }
 0x208   :  { %7341 = dma.done.wait [#allocation6], 1616  }
 0x209   :  { %7342 = vsyncadd [#allocation6], 4294965680 }
 0x20a   :  { %7343 = dma.done.wait [#allocation9], 6176  }
 0x20b   :  { %7344 = vsyncadd [#allocation9], 4294961120 }
 0x20c   :  { %7345 = dma.done.wait [#allocation12], 96  }
 0x20d   :  { %7346 = vsyncadd [#allocation12], 4294967200 }
 0x20e   :  { %7347 = dma.done.wait [#allocation15], 6176  }
 0x20f   :  { %7348 = vsyncadd [#allocation15], 4294961120 }
 0x210   :  { %7349 = dma.done.wait [#allocation18], 4128  }
 0x211   :  { %7350 = vsyncadd [#allocation18], 4294963168 }
 0x212   :  { %7351 = dma.done.wait [#allocation21], 4128  }
 0x213   :  { %7352 = vsyncadd [#allocation21], 4294963168 }
 0x214   :  { %7353 = dma.done.wait [#allocation24], 64  }
 0x215   :  { %7354 = vsyncadd [#allocation24], 4294967232 }
 0x216   :  { %7355 = dma.done.wait [#allocation27], 80  }
 0x217   :  { %7356 = vsyncadd [#allocation27], 4294967216 }
 0x218   :  { %7357 = dma.done.wait [#allocation30], 32  }
 0x219   :  { %7358 = vsyncadd [#allocation30], 4294967264 }
 0x21a   :  { %7359 = dma.done.wait [#allocation33], 208  }
 0x21b   :  { %7360 = vsyncadd [#allocation33], 4294967088 }
 0x21c   :  { %7361 = dma.done.wait [#allocation36], 400  }
 0x21d   :  { %7362 = vsyncadd [#allocation36], 4294966896 }
 0x21e   :  { %7363 = dma.done.wait [#allocation39], 16  }
 0x21f   :  { %7364 = vsyncadd [#allocation39], 4294967280  ;;  %s8348_s18 = sld [smem:[#allocation56_spill]]  ;;  %v7437_v10 = vmov 0.0   ;;  %vm7438_vm0 = vmmov 0   ;;  %v460_v14 = vld [vmem:[#allocation2 + $0x8] sm:$0xff] }
 0x220   :  { %5886 = vmatprep.subr.bf16.mxu1 %v7437_v10  ;;  %5888 = vmatprep.mubr.msk.bf16.mxu1 %vm7438_vm0, %v7437_v10  ;;  %v465_v15 = vpack.c.bf16 %v460_v14, %v460_v14  ;;  %s8349_s22 = sld [smem:[#allocation55_spill]]  ;;  %vm1039_vm1 = vcmask 1040384   ;;  %vm1040_vm2 = vcmask 1041408   ;;  %v7439_v26 = vmov 65535   ;;  %v1027_v32 = vld [vmem:[#allocation25] sm:$0x3] }
 0x221   :  { %v1041_v27 = vsel %vm1039_vm1, 4294967295, %v7439_v26  ;;  %vm1035_vm3 = vcmask 23552   ;;  %v6217_v37 = vld [vmem:[#allocation5] sm:$0xff]   ;;  %v7440_v39 = vmov 0   ;;  %v6218_v41 = vld [vmem:[#allocation5 + $0x8] sm:$0xff]   ;;  %v459_v45 = vld [vmem:[#allocation2] sm:$0xff] }
 0x222   :  { %932 = vmatprep.mubr.bf16.mxu0 %v465_v15  ;;  %v1042_v30 = vsel %vm1040_vm2, %v1041_v27, 0  ;;  %v6219_v47 = vld [vmem:[#allocation5 + $0x10] sm:$0xff]   ;;  %v6220_v49 = vld [vmem:[#allocation5 + $0x18] sm:$0xff]   ;;  %v464_v51 = vpack.c.bf16 %v459_v45, %v459_v45  ;;  %v6221_v54 = vld [vmem:[#allocation5 + $0x20] sm:$0xff]   ;;  %vm893_vm4 = vcmask 1045504   ;;  %vm889_vm5 = vcmask 228352  }
 0x223   :  { %v1044_v35 = vand.u32 %v1042_v30, %v1027_v32  ;;  %v462_v48 = vld [vmem:[#allocation2 + $0x18] sm:$0xff]  ;;  %v6222_v57 = vld [vmem:[#allocation5 + $0x28] sm:$0xff]   ;;  %v6224_v63 = vld [vmem:[#allocation5 + $0x38] sm:$0xff]   ;;  %s8350_s23 = sld [smem:[#allocation57_spill]]  ;;  %vm1199_vm6 = vcmask 1043456   ;;  %s8351_s21 = sld [smem:[#allocation58_spill]] }
 0x224   :  { %v467_v53 = vpack.c.bf16 %v462_v48, %v462_v48  ;;  %v6223_v60 = vld [vmem:[#allocation5 + $0x30] sm:$0xff]   ;;  %v461_v27 = vld [vmem:[#allocation2 + $0x10] sm:$0xff]  ;;  %vm1257_vm7 = vcmask 1042432   ;;  %vm1195_vm8 = vcmask 588800   ;;  %vm1253_vm9 = vcmask 48128   ;;  %s8352_s9 = sld [smem:[#allocation67_spill]] }
 0x225   :  { %v6115_v0 = vld [vmem:[%s8348_s18 + $0x4] ss:$8 sps:$4 sm:$0xff]   ;;  %v6117_v1 = vld [vmem:[%s8348_s18] ss:$8 sps:$4 sm:$0xff]   ;;  %v6118_v2 = vld [vmem:[%s8348_s18 + $0x14] ss:$8 sps:$4 sm:$0xff]   ;;  %5887 = vmatpush3.bf16.msra.mxu1 %v1044_v35  ;;  %v466_v30 = vpack.c.bf16 %v461_v27, %v461_v27 }
 0x226   :  { %900 = vmatprep.subr.bf16.mxu0 %v6115_v0  ;;  %v6120_v3 = vld [vmem:[%s8348_s18 + $0x10] ss:$8 sps:$4 sm:$0xff]   ;;  %v6121_v4 = vld [vmem:[%s8348_s18 + $0x24] ss:$8 sps:$4 sm:$0xff]   ;;  %v6123_v5 = vld [vmem:[%s8348_s18 + $0x20] ss:$8 sps:$4 sm:$0xff]   ;;  %1203 = vmatprep.subr.bf16.mxu1 %v7440_v39 }
 0x227   :  { %901 = vmatpush1.bf16.msra.mxu0 %v6117_v1  ;;  %v6124_v6 = vld [vmem:[%s8348_s18 + $0x34] ss:$8 sps:$4 sm:$0xff]   ;;  %v6126_v7 = vld [vmem:[%s8348_s18 + $0x30] ss:$8 sps:$4 sm:$0xff]   ;;  %v6127_v8 = vld [vmem:[%s8348_s18 + $0x44] ss:$8 sps:$4 sm:$0xff]  }
 0x228   :  { %902 = vmatprep.subr.bf16.mxu0 %v6118_v2  ;;  %v6129_v9 = vld [vmem:[%s8348_s18 + $0x40] ss:$8 sps:$4 sm:$0xff]   ;;  %v6130_v11 = vld [vmem:[%s8348_s18 + $0x54] ss:$8 sps:$4 sm:$0xff]   ;;  %v6132_v12 = vld [vmem:[%s8348_s18 + $0x50] ss:$8 sps:$4 sm:$0xff]  }
 0x229   :  { %v6133_v13 = vld [vmem:[%s8348_s18 + $0x64] ss:$8 sps:$4 sm:$0xff]   ;;  %v6135_v16 = vld [vmem:[%s8348_s18 + $0x60] ss:$8 sps:$4 sm:$0xff]   ;;  %v6136_v17 = vld [vmem:[%s8348_s18 + $0x74] ss:$8 sps:$4 sm:$0xff]  }
 0x22a   :  { %v6138_v18 = vld [vmem:[%s8348_s18 + $0x70] ss:$8 sps:$4 sm:$0xff]   ;;  %v6139_v19 = vld [vmem:[%s8348_s18 + $0x84] ss:$8 sps:$4 sm:$0xff]   ;;  %v6141_v20 = vld [vmem:[%s8348_s18 + $0x80] ss:$8 sps:$4 sm:$0xff]  }
 0x22b   :  { %903 = vmatpush1.bf16.msra.mxu0 %v6120_v3  ;;  %v6142_v21 = vld [vmem:[%s8348_s18 + $0x94] ss:$8 sps:$4 sm:$0xff]   ;;  %v6144_v22 = vld [vmem:[%s8348_s18 + $0x90] ss:$8 sps:$4 sm:$0xff]   ;;  %v6145_v23 = vld [vmem:[%s8348_s18 + $0xa4] ss:$8 sps:$4 sm:$0xff]  }
 0x22c   :  { %904 = vmatprep.subr.bf16.mxu0 %v6121_v4  ;;  %v6147_v24 = vld [vmem:[%s8348_s18 + $0xa0] ss:$8 sps:$4 sm:$0xff]   ;;  %v6148_v25 = vld [vmem:[%s8348_s18 + $0xb4] ss:$8 sps:$4 sm:$0xff]   ;;  %v6150_v28 = vld [vmem:[%s8348_s18 + $0xb0] ss:$8 sps:$4 sm:$0xff]  }
 0x22d   :  { %v6151_v29 = vld [vmem:[%s8348_s18 + $0xc4] ss:$8 sps:$4 sm:$0xff]   ;;  %v6153_v31 = vld [vmem:[%s8348_s18 + $0xc0] ss:$8 sps:$4 sm:$0xff]   ;;  %v6154_v34 = vld [vmem:[%s8348_s18 + $0xd4] ss:$8 sps:$4 sm:$0xff]  }
 0x22e   :  { %v469_v33 = vld [vmem:[%s8349_s22] sm:$0xff]  ;;  %v6156_v38 = vld [vmem:[%s8348_s18 + $0xd0] ss:$8 sps:$4 sm:$0xff]   ;;  %v6160_v43 = vld [vmem:[%s8348_s18 + $0xf4] ss:$8 sps:$4 sm:$0xff]   ;;  %vm1393_vm10 = vcmask 818176  }
 0x22f   :  { %905 = vmatpush1.bf16.msra.mxu0 %v6123_v5  ;;  %v470_v36 = vpack.c.bf16 %v469_v33, %v469_v33  ;;  %v6157_v40 = vld [vmem:[%s8348_s18 + $0xe4] ss:$8 sps:$4 sm:$0xff]   ;;  %v6159_v42 = vld [vmem:[%s8348_s18 + $0xe0] ss:$8 sps:$4 sm:$0xff]   ;;  %v6162_v44 = vld [vmem:[%s8348_s18 + $0xf0] ss:$8 sps:$4 sm:$0xff]  }
 0x230   :  { %906 = vmatprep.subr.bf16.mxu0 %v6124_v6  ;;  %v6165_v46 = vld [vmem:[%s8348_s18 + $0x104] ss:$8 sps:$4 sm:$0xff]   ;;  %v6163_v50 = vld [vmem:[%s8348_s18 + $0x100] ss:$8 sps:$4 sm:$0xff]   ;;  %v6168_v52 = vld [vmem:[%s8348_s18 + $0x114] ss:$8 sps:$4 sm:$0xff]  }
 0x231   :  { %5889 = vmatmul.mubr.msk.bf16.vlgmr.msra.gmra.mrb[0].mxu1 %vm1035_vm3, %v470_v36  ;;  %v6166_v55 = vld [vmem:[%s8348_s18 + $0x110] ss:$8 sps:$4 sm:$0xff]   ;;  %v6171_v56 = vld [vmem:[%s8348_s18 + $0x124] ss:$8 sps:$4 sm:$0xff]   ;;  %v6169_v58 = vld [vmem:[%s8348_s18 + $0x120] ss:$8 sps:$4 sm:$0xff]  }
 0x232   :  { %1204 = vmatpush1.bf16.msra.mxu1 %v6217_v37  ;;  %v6174_v59 = vld [vmem:[%s8348_s18 + $0x134] ss:$8 sps:$4 sm:$0xff]   ;;  %v6172_v61 = vld [vmem:[%s8348_s18 + $0x130] ss:$8 sps:$4 sm:$0xff]   ;;  %v6177_v62 = vld [vmem:[%s8348_s18 + $0x144] ss:$8 sps:$4 sm:$0xff]  }
 0x233   :  { %907 = vmatpush1.bf16.msra.mxu0 %v6126_v7  ;;  %1205 = vmatprep.subr.bf16.mxu1 %v7440_v39  ;;  %v6175_v0 = vld [vmem:[%s8348_s18 + $0x140] ss:$8 sps:$4 sm:$0xff]   ;;  %v6180_v1 = vld [vmem:[%s8348_s18 + $0x154] ss:$8 sps:$4 sm:$0xff]   ;;  %v6178_v3 = vld [vmem:[%s8348_s18 + $0x150] ss:$8 sps:$4 sm:$0xff]  }
 0x234   :  { %908 = vmatprep.subr.bf16.mxu0 %v6127_v8  ;;  %v6225_v2 = vld [vmem:[#allocation5 + $0x40] sm:$0xff]   ;;  %v6226_v5 = vld [vmem:[#allocation5 + $0x48] sm:$0xff]   ;;  %v6227_v8 = vld [vmem:[#allocation5 + $0x50] sm:$0xff]   ;;  %vm1462_vm11 = vcmask 97280   ;;  %s8353_s30 = sld [smem:[#allocation59_spill]]  ;;  %vm1954_vm12 = vcmask 195584  }
 0x235   :  { %v6183_v4 = vld [vmem:[%s8348_s18 + $0x164] ss:$8 sps:$4 sm:$0xff]   ;;  %v6181_v6 = vld [vmem:[%s8348_s18 + $0x160] ss:$8 sps:$4 sm:$0xff]   ;;  %v6186_v7 = vld [vmem:[%s8348_s18 + $0x174] ss:$8 sps:$4 sm:$0xff]  }
 0x236   :  { %1206 = vmatpush1.bf16.msra.mxu1 %v6218_v41  ;;  %v6190_v14 = vld [vmem:[%s8348_s18 + $0x190] ss:$8 sps:$4 sm:$0xff]   ;;  %v6195_v15 = vld [vmem:[%s8348_s18 + $0x1a4] ss:$8 sps:$4 sm:$0xff]   ;;  %v6229_v37 = vld [vmem:[#allocation5 + $0x60] ss:$0 sps:$4 sm:$0xff]  }
 0x237   :  { %909 = vmatpush1.bf16.msra.mxu0 %v6129_v9  ;;  %1207 = vmatprep.subr.bf16.mxu1 %v7440_v39  ;;  %v6184_v9 = vld [vmem:[%s8348_s18 + $0x170] ss:$8 sps:$4 sm:$0xff]   ;;  %v6228_v36 = vld [vmem:[#allocation5 + $0x58] sm:$0xff]   ;;  %vm2699_vm13 = vcmask 392192   ;;  %s8354_s13 = sld [smem:[#allocation71_spill]]  ;;  %vm3170_vm14 = vcmask 523264  }
 0x238   :  { %910 = vmatprep.subr.bf16.mxu0 %v6130_v11  ;;  %v6189_v11 = vld [vmem:[%s8348_s18 + $0x184] ss:$8 sps:$4 sm:$0xff]   ;;  %v6208_v26 = vld [vmem:[%s8348_s18 + $0x1f0] ss:$8 sps:$4 sm:$0xff]   ;;  %s8355_s8 = sld [smem:[#allocation73_spill]]  ;;  %s8356_s26 = sld [smem:[#allocation75_spill]] }
 0x239   :  { %v6216_v32 = vld [vmem:[%s8348_s18 + $0x210] ss:$8 sps:$4 sm:$0x3f]   ;;  %v6294_v27 = vld [vmem:[#allocation10 + $0x50] ss:$12 sps:$4 sm:$0xff]   ;;  %s8357_s12 = sld [smem:[#allocation64_spill]] }
 0x23a   :  { %1208 = vmatpush1.bf16.msra.mxu1 %v6219_v47  ;;  %v895_v33 = vsel %vm893_vm4, %v6216_v32, 0  ;;  %v539_v47 = vld [vmem:[%s8350_s23] sm:$0x3]  ;;  %v5335_v32 = vld [vmem:[#allocation7] ss:$0 sm:$0xff]  ;;  %s8358_s28 = sld [smem:[#allocation74_spill]] }
 0x23b   :  { %911 = vmatpush1.bf16.msra.mxu0 %v6132_v12  ;;  %1209 = vmatprep.subr.bf16.mxu1 %v7440_v39  ;;  %v6187_v12 = vld [vmem:[%s8348_s18 + $0x180] ss:$8 sps:$4 sm:$0xff]   ;;  %vm3762_vm15 = vcmask 1044480   ;;  %vm3869_vm1 = vcmask 785408   ;;  %s8359_s3 = sld [smem:[#allocation77_spill]]  ;;  %vm3758_vm3 = vcmask 998400  }
 0x23c   :  { %912 = vmatprep.subr.bf16.mxu0 %v6133_v13  ;;  %v6192_v13 = vld [vmem:[%s8348_s18 + $0x194] ss:$8 sps:$4 sm:$0xff]   ;;  %s8360_s0 = sld [smem:[#allocation76_spill]] }
 0x23e   :  { %1210 = vmatpush1.bf16.msra.mxu1 %v6220_v49 }
 0x23f   :  { %913 = vmatpush1.bf16.msra.mxu0 %v6135_v16  ;;  %1211 = vmatprep.subr.bf16.mxu1 %v7440_v39  ;;  %v6193_v16 = vld [vmem:[%s8348_s18 + $0x1a0] ss:$8 sps:$4 sm:$0xff]  }
 0x240   :  { %914 = vmatprep.subr.bf16.mxu0 %v6136_v17  ;;  %v6198_v17 = vld [vmem:[%s8348_s18 + $0x1b4] ss:$8 sps:$4 sm:$0xff]  }
 0x242   :  { %1212 = vmatpush1.bf16.msra.mxu1 %v6221_v54 }
 0x243   :  { %915 = vmatpush1.bf16.msra.mxu0 %v6138_v18  ;;  %1213 = vmatprep.subr.bf16.mxu1 %v7440_v39  ;;  %v6196_v18 = vld [vmem:[%s8348_s18 + $0x1b0] ss:$8 sps:$4 sm:$0xff]  }
 0x244   :  { %916 = vmatprep.subr.bf16.mxu0 %v6139_v19  ;;  %v6201_v19 = vld [vmem:[%s8348_s18 + $0x1c4] ss:$8 sps:$4 sm:$0xff]  }
 0x246   :  { %1214 = vmatpush1.bf16.msra.mxu1 %v6222_v57 }
 0x247   :  { %917 = vmatpush1.bf16.msra.mxu0 %v6141_v20  ;;  %1215 = vmatprep.subr.bf16.mxu1 %v7440_v39  ;;  %v6199_v20 = vld [vmem:[%s8348_s18 + $0x1c0] ss:$8 sps:$4 sm:$0xff]  }
 0x248   :  { %918 = vmatprep.subr.bf16.mxu0 %v6142_v21  ;;  %v6204_v21 = vld [vmem:[%s8348_s18 + $0x1d4] ss:$8 sps:$4 sm:$0xff]  }
 0x24a   :  { %1216 = vmatpush1.bf16.msra.mxu1 %v6223_v60  ;;  %v1245_v60 = vld [vmem:[#allocation28] sm:$0x7] }
 0x24b   :  { %919 = vmatpush1.bf16.msra.mxu0 %v6144_v22  ;;  %1217 = vmatprep.subr.bf16.mxu1 %v7440_v39  ;;  %v6202_v22 = vld [vmem:[%s8348_s18 + $0x1d0] ss:$8 sps:$4 sm:$0xff]  }
 0x24c   :  { %920 = vmatprep.subr.bf16.mxu0 %v6145_v23  ;;  %v6207_v23 = vld [vmem:[%s8348_s18 + $0x1e4] ss:$8 sps:$4 sm:$0xff]  }
 0x24e   :  { %1218 = vmatpush1.bf16.msra.mxu1 %v6224_v63 }
 0x24f   :  { %921 = vmatpush1.bf16.msra.mxu0 %v6147_v24  ;;  %1219 = vmatprep.subr.bf16.mxu1 %v7440_v39  ;;  %v6205_v24 = vld [vmem:[%s8348_s18 + $0x1e0] ss:$8 sps:$4 sm:$0xff]  }
 0x250   :  { %922 = vmatprep.subr.bf16.mxu0 %v6148_v25  ;;  %v6210_v25 = vld [vmem:[%s8348_s18 + $0x1f4] ss:$8 sps:$4 sm:$0xff]  }
 0x252   :  { %1220 = vmatpush1.bf16.msra.mxu1 %v6225_v2 }
 0x253   :  { %923 = vmatpush1.bf16.msra.mxu0 %v6150_v28  ;;  %1221 = vmatprep.subr.bf16.mxu1 %v7440_v39  ;;  %v6213_v28 = vld [vmem:[%s8348_s18 + $0x204] ss:$8 sps:$4 sm:$0xff]  }
 0x254   :  { %924 = vmatprep.subr.bf16.mxu0 %v6151_v29  ;;  %v6211_v29 = vld [vmem:[%s8348_s18 + $0x200] ss:$8 sps:$4 sm:$0xff]  }
 0x256   :  { %1222 = vmatpush1.bf16.msra.mxu1 %v6226_v5  ;;  %v6235_v5 = vld [vmem:[%s8351_s21 + $0x14] ss:$8 sps:$4 sm:$0xff]  }
 0x257   :  { %925 = vmatpush1.bf16.msra.mxu0 %v6153_v31  ;;  %1223 = vmatprep.subr.bf16.mxu1 %v7440_v39  ;;  %v6214_v31 = vld [vmem:[%s8348_s18 + $0x214] ss:$8 sps:$4 sm:$0x3f]  }
 0x258   :  { %926 = vmatprep.subr.bf16.mxu0 %v6154_v34  ;;  %v463_v34 = vld [vmem:[#allocation2 + $0x20] sm:$0xff] }
 0x259   :  { %v468_v35 = vpack.c.bf16 %v463_v34, %v463_v34 }
 0x25a   :  { %1224 = vmatpush1.bf16.msra.mxu1 %v6227_v8  ;;  %v6236_v8 = vld [vmem:[%s8351_s21 + $0x20] ss:$8 sps:$4 sm:$0xff]  }
 0x25b   :  { %927 = vmatpush1.bf16.msra.mxu0 %v6156_v38  ;;  %1225 = vmatprep.subr.bf16.mxu1 %v7440_v39  ;;  %v1201_v38 = vsel %vm1199_vm6, %v6229_v37, 0 }
 0x25c   :  { %928 = vmatprep.subr.bf16.mxu0 %v6157_v40 }
 0x25e   :  { %1226 = vmatpush1.bf16.msra.mxu1 %v6228_v36  ;;  %v6250_v36 = vld [vmem:[%s8352_s9] sm:$0x3f]  }
 0x25f   :  { %929 = vmatpush1.bf16.msra.mxu0 %v6159_v42  ;;  %1227 = vmatprep.subr.bf16.mxu1 %v7440_v39 }
 0x260   :  { %930 = vmatprep.subr.bf16.mxu0 %v6160_v43 }
 0x262   :  { %1228 = vmatpush1.bf16.msra.mxu1 %v1201_v38 }
 0x263   :  { %931 = vmatpush1.bf16.msra.mxu0 %v6162_v44  ;;  %5892 = vmatprep.subr.bf16.mxu1 %v7437_v10  ;;  %v541_v44 = vlaneseq }
 0x264   :  { %941 = vmatprep.subr.bf16.mxu0 %v6165_v46 }
 0x265   :  { %v7878_v45 = vshrl.u32 %v541_v44, 7  ;;  %v5350_v44 = vld [vmem:[#allocation29] ss:$0 sm:$0xff] }
 0x266   :  { %933 = vmatmul.mubr.bf16.vlgmr.msra.gmra.mrb[0].mxu0 %v464_v51 }
 0x267   :  { %942 = vmatpush1.bf16.msra.mxu0 %v6163_v50  ;;  %973 = vmatprep.mubr.bf16.mxu0 %v467_v53  ;;  %v7881_v46 = vsub.s32 0, %v7878_v45  ;;  %v7885_v48 = vsub.s32 1, %v7878_v45 }
 0x268   :  { %943 = vmatprep.subr.bf16.mxu0 %v6168_v52 }
 0x269   :  { %v544_v49 = vrot.slane %v539_v47, %v7881_v46  ;;  %v548_v50 = vrot.slane %v539_v47, %v7885_v48 }
 0x26b   :  { %944 = vmatpush1.bf16.msra.mxu0 %v6166_v55 }
 0x26c   :  { %945 = vmatprep.subr.bf16.mxu0 %v6171_v56  ;;  %v5333_v56 = vld [vmem:[#allocation26] ss:$0 sm:$0xff] }
 0x26f   :  { %946 = vmatpush1.bf16.msra.mxu0 %v6169_v58 }
 0x270   :  { %947 = vmatprep.subr.bf16.mxu0 %v6174_v59 }
 0x273   :  { %948 = vmatpush1.bf16.msra.mxu0 %v6172_v61 }
 0x274   :  { %949 = vmatprep.subr.bf16.mxu0 %v6177_v62 }
 0x277   :  { %950 = vmatpush1.bf16.msra.mxu0 %v6175_v0  ;;  %v1259_v0 = vsel %vm1257_vm7, %v1245_v60, 0  ;;  %v6262_v60 = vld [vmem:[#allocation10 + $0x4c] ss:$12 sps:$4 sm:$0xff]  }
 0x278   :  { %951 = vmatprep.subr.bf16.mxu0 %v6180_v1  ;;  %v6232_v1 = vld [vmem:[%s8351_s21 + $0x4] ss:$8 sps:$4 sm:$0xff]  }
 0x27b   :  { %952 = vmatpush1.bf16.msra.mxu0 %v6178_v3 }
 0x27c   :  { %953 = vmatprep.subr.bf16.mxu0 %v6183_v4  ;;  %v6230_v4 = vld [vmem:[%s8351_s21] ss:$8 sps:$4 sm:$0xff]  }
 0x27f   :  { %954 = vmatpush1.bf16.msra.mxu0 %v6181_v6  ;;  %v6233_v6 = vld [vmem:[%s8351_s21 + $0x10] ss:$8 sps:$4 sm:$0xff]  }
 0x280   :  { %955 = vmatprep.subr.bf16.mxu0 %v6186_v7  ;;  %v6238_v7 = vld [vmem:[%s8351_s21 + $0x24] ss:$8 sps:$4 sm:$0xff]  }
 0x283   :  { %956 = vmatpush1.bf16.msra.mxu0 %v6184_v9  ;;  %v6241_v9 = vld [vmem:[%s8351_s21 + $0x34] ss:$8 sps:$4 sm:$0xff]  }
 0x284   :  { %957 = vmatprep.subr.bf16.mxu0 %v6189_v11  ;;  %v6239_v11 = vld [vmem:[%s8351_s21 + $0x30] ss:$8 sps:$4 sm:$0xff]  }
 0x287   :  { %958 = vmatpush1.bf16.msra.mxu0 %v6187_v12  ;;  %v6244_v12 = vld [vmem:[%s8351_s21 + $0x44] ss:$8 sps:$4 sm:$0xff]  }
 0x288   :  { %959 = vmatprep.subr.bf16.mxu0 %v6192_v13  ;;  %v6242_v13 = vld [vmem:[%s8351_s21 + $0x40] ss:$8 sps:$4 sm:$0xff]  }
 0x28b   :  { %960 = vmatpush1.bf16.msra.mxu0 %v6190_v14  ;;  %v6247_v14 = vld [vmem:[%s8351_s21 + $0x54] ss:$8 sps:$4 sm:$0xff]  }
 0x28c   :  { %961 = vmatprep.subr.bf16.mxu0 %v6195_v15  ;;  %v6245_v15 = vld [vmem:[%s8351_s21 + $0x50] ss:$8 sps:$4 sm:$0xff]  }
 0x28f   :  { %962 = vmatpush1.bf16.msra.mxu0 %v6193_v16  ;;  %v1315_v16 = vld [vmem:[%s8351_s21 + $0x60] sm:$0x33] }
 0x290   :  { %963 = vmatprep.subr.bf16.mxu0 %v6198_v17  ;;  %v5365_v17 = vcombine.high %v1315_v16, %v1315_v16 }
 0x293   :  { %964 = vmatpush1.bf16.msra.mxu0 %v6196_v18  ;;  %v5364_v18 = vcombine.low %v1315_v16, %v1315_v16  ;;  %v6295_v16 = vld [vmem:[#allocation10 + $0x120] ss:$12 sps:$4 sm:$0xff]  }
 0x294   :  { %965 = vmatprep.subr.bf16.mxu0 %v6201_v19 }
 0x295   :  { %v1398_v19 = vsel %vm1040_vm2, %v5364_v18, 0  ;;  %v6300_v18 = vld [vmem:[#allocation10 + $0x138] ss:$12 sps:$4 sm:$0xff]  }
 0x297   :  { %966 = vmatpush1.bf16.msra.mxu0 %v6199_v20  ;;  %v6278_v20 = vld [vmem:[#allocation10 + $0xc8] ss:$12 sps:$4 sm:$0xff]  }
 0x298   :  { %967 = vmatprep.subr.bf16.mxu0 %v6204_v21  ;;  %v6279_v21 = vld [vmem:[#allocation10 + $0x8] ss:$12 sps:$4 sm:$0xff]  }
 0x29b   :  { %968 = vmatpush1.bf16.msra.mxu0 %v6202_v22  ;;  %v6283_v22 = vld [vmem:[#allocation10 + $0xe0] ss:$12 sps:$4 sm:$0xff]  }
 0x29c   :  { %969 = vmatprep.subr.bf16.mxu0 %v6207_v23  ;;  %v6284_v23 = vld [vmem:[#allocation10 + $0x20] ss:$12 sps:$4 sm:$0xff]  }
 0x29f   :  { %970 = vmatpush1.bf16.msra.mxu0 %v6205_v24  ;;  %v6288_v24 = vld [vmem:[#allocation10 + $0xf8] ss:$12 sps:$4 sm:$0xff]  }
 0x2a0   :  { %971 = vmatprep.subr.bf16.mxu0 %v6210_v25  ;;  %v6289_v25 = vld [vmem:[#allocation10 + $0x38] ss:$12 sps:$4 sm:$0xff]  }
 0x2a3   :  { %972 = vmatpush1.bf16.msra.mxu0 %v6208_v26  ;;  %v6293_v26 = vld [vmem:[#allocation10 + $0x110] ss:$12 sps:$4 sm:$0xff]  }
 0x2a4   :  { %982 = vmatprep.subr.bf16.mxu0 %v6213_v28  ;;  %v6298_v28 = vld [vmem:[#allocation10 + $0x128] ss:$12 sps:$4 sm:$0xff]  }
 0x2a6   :  { %974 = vmatmul.mubr.bf16.vlgmr.msra.gmra.mrb[0].mxu0 %v466_v30  ;;  %v6303_v30 = vld [vmem:[#allocation10 + $0x140] ss:$12 sps:$4 sm:$0xff]  }
 0x2a7   :  { %983 = vmatpush1.bf16.msra.mxu0 %v6211_v29  ;;  %1014 = vmatprep.mubr.bf16.mxu0 %v7440_v39  ;;  %v6299_v29 = vld [vmem:[#allocation10 + $0x68] ss:$12 sps:$4 sm:$0xff]  }
 0x2a8   :  { %5331 = vmatprep.subr.msk.bf16.mxu0 %vm893_vm4, %v6214_v31  ;;  %v6304_v31 = vld [vmem:[#allocation10 + $0x80] ss:$12 sps:$4 sm:$0xff]  }
 0x2ab   :  { %985 = vmatpush1.bf16.msra.mxu0 %v895_v33 }
 0x2ac   :  { %5793 = vmatprep.subr.bf16.mxu0 %v6278_v20  ;;  %v6308_v20 = vld [vmem:[#allocation10 + $0x158] ss:$12 sps:$4 sm:$0xff]  }
 0x2b2   :  { %5332 = vmatmul.mubr.msk.bf16.vlgmr.msra.gmra.mrb[0].mxu0 %vm889_vm5, %v468_v35 }
 0x2b3   :  { %5794 = vmatpush3.bf16.msra.mxu0 %v6279_v21  ;;  %v6305_v21 = vld [vmem:[#allocation10 + $0x150] ss:$12 sps:$4 sm:$0xff]  }
 0x2b4   :  { %5795 = vmatprep.subr.bf16.mxu0 %v6283_v22  ;;  %v6309_v22 = vld [vmem:[#allocation10 + $0x98] ss:$12 sps:$4 sm:$0xff]  }
 0x2b7   :  { %5796 = vmatpush3.bf16.msra.mxu0 %v6284_v23  ;;  %v6312_v23 = vld [vmem:[#allocation10 + $0x16c] ss:$12 sps:$4 sm:$0xff]  }
 0x2b8   :  { %5797 = vmatprep.subr.bf16.mxu0 %v6288_v24  ;;  %v6313_v24 = vld [vmem:[#allocation10 + $0x170] ss:$12 sps:$4 sm:$0xff]  }
 0x2bb   :  { %5798 = vmatpush3.bf16.msra.mxu0 %v6289_v25  ;;  %v6310_v25 = vld [vmem:[#allocation10 + $0x168] ss:$12 sps:$4 sm:$0xff]  }
 0x2bc   :  { %5799 = vmatprep.subr.bf16.mxu0 %v6293_v26  ;;  %v6314_v26 = vld [vmem:[#allocation10 + $0xb0] ss:$12 sps:$4 sm:$0xff]  }
 0x2bf   :  { %5800 = vmatpush3.bf16.msra.mxu0 %v6294_v27  ;;  %v6319_v27 = vld [vmem:[%s8353_s30 + $0x4] ss:$12 sps:$4 sm:$0xff]  }
 0x2c0   :  { %5801 = vmatprep.subr.bf16.mxu0 %v6298_v28  ;;  %v1316_v28 = vld [vmem:[#allocation8] sm:$0x3] }
 0x2c3   :  { %5802 = vmatpush3.bf16.msra.mxu0 %v6299_v29  ;;  %v1321_v29 = vrot.slane %v1316_v28, %v7881_v46 }
 0x2c4   :  { %5803 = vmatprep.subr.bf16.mxu0 %v6303_v30  ;;  %v1325_v30 = vrot.slane %v1316_v28, %v7885_v48  ;;  %v6363_v28 = vld [vmem:[%s8353_s30 + $0x124] ss:$12 sps:$4 sm:$0xff]  }
 0x2c7   :  { %5804 = vmatpush3.bf16.msra.mxu0 %v6304_v31 }
 0x2c8   :  { %5805 = vmatprep.subr.bf16.mxu0 %v6308_v20  ;;  %v6343_v20 = vld [vmem:[%s8353_s30 + $0xc4] ss:$12 sps:$4 sm:$0xff]  }
 0x2cb   :  { %5806 = vmatpush3.bf16.msra.mxu0 %v6309_v22  ;;  %v6348_v22 = vld [vmem:[%s8353_s30 + $0xdc] ss:$12 sps:$4 sm:$0xff]  }
 0x2cc   :  { %5807 = vmatprep.subr.bf16.mxu0 %v6313_v24  ;;  %v6353_v24 = vld [vmem:[%s8353_s30 + $0xf4] ss:$12 sps:$4 sm:$0xff]  }
 0x2cf   :  { %5808 = vmatpush3.bf16.msra.mxu0 %v6314_v26  ;;  %v6358_v26 = vld [vmem:[%s8353_s30 + $0x10c] ss:$12 sps:$4 sm:$0xff]  }
 0x2d0   :  { %2500 = vmatprep.subr.bf16.mxu0 %v6319_v27  ;;  %v6356_v27 = vld [vmem:[%s8353_s30 + $0x108] ss:$12 sps:$4 sm:$0xff]  }
 0x304   :  { %v1080_v40 = vpop.f32.mrb[0].mxu1 }
 0x305   :  { %v5890_v41 = vpop.f32.mrb[1].mxu1  ;;  %v1081_v61 = vadd.f32 %v5333_v56, %v1080_v40  ;;  %v6256_v56 = vld [vmem:[#allocation10 + $0x1c] ss:$12 sps:$4 sm:$0xff]  }
 0x306   :  { %v1083_v42 = vpop.f32.mrb[2].mxu1 }
 0x307   :  { %v5891_v43 = vpop.f32.mrb[3].mxu1  ;;  %v1086_v2 = vmax.f32 %v1081_v61, 0.0  ;;  %v1467_v42 = vsel %vm893_vm4, %v6250_v36, 0  ;;  %v6260_v61 = vld [vmem:[#allocation10 + $0x48] ss:$12 sps:$4 sm:$0xff]  }
 0x308   :  { %v6253_v43 = vld [vmem:[#allocation10 + $0x4] ss:$12 sps:$4 sm:$0xff]  }
 0x309   :  { %v1087_v3 = vpack.c.bf16 %v1086_v2, %v1086_v2  ;;  %v6271_v2 = vld [vmem:[#allocation10 + $0x94] ss:$12 sps:$4 sm:$0xff]  }
 0x385   :  { %v1016_v51 = vpop.f32.mrb[0].mxu0 }
 0x386   :  { %v6018_v52 = vadd.f32 %v1016_v51, %v544_v49  ;;  %v1018_v53 = vpop.f32.mrb[1].mxu0 }
 0x387   :  { %v6019_v54 = vadd.f32 %v1018_v53, %v548_v50  ;;  %v1020_v55 = vpop.f32.mrb[2].mxu0 }
 0x388   :  { %v1023_v57 = vmax.f32 %v6018_v52, 0.0  ;;  %v1021_v58 = vpop.f32.mrb[3].mxu0 }
 0x389   :  { %v1024_v59 = vmax.f32 %v6019_v54, 0.0  ;;  %v6251_v54 = vld [vmem:[#allocation10] ss:$12 sps:$4 sm:$0xff]  }
 0x38a   :  { %v1025_v63 = vpack.c.bf16 %v1023_v57, %v1023_v57  ;;  %v6254_v57 = vld [vmem:[#allocation10 + $0x18] ss:$12 sps:$4 sm:$0xff]   ;;  %v6259_v58 = vld [vmem:[#allocation10 + $0x34] ss:$12 sps:$4 sm:$0xff]  }
 0x38b   :  { %v1026_v62 = vpack.c.bf16 %v1024_v59, %v1024_v59  ;;  %v6257_v59 = vld [vmem:[#allocation10 + $0x30] ss:$12 sps:$4 sm:$0xff]  }
 0x38d   :  { %5349 = vmatprep.mubr.msk.bf16.mxu1 %vm1195_vm8, %v1026_v62  ;;  %v6265_v62 = vld [vmem:[#allocation10 + $0x64] ss:$12 sps:$4 sm:$0xff]  }
 0x38e   :  { %1236 = vmatmul.mubr.bf16.vlgmr.msra.gmra.mrb[4].mxu1 %v1025_v63  ;;  %v6263_v63 = vld [vmem:[#allocation10 + $0x60] ss:$12 sps:$4 sm:$0xff]  }
 0x38f   :  { %5893 = vmatpush3.bf16.msra.mxu1 %v1259_v0  ;;  %5894 = vmatprep.mubr.msk.bf16.mxu1 %vm7438_vm0, %v7437_v10  ;;  %v6268_v0 = vld [vmem:[#allocation10 + $0x7c] ss:$12 sps:$4 sm:$0xff]  }
 0x390   :  { %1403 = vmatprep.subr.bf16.mxu1 %v6232_v1  ;;  %v6266_v1 = vld [vmem:[#allocation10 + $0x78] ss:$12 sps:$4 sm:$0xff]  }
 0x396   :  { %5895 = vmatmul.mubr.msk.bf16.vlgmr.msra.gmra.mrb[8].mxu1 %vm1253_vm9, %v1087_v3  ;;  %v6269_v3 = vld [vmem:[#allocation10 + $0x90] ss:$12 sps:$4 sm:$0xff]  }
 0x397   :  { %1404 = vmatpush1.bf16.msra.mxu1 %v6230_v4  ;;  %1435 = vmatprep.mubr.bf16.mxu1 %v7440_v39  ;;  %v6274_v4 = vld [vmem:[#allocation10 + $0xac] ss:$12 sps:$4 sm:$0xff]  }
 0x398   :  { %1405 = vmatprep.subr.bf16.mxu1 %v6235_v5  ;;  %v6272_v5 = vld [vmem:[#allocation10 + $0xa8] ss:$12 sps:$4 sm:$0xff]  }
 0x39b   :  { %1406 = vmatpush1.bf16.msra.mxu1 %v6233_v6  ;;  %v6277_v6 = vld [vmem:[#allocation10 + $0xc4] ss:$12 sps:$4 sm:$0xff]  }
 0x39c   :  { %1407 = vmatprep.subr.bf16.mxu1 %v6238_v7  ;;  %v6275_v7 = vld [vmem:[#allocation10 + $0xc0] ss:$12 sps:$4 sm:$0xff]  }
 0x39f   :  { %1408 = vmatpush1.bf16.msra.mxu1 %v6236_v8  ;;  %v6282_v8 = vld [vmem:[#allocation10 + $0xdc] ss:$12 sps:$4 sm:$0xff]  }
 0x3a0   :  { %1409 = vmatprep.subr.bf16.mxu1 %v6241_v9  ;;  %v6280_v9 = vld [vmem:[#allocation10 + $0xd8] ss:$12 sps:$4 sm:$0xff]  }
 0x3a3   :  { %1410 = vmatpush1.bf16.msra.mxu1 %v6239_v11  ;;  %v6287_v11 = vld [vmem:[#allocation10 + $0xf4] ss:$12 sps:$4 sm:$0xff]  }
 0x3a4   :  { %1411 = vmatprep.subr.bf16.mxu1 %v6244_v12  ;;  %v6285_v12 = vld [vmem:[#allocation10 + $0xf0] ss:$12 sps:$4 sm:$0xff]  }
 0x3a7   :  { %1412 = vmatpush1.bf16.msra.mxu1 %v6242_v13  ;;  %v6292_v13 = vld [vmem:[#allocation10 + $0x10c] ss:$12 sps:$4 sm:$0xff]  }
 0x3a8   :  { %1413 = vmatprep.subr.bf16.mxu1 %v6247_v14  ;;  %v6290_v14 = vld [vmem:[#allocation10 + $0x108] ss:$12 sps:$4 sm:$0xff]  }
 0x3ab   :  { %1414 = vmatpush1.bf16.msra.mxu1 %v6245_v15  ;;  %v6297_v15 = vld [vmem:[#allocation10 + $0x124] ss:$12 sps:$4 sm:$0xff]  }
 0x3ac   :  { %5366 = vmatprep.subr.msk.bf16.mxu1 %vm1040_vm2, %v5365_v17  ;;  %v6302_v17 = vld [vmem:[#allocation10 + $0x13c] ss:$12 sps:$4 sm:$0xff]  }
 0x3af   :  { %1416 = vmatpush1.bf16.msra.mxu1 %v1398_v19  ;;  %v6307_v19 = vld [vmem:[#allocation10 + $0x154] ss:$12 sps:$4 sm:$0xff]  }
 0x3b0   :  { %5898 = vmatprep.subr.bf16.mxu1 %v7437_v10 }
 0x461   :  { %v1237_v33 = vpop.f32.mrb[4].mxu1 }
 0x462   :  { %v1238_v34 = vadd.f32 %v5335_v32, %v1237_v33  ;;  %v1239_v35 = vpop.f32.mrb[5].mxu1 }
 0x463   :  { %v1240_v37 = vpop.f32.mrb[6].mxu1 }
 0x464   :  { %v1243_v38 = vmax.f32 %v1238_v34, 0.0  ;;  %v1241_v40 = vpop.f32.mrb[7].mxu1 }
 0x466   :  { %v1244_v41 = vpack.c.bf16 %v1243_v38, %v1243_v38 }
 0x468   :  { %5367 = vmatmul.mubr.msk.bf16.vlgmr.msra.gmra.mrb[12].mxu1 %vm1393_vm10, %v1244_v41  ;;  %v5368_v41 = vld [vmem:[#allocation31] ss:$0 sm:$0xff] }
 0x469   :  { %v1295_v47 = vpop.f32.mrb[8].mxu1  ;;  %5899 = vmatpush3.bf16.msra.mxu1 %v1467_v42  ;;  %5900 = vmatprep.mubr.msk.bf16.mxu1 %vm7438_vm0, %v7437_v10  ;;  %v6315_v42 = vld [vmem:[#allocation32] sm:$0xff]  }
 0x46a   :  { %v1296_v49 = vadd.f32 %v5350_v44, %v1295_v47  ;;  %v5896_v50 = vpop.f32.mrb[9].mxu1  ;;  %1848 = vmatprep.subr.bf16.mxu1 %v6253_v43  ;;  %v6316_v43 = vld [vmem:[#allocation32 + $0x8] ss:$0 sps:$4 sm:$0xff]   ;;  %v6317_v47 = vld [vmem:[%s8353_s30] ss:$12 sps:$4 sm:$0xff]  }
 0x46b   :  { %v1298_v51 = vpop.f32.mrb[10].mxu1  ;;  %v6322_v50 = vld [vmem:[%s8353_s30 + $0x1c] ss:$12 sps:$4 sm:$0xff]  }
 0x46c   :  { %v1301_v52 = vmax.f32 %v1296_v49, 0.0  ;;  %v5897_v53 = vpop.f32.mrb[11].mxu1 }
 0x46e   :  { %v1302_v55 = vpack.c.bf16 %v1301_v52, %v1301_v52 }
 0x470   :  { %5901 = vmatmul.mubr.msk.bf16.vlgmr.msra.gmra.mrb[16].mxu1 %vm1462_vm11, %v1302_v55 }
 0x471   :  { %1849 = vmatpush1.bf16.msra.mxu1 %v6251_v54  ;;  %v1959_v54 = vsel %vm1199_vm6, %v6316_v43, 0 }
 0x472   :  { %1850 = vmatprep.subr.bf16.mxu1 %v6256_v56 }
 0x475   :  { %1851 = vmatpush1.bf16.msra.mxu1 %v6254_v57  ;;  %v6320_v57 = vld [vmem:[%s8353_s30 + $0x18] ss:$12 sps:$4 sm:$0xff]  }
 0x476   :  { %1852 = vmatprep.subr.bf16.mxu1 %v6259_v58  ;;  %v6344_v58 = vld [vmem:[%s8353_s30 + $0xc8] ss:$12 sps:$4 sm:$0xff]  }
 0x479   :  { %1853 = vmatpush1.bf16.msra.mxu1 %v6257_v59  ;;  %v6325_v59 = vld [vmem:[%s8353_s30 + $0x34] ss:$12 sps:$4 sm:$0xff]  }
 0x47a   :  { %1854 = vmatprep.subr.bf16.mxu1 %v6262_v60 }
 0x47d   :  { %1855 = vmatpush1.bf16.msra.mxu1 %v6260_v61  ;;  %v6345_v61 = vld [vmem:[%s8353_s30 + $0x8] ss:$12 sps:$4 sm:$0xff]  }
 0x47e   :  { %1856 = vmatprep.subr.bf16.mxu1 %v6265_v62  ;;  %v6323_v62 = vld [vmem:[%s8353_s30 + $0x30] ss:$12 sps:$4 sm:$0xff]  }
 0x481   :  { %1857 = vmatpush1.bf16.msra.mxu1 %v6263_v63  ;;  %v6349_v63 = vld [vmem:[%s8353_s30 + $0xe0] ss:$12 sps:$4 sm:$0xff]  }
 0x482   :  { %1858 = vmatprep.subr.bf16.mxu1 %v6268_v0  ;;  %v6328_v0 = vld [vmem:[%s8353_s30 + $0x4c] ss:$12 sps:$4 sm:$0xff]  }
 0x485   :  { %1859 = vmatpush1.bf16.msra.mxu1 %v6266_v1  ;;  %v6350_v1 = vld [vmem:[%s8353_s30 + $0x20] ss:$12 sps:$4 sm:$0xff]  }
 0x486   :  { %1860 = vmatprep.subr.bf16.mxu1 %v6271_v2  ;;  %v6326_v2 = vld [vmem:[%s8353_s30 + $0x48] ss:$12 sps:$4 sm:$0xff]  }
 0x489   :  { %1861 = vmatpush1.bf16.msra.mxu1 %v6269_v3  ;;  %v6354_v3 = vld [vmem:[%s8353_s30 + $0xf8] ss:$12 sps:$4 sm:$0xff]  }
 0x48a   :  { %1862 = vmatprep.subr.bf16.mxu1 %v6274_v4  ;;  %v6331_v4 = vld [vmem:[%s8353_s30 + $0x64] ss:$12 sps:$4 sm:$0xff]  }
 0x48d   :  { %1863 = vmatpush1.bf16.msra.mxu1 %v6272_v5  ;;  %v6355_v5 = vld [vmem:[%s8353_s30 + $0x38] ss:$12 sps:$4 sm:$0xff]  }
 0x48e   :  { %1864 = vmatprep.subr.bf16.mxu1 %v6277_v6  ;;  %v6329_v6 = vld [vmem:[%s8353_s30 + $0x60] ss:$12 sps:$4 sm:$0xff]  }
 0x491   :  { %1865 = vmatpush1.bf16.msra.mxu1 %v6275_v7  ;;  %v6359_v7 = vld [vmem:[%s8353_s30 + $0x110] ss:$12 sps:$4 sm:$0xff]  }
 0x492   :  { %1866 = vmatprep.subr.bf16.mxu1 %v6282_v8  ;;  %v6334_v8 = vld [vmem:[%s8353_s30 + $0x7c] ss:$12 sps:$4 sm:$0xff]  }
 0x495   :  { %1867 = vmatpush1.bf16.msra.mxu1 %v6280_v9  ;;  %v6360_v9 = vld [vmem:[%s8353_s30 + $0x50] ss:$12 sps:$4 sm:$0xff]  }
 0x496   :  { %1868 = vmatprep.subr.bf16.mxu1 %v6287_v11  ;;  %v6332_v11 = vld [vmem:[%s8353_s30 + $0x78] ss:$12 sps:$4 sm:$0xff]  }
 0x499   :  { %1869 = vmatpush1.bf16.msra.mxu1 %v6285_v12  ;;  %v6364_v12 = vld [vmem:[%s8353_s30 + $0x128] ss:$12 sps:$4 sm:$0xff]  }
 0x49a   :  { %1870 = vmatprep.subr.bf16.mxu1 %v6292_v13  ;;  %v6337_v13 = vld [vmem:[%s8353_s30 + $0x94] ss:$12 sps:$4 sm:$0xff]  }
 0x49d   :  { %1871 = vmatpush1.bf16.msra.mxu1 %v6290_v14  ;;  %v6365_v14 = vld [vmem:[%s8353_s30 + $0x68] ss:$12 sps:$4 sm:$0xff]  }
 0x49e   :  { %1872 = vmatprep.subr.bf16.mxu1 %v6297_v15  ;;  %v6335_v15 = vld [vmem:[%s8353_s30 + $0x90] ss:$12 sps:$4 sm:$0xff]  }
 0x4a1   :  { %1873 = vmatpush1.bf16.msra.mxu1 %v6295_v16  ;;  %v6369_v16 = vld [vmem:[%s8353_s30 + $0x140] ss:$12 sps:$4 sm:$0xff]  }
 0x4a2   :  { %1874 = vmatprep.subr.bf16.mxu1 %v6302_v17  ;;  %v6340_v17 = vld [vmem:[%s8353_s30 + $0xac] ss:$12 sps:$4 sm:$0xff]  }
 0x4a5   :  { %1875 = vmatpush1.bf16.msra.mxu1 %v6300_v18  ;;  %v6370_v18 = vld [vmem:[%s8353_s30 + $0x80] ss:$12 sps:$4 sm:$0xff]  }
 0x4a6   :  { %1876 = vmatprep.subr.bf16.mxu1 %v6307_v19  ;;  %v6338_v19 = vld [vmem:[%s8353_s30 + $0xa8] ss:$12 sps:$4 sm:$0xff]  }
 0x4a9   :  { %1877 = vmatpush1.bf16.msra.mxu1 %v6305_v21  ;;  %v6341_v21 = vld [vmem:[%s8353_s30 + $0xc0] ss:$12 sps:$4 sm:$0xff]  }
 0x4aa   :  { %1878 = vmatprep.subr.bf16.mxu1 %v6312_v23  ;;  %v6346_v23 = vld [vmem:[%s8353_s30 + $0xd8] ss:$12 sps:$4 sm:$0xff]  }
 0x4ad   :  { %1879 = vmatpush1.bf16.msra.mxu1 %v6310_v25  ;;  %v6351_v25 = vld [vmem:[%s8353_s30 + $0xf0] ss:$12 sps:$4 sm:$0xff]  }
 0x4ae   :  { %5904 = vmatprep.subr.bf16.mxu1 %v7437_v10 }
 0x53b   :  { %v1437_v31 = vpop.f32.mrb[12].mxu1 }
 0x53c   :  { %v1438_v32 = vadd.f32 %v1437_v31, %v1321_v29  ;;  %v1439_v33 = vpop.f32.mrb[13].mxu1  ;;  %v6361_v29 = vld [vmem:[%s8353_s30 + $0x120] ss:$12 sps:$4 sm:$0xff]   ;;  %v6366_v31 = vld [vmem:[%s8353_s30 + $0x138] ss:$12 sps:$4 sm:$0xff]  }
 0x53d   :  { %v1440_v34 = vadd.f32 %v1439_v33, %v1325_v30  ;;  %v1441_v35 = vpop.f32.mrb[14].mxu1  ;;  %v6368_v30 = vld [vmem:[%s8353_s30 + $0x13c] ss:$12 sps:$4 sm:$0xff]   ;;  %v6374_v33 = vld [vmem:[%s8353_s30 + $0x158] ss:$12 sps:$4 sm:$0xff]  }
 0x53e   :  { %v1444_v36 = vmax.f32 %v1438_v32, 0.0  ;;  %v1442_v37 = vpop.f32.mrb[15].mxu1  ;;  %v6373_v32 = vld [vmem:[%s8353_s30 + $0x154] ss:$12 sps:$4 sm:$0xff]   ;;  %v6375_v35 = vld [vmem:[%s8353_s30 + $0x98] ss:$12 sps:$4 sm:$0xff]  }
 0x53f   :  { %v1445_v38 = vmax.f32 %v1440_v34, 0.0  ;;  %v6371_v34 = vld [vmem:[%s8353_s30 + $0x150] ss:$12 sps:$4 sm:$0xff]  }
 0x540   :  { %v1446_v44 = vpack.c.bf16 %v1444_v36, %v1444_v36  ;;  %v6378_v36 = vld [vmem:[%s8353_s30 + $0x16c] ss:$12 sps:$4 sm:$0xff]   ;;  %v6379_v37 = vld [vmem:[%s8353_s30 + $0x170] ss:$12 sps:$4 sm:$0xff]  }
 0x541   :  { %v1447_v40 = vpack.c.bf16 %v1445_v38, %v1445_v38  ;;  %v6376_v38 = vld [vmem:[%s8353_s30 + $0x168] ss:$12 sps:$4 sm:$0xff]  }
 0x543   :  { %1880 = vmatprep.mubr.bf16.mxu1 %v1447_v40  ;;  %1921 = vmatprep.mubr.bf16.mxu0 %v1447_v40  ;;  %v1503_v49 = vpop.f32.mrb[16].mxu1  ;;  %v6380_v40 = vld [vmem:[%s8353_s30 + $0xb0] ss:$12 sps:$4 sm:$0xff]  }
 0x544   :  { %1881 = vmatmul.mubr.bf16.vlgmr.msra.gmra.mrb[20].mxu1 %v1446_v44  ;;  %1922 = vmatmul.mubr.bf16.vlgmr.msra.gmra.mrb[4].mxu0 %v1446_v44  ;;  %v1504_v51 = vadd.f32 %v5368_v41, %v1503_v49  ;;  %v5902_v52 = vpop.f32.mrb[17].mxu1  ;;  %v6383_v41 = vld [vmem:[%s8353_s30 + $0x184] ss:$12 sps:$4 sm:$0xff]  }
 0x545   :  { %5905 = vmatpush3.bf16.msra.mxu1 %v6315_v42  ;;  %v1506_v53 = vpop.f32.mrb[18].mxu1  ;;  %5908 = vmatprep.mubr.msk.bf16.mxu1 %vm7438_vm0, %v7437_v10  ;;  %v7971_v42 = vld [vmem:[#allocation11] sm:$0x7] }
 0x546   :  { %v1509_v55 = vmax.f32 %v1504_v51, 0.0  ;;  %v5903_v56 = vpop.f32.mrb[19].mxu1  ;;  %5906 = vmatprep.subr.bf16.mxu1 %v7437_v10  ;;  %2501 = vmatpush1.bf16.msra.mxu0 %v6317_v47  ;;  %v1580_v43 = vrot.slane %v7971_v42, %v7881_v46  ;;  %v1584_v44 = vrot.slane %v7971_v42, %v7885_v48 }
 0x547   :  { %2502 = vmatprep.subr.bf16.mxu0 %v6322_v50 }
 0x548   :  { %v1510_v60 = vpack.c.bf16 %v1509_v55, %v1509_v55 }
 0x549   :  { %5907 = vmatpush3.bf16.msra.mxu1 %v1959_v54 }
 0x54a   :  { %2503 = vmatpush1.bf16.msra.mxu0 %v6320_v57  ;;  %5818 = vmatprep.subr.bf16.mxu1 %v6344_v58 }
 0x54b   :  { %2504 = vmatprep.subr.bf16.mxu0 %v6325_v59 }
 0x54c   :  { %5909 = vmatmul.mubr.msk.bf16.vlgmr.msra.gmra.mrb[24].mxu1 %vm1954_vm12, %v1510_v60 }
 0x54d   :  { %5819 = vmatpush3.bf16.msra.mxu1 %v6345_v61 }
 0x54e   :  { %2505 = vmatpush1.bf16.msra.mxu0 %v6323_v62  ;;  %5820 = vmatprep.subr.bf16.mxu1 %v6349_v63  ;;  %v6381_v62 = vld [vmem:[%s8353_s30 + $0x180] ss:$12 sps:$4 sm:$0xff]   ;;  %v6384_v63 = vld [vmem:[%s8353_s30 + $0x188] ss:$12 sps:$4 sm:$0xff]  }
 0x54f   :  { %2506 = vmatprep.subr.bf16.mxu0 %v6328_v0 }
 0x551   :  { %5821 = vmatpush3.bf16.msra.mxu1 %v6350_v1  ;;  %v6387_v1 = vld [vmem:[%s8353_s30 + $0x19c] ss:$12 sps:$4 sm:$0xff]  }
 0x552   :  { %2507 = vmatpush1.bf16.msra.mxu0 %v6326_v2  ;;  %5822 = vmatprep.subr.bf16.mxu1 %v6354_v3 }
 0x553   :  { %2508 = vmatprep.subr.bf16.mxu0 %v6331_v4  ;;  %v6385_v4 = vld [vmem:[%s8353_s30 + $0x198] ss:$12 sps:$4 sm:$0xff]  }
 0x555   :  { %5823 = vmatpush3.bf16.msra.mxu1 %v6355_v5  ;;  %v6388_v5 = vld [vmem:[%s8353_s30 + $0x1a0] ss:$12 sps:$4 sm:$0xff]  }
 0x556   :  { %2509 = vmatpush1.bf16.msra.mxu0 %v6329_v6  ;;  %5824 = vmatprep.subr.bf16.mxu1 %v6359_v7  ;;  %v6391_v7 = vld [vmem:[%s8353_s30 + $0x1b4] ss:$12 sps:$4 sm:$0xff]  }
 0x557   :  { %2510 = vmatprep.subr.bf16.mxu0 %v6334_v8 }
 0x559   :  { %5825 = vmatpush3.bf16.msra.mxu1 %v6360_v9  ;;  %v6389_v9 = vld [vmem:[%s8353_s30 + $0x1b0] ss:$12 sps:$4 sm:$0xff]  }
 0x55a   :  { %2511 = vmatpush1.bf16.msra.mxu0 %v6332_v11  ;;  %5826 = vmatprep.subr.bf16.mxu1 %v6364_v12  ;;  %v6392_v11 = vld [vmem:[%s8353_s30 + $0x1b8] ss:$12 sps:$4 sm:$0xff]  }
 0x55b   :  { %2512 = vmatprep.subr.bf16.mxu0 %v6337_v13  ;;  %v6395_v12 = vld [vmem:[%s8353_s30 + $0x1cc] ss:$12 sps:$4 sm:$0xff]   ;;  %v6393_v13 = vld [vmem:[%s8353_s30 + $0x1c8] ss:$12 sps:$4 sm:$0xff]  }
 0x55d   :  { %5827 = vmatpush3.bf16.msra.mxu1 %v6365_v14  ;;  %v6396_v14 = vld [vmem:[%s8353_s30 + $0x1d0] ss:$12 sps:$4 sm:$0xff]  }
 0x55e   :  { %2513 = vmatpush1.bf16.msra.mxu0 %v6335_v15  ;;  %5828 = vmatprep.subr.bf16.mxu1 %v6369_v16  ;;  %v6399_v15 = vld [vmem:[%s8353_s30 + $0x1e4] ss:$12 sps:$4 sm:$0xff]   ;;  %v6397_v16 = vld [vmem:[%s8353_s30 + $0x1e0] ss:$12 sps:$4 sm:$0xff]  }
 0x55f   :  { %2514 = vmatprep.subr.bf16.mxu0 %v6340_v17  ;;  %v6400_v17 = vld [vmem:[%s8353_s30 + $0x1e8] ss:$12 sps:$4 sm:$0xff]  }
 0x561   :  { %5829 = vmatpush3.bf16.msra.mxu1 %v6370_v18  ;;  %v8002_v18 = vsub.s32 2, %v7878_v45 }
 0x562   :  { %2515 = vmatpush1.bf16.msra.mxu0 %v6338_v19  ;;  %5830 = vmatprep.subr.bf16.mxu1 %v6374_v33  ;;  %v6403_v19 = vld [vmem:[%s8353_s30 + $0x1fc] ss:$12 sps:$4 sm:$0xff]  }
 0x563   :  { %2516 = vmatprep.subr.bf16.mxu0 %v6343_v20  ;;  %v6401_v20 = vld [vmem:[%s8353_s30 + $0x1f8] ss:$12 sps:$4 sm:$0xff]  }
 0x565   :  { %5831 = vmatpush3.bf16.msra.mxu1 %v6375_v35  ;;  %v6414_v35 = vld [vmem:[#allocation35 + $0x8] sm:$0xff]  }
 0x566   :  { %2517 = vmatpush1.bf16.msra.mxu0 %v6341_v21  ;;  %5832 = vmatprep.subr.bf16.mxu1 %v6379_v37  ;;  %v6404_v21 = vld [vmem:[%s8353_s30 + $0x200] ss:$12 sps:$4 sm:$0xff]  }
 0x567   :  { %2518 = vmatprep.subr.bf16.mxu0 %v6348_v22  ;;  %v1588_v22 = vrot.slane %v7971_v42, %v8002_v18  ;;  %v6415_v37 = vld [vmem:[#allocation35 + $0x10] sm:$0xff]  }
 0x568   :  { %v6421_v42 = vld [vmem:[#allocation14 + $0x14] ss:$8 sps:$4 sm:$0xff]  }
 0x569   :  { %5833 = vmatpush3.bf16.msra.mxu1 %v6380_v40 }
 0x56a   :  { %2519 = vmatpush1.bf16.msra.mxu0 %v6346_v23  ;;  %5912 = vmatprep.subr.bf16.mxu1 %v7437_v10  ;;  %v6407_v23 = vld [vmem:[%s8353_s30 + $0x214] ss:$12 sps:$4 sm:$0xff]  }
 0x56b   :  { %2520 = vmatprep.subr.bf16.mxu0 %v6353_v24  ;;  %v6405_v24 = vld [vmem:[%s8353_s30 + $0x210] ss:$12 sps:$4 sm:$0xff]  }
 0x56e   :  { %2521 = vmatpush1.bf16.msra.mxu0 %v6351_v25  ;;  %v6408_v25 = vld [vmem:[%s8353_s30 + $0x218] ss:$12 sps:$4 sm:$0xff]  }
 0x56f   :  { %2522 = vmatprep.subr.bf16.mxu0 %v6358_v26 }
 0x572   :  { %2523 = vmatpush1.bf16.msra.mxu0 %v6356_v27  ;;  %v6411_v27 = vld [vmem:[%s8353_s30 + $0x22c] ss:$12 sps:$4 sm:$0xff]  }
 0x573   :  { %2524 = vmatprep.subr.bf16.mxu0 %v6363_v28  ;;  %v6409_v28 = vld [vmem:[%s8353_s30 + $0x228] ss:$12 sps:$4 sm:$0xff]  }
 0x576   :  { %2525 = vmatpush1.bf16.msra.mxu0 %v6361_v29  ;;  %v6412_v29 = vld [vmem:[%s8353_s30 + $0x230] ss:$12 sps:$4 sm:$0xff]  }
 0x577   :  { %2526 = vmatprep.subr.bf16.mxu0 %v6368_v30 }
 0x57a   :  { %2527 = vmatpush1.bf16.msra.mxu0 %v6366_v31  ;;  %v6413_v31 = vld [vmem:[#allocation35] sm:$0xff]  }
 0x57b   :  { %2528 = vmatprep.subr.bf16.mxu0 %v6373_v32  ;;  %v5419_v32 = vld [vmem:[#allocation34] ss:$0 sm:$0xff] }
 0x57e   :  { %2529 = vmatpush1.bf16.msra.mxu0 %v6371_v34 }
 0x57f   :  { %2530 = vmatprep.subr.bf16.mxu0 %v6378_v36 }
 0x582   :  { %2531 = vmatpush1.bf16.msra.mxu0 %v6376_v38  ;;  %v6418_v38 = vld [vmem:[#allocation14 + $0x4] ss:$8 sps:$4 sm:$0xff]  }
 0x583   :  { %2541 = vmatprep.subr.bf16.mxu0 %v6383_v41  ;;  %v6416_v41 = vld [vmem:[#allocation14] ss:$8 sps:$4 sm:$0xff]  }
 0x617   :  { %v1882_v47 = vpop.f32.mrb[20].mxu1  ;;  %v5809_v49 = vpop.f32.mrb[4].mxu0 }
 0x618   :  { %v1883_v50 = vadd.f32 %v1882_v47, %v1580_v43  ;;  %v1884_v51 = vpop.f32.mrb[21].mxu1  ;;  %v5810_v52 = vpop.f32.mrb[5].mxu0  ;;  %v6419_v43 = vld [vmem:[#allocation14 + $0x10] ss:$8 sps:$4 sm:$0xff]   ;;  %v6422_v47 = vld [vmem:[#allocation14 + $0x20] ss:$8 sps:$4 sm:$0xff]  }
 0x619   :  { %v1885_v53 = vadd.f32 %v1884_v51, %v1584_v44  ;;  %v7977_v54 = vadd.f32 %v5810_v52, %v5809_v49  ;;  %v1886_v55 = vpop.f32.mrb[22].mxu1  ;;  %v5812_v56 = vpop.f32.mrb[6].mxu0  ;;  %v6424_v44 = vld [vmem:[#allocation14 + $0x24] ss:$8 sps:$4 sm:$0xff]   ;;  %v6427_v49 = vld [vmem:[#allocation14 + $0x34] ss:$8 sps:$4 sm:$0xff]  }
 0x61a   :  { %v1929_v57 = vmax.f32 %v1883_v50, 0.0  ;;  %v1887_v58 = vpop.f32.mrb[23].mxu1  ;;  %v5813_v59 = vpop.f32.mrb[7].mxu0  ;;  %v6425_v50 = vld [vmem:[#allocation14 + $0x30] ss:$8 sps:$4 sm:$0xff]  }
 0x61b   :  { %v1930_v60 = vmax.f32 %v1885_v53, 0.0  ;;  %v1924_v26 = vadd.f32 %v7977_v54, %v1588_v22  ;;  %v6430_v51 = vld [vmem:[#allocation14 + $0x44] ss:$8 sps:$4 sm:$0xff]   ;;  %v6428_v52 = vld [vmem:[#allocation14 + $0x40] ss:$8 sps:$4 sm:$0xff]  }
 0x61c   :  { %v1932_v0 = vpack.c.bf16 %v1929_v57, %v1929_v57  ;;  %v6433_v53 = vld [vmem:[#allocation14 + $0x54] ss:$8 sps:$4 sm:$0xff]   ;;  %v6431_v54 = vld [vmem:[#allocation14 + $0x50] ss:$8 sps:$4 sm:$0xff]   ;;  %v6436_v55 = vld [vmem:[#allocation14 + $0x64] ss:$8 sps:$4 sm:$0xff]  }
 0x61d   :  { %v1933_v61 = vpack.c.bf16 %v1930_v60, %v1930_v60  ;;  %v1931_v30 = vmax.f32 %v1924_v26, 0.0  ;;  %v6434_v56 = vld [vmem:[#allocation14 + $0x60] ss:$8 sps:$4 sm:$0xff]   ;;  %v6439_v57 = vld [vmem:[#allocation14 + $0x74] ss:$8 sps:$4 sm:$0xff]  }
 0x61e   :  { %v6437_v58 = vld [vmem:[#allocation14 + $0x70] ss:$8 sps:$4 sm:$0xff]   ;;  %v6442_v59 = vld [vmem:[#allocation14 + $0x84] ss:$8 sps:$4 sm:$0xff]   ;;  %v6440_v60 = vld [vmem:[#allocation14 + $0x80] ss:$8 sps:$4 sm:$0xff]  }
 0x61f   :  { %2532 = vmatprep.mubr.bf16.mxu0 %v1933_v61  ;;  %2614 = vmatprep.mubr.bf16.mxu1 %v1933_v61  ;;  %v7982_v2 = vpop.f32.mrb[24].mxu1  ;;  %v1934_v33 = vpack.c.bf16 %v1931_v30, %v1931_v30  ;;  %v6445_v61 = vld [vmem:[#allocation14 + $0x94] ss:$8 sps:$4 sm:$0xff]  }
 0x620   :  { %2533 = vmatmul.mubr.bf16.vlgmr.msra.gmra.mrb[8].mxu0 %v1932_v0  ;;  %2615 = vmatmul.mubr.bf16.vlgmr.msra.gmra.mrb[28].mxu1 %v1932_v0  ;;  %v5910_v3 = vpop.f32.mrb[25].mxu1  ;;  %v1996_v34 = vadd.f32 %v5419_v32, %v7982_v2  ;;  %v6446_v0 = vld [vmem:[#allocation14 + $0xa0] ss:$8 sps:$4 sm:$0xff]   ;;  %v6449_v2 = vld [vmem:[#allocation14 + $0xb0] ss:$8 sps:$4 sm:$0xff]  }
 0x621   :  { %2542 = vmatpush1.bf16.msra.mxu0 %v6381_v62  ;;  %5913 = vmatpush3.bf16.msra.mxu1 %v6384_v63  ;;  %v1998_v6 = vpop.f32.mrb[26].mxu1  ;;  %v6443_v62 = vld [vmem:[#allocation14 + $0x90] ss:$8 sps:$4 sm:$0xff]   ;;  %v6448_v63 = vld [vmem:[#allocation14 + $0xa4] ss:$8 sps:$4 sm:$0xff]  }
 0x622   :  { %2543 = vmatprep.subr.bf16.mxu0 %v6387_v1  ;;  %5914 = vmatprep.subr.bf16.mxu1 %v7437_v10  ;;  %v5911_v8 = vpop.f32.mrb[27].mxu1  ;;  %v2001_v36 = vmax.f32 %v1996_v34, 0.0  ;;  %v6451_v1 = vld [vmem:[#allocation14 + $0xb4] ss:$8 sps:$4 sm:$0xff]   ;;  %v6454_v3 = vld [vmem:[#allocation14 + $0xc4] ss:$8 sps:$4 sm:$0xff]  }
 0x623   :  { %2573 = vmatprep.mubr.bf16.mxu0 %v7440_v39  ;;  %5928 = vmatprep.mubr.msk.bf16.mxu1 %vm7438_vm0, %v7437_v10  ;;  %v6455_v6 = vld [vmem:[#allocation14 + $0xd0] ss:$8 sps:$4 sm:$0xff]   ;;  %v6458_v8 = vld [vmem:[#allocation14 + $0xe0] ss:$8 sps:$4 sm:$0xff]  }
 0x624   :  { %v2002_v40 = vpack.c.bf16 %v2001_v36, %v2001_v36 }
 0x625   :  { %2544 = vmatpush1.bf16.msra.mxu0 %v6385_v4  ;;  %5915 = vmatpush3.bf16.msra.mxu1 %v6388_v5  ;;  %v6452_v4 = vld [vmem:[#allocation14 + $0xc0] ss:$8 sps:$4 sm:$0xff]   ;;  %v6457_v5 = vld [vmem:[#allocation14 + $0xd4] ss:$8 sps:$4 sm:$0xff]  }
 0x626   :  { %2545 = vmatprep.subr.bf16.mxu0 %v6391_v7  ;;  %5916 = vmatprep.subr.bf16.mxu1 %v7437_v10  ;;  %v6460_v7 = vld [vmem:[#allocation14 + $0xe4] ss:$8 sps:$4 sm:$0xff]  }
 0x629   :  { %2546 = vmatpush1.bf16.msra.mxu0 %v6389_v9  ;;  %5917 = vmatpush3.bf16.msra.mxu1 %v6392_v11  ;;  %v6463_v9 = vld [vmem:[#allocation14 + $0xf4] ss:$8 sps:$4 sm:$0xff]   ;;  %v6464_v11 = vld [vmem:[%s8354_s13] sm:$0xff]  }
 0x62a   :  { %2547 = vmatprep.subr.bf16.mxu0 %v6395_v12  ;;  %5918 = vmatprep.subr.bf16.mxu1 %v7437_v10  ;;  %v6461_v12 = vld [vmem:[#allocation14 + $0xf0] ss:$8 sps:$4 sm:$0xff]  }
 0x62d   :  { %2548 = vmatpush1.bf16.msra.mxu0 %v6393_v13  ;;  %5919 = vmatpush3.bf16.msra.mxu1 %v6396_v14  ;;  %v6467_v13 = vld [vmem:[#allocation14 + $0x104] ss:$8 sps:$4 sm:$0xff]   ;;  %v6468_v14 = vld [vmem:[%s8354_s13 + $0x8] sm:$0xff]  }
 0x62e   :  { %2549 = vmatprep.subr.bf16.mxu0 %v6399_v15  ;;  %5920 = vmatprep.subr.bf16.mxu1 %v7437_v10  ;;  %v6472_v15 = vld [vmem:[%s8354_s13 + $0x10] sm:$0xff]  }
 0x631   :  { %2550 = vmatpush1.bf16.msra.mxu0 %v6397_v16  ;;  %5921 = vmatpush3.bf16.msra.mxu1 %v6400_v17  ;;  %v6476_v16 = vld [vmem:[%s8354_s13 + $0x18] sm:$0xff]  }
 0x632   :  { %2551 = vmatprep.subr.bf16.mxu0 %v6403_v19  ;;  %5922 = vmatprep.subr.bf16.mxu1 %v7437_v10  ;;  %v6494_v17 = vld [vmem:[#allocation17 + $0x4] ss:$8 sps:$4 sm:$0xff]  }
 0x635   :  { %2552 = vmatpush1.bf16.msra.mxu0 %v6401_v20  ;;  %5923 = vmatpush3.bf16.msra.mxu1 %v6404_v21 }
 0x636   :  { %2553 = vmatprep.subr.bf16.mxu0 %v6407_v23  ;;  %5924 = vmatprep.subr.bf16.mxu1 %v7437_v10 }
 0x639   :  { %2554 = vmatpush1.bf16.msra.mxu0 %v6405_v24  ;;  %5925 = vmatpush3.bf16.msra.mxu1 %v6408_v25  ;;  %v2099_v24 = vld [vmem:[#allocation13] sm:$0x7] }
 0x63a   :  { %2555 = vmatprep.subr.bf16.mxu0 %v6411_v27  ;;  %5926 = vmatprep.subr.bf16.mxu1 %v7437_v10  ;;  %v2112_v25 = vrot.slane %v2099_v24, %v8002_v18  ;;  %v2104_v26 = vrot.slane %v2099_v24, %v7881_v46  ;;  %v2108_v27 = vrot.slane %v2099_v24, %v7885_v48  ;;  %v6511_v24 = vld [vmem:[#allocation17 + $0x60] ss:$8 sps:$4 sm:$0xff]  }
 0x63d   :  { %2556 = vmatpush1.bf16.msra.mxu0 %v6409_v28  ;;  %5927 = vmatpush3.bf16.msra.mxu1 %v6412_v29 }
 0x63e   :  { %5932 = vmatprep.subr.bf16.mxu1 %v7437_v10  ;;  %5942 = vmatprep.subr.bf16.mxu0 %v7437_v10 }
 0x640   :  { %2574 = vmatmul.mubr.bf16.vlgmr.msra.gmra.mrb[8].mxu0 %v1934_v33  ;;  %5929 = vmatmul.mubr.bf16.vlgmr.msra.gmra.mrb[32].mxu1 %v1934_v33 }
 0x641   :  { %5933 = vmatpush3.bf16.msra.mxu1 %v6413_v31  ;;  %5938 = vmatprep.mubr.msk.bf16.mxu1 %vm7438_vm0, %v7437_v10 }
 0x642   :  { %5934 = vmatprep.subr.bf16.mxu1 %v7437_v10  ;;  %5950 = vmatprep.mubr.msk.bf16.mxu0 %vm7438_vm0, %v7437_v10 }
 0x643   :  { %5943 = vmatpush3.bf16.msra.mxu0 %v6464_v11  ;;  %v6501_v11 = vld [vmem:[#allocation17 + $0x30] ss:$8 sps:$4 sm:$0xff]  }
 0x644   :  { %5944 = vmatprep.subr.bf16.mxu0 %v7437_v10 }
 0x645   :  { %5935 = vmatpush3.bf16.msra.mxu1 %v6414_v35 }
 0x646   :  { %5936 = vmatprep.subr.bf16.mxu1 %v7437_v10 }
 0x647   :  { %5945 = vmatpush3.bf16.msra.mxu0 %v6468_v14  ;;  %v6491_v14 = vld [vmem:[#allocation14 + $0x174] ss:$8 sps:$4 sm:$0xff]  }
 0x648   :  { %5946 = vmatprep.subr.bf16.mxu0 %v7437_v10 }
 0x649   :  { %5937 = vmatpush3.bf16.msra.mxu1 %v6415_v37 }
 0x64a   :  { %3045 = vmatprep.subr.bf16.mxu1 %v6418_v38 }
 0x64b   :  { %5947 = vmatpush3.bf16.msra.mxu0 %v6472_v15  ;;  %v6504_v15 = vld [vmem:[#allocation17 + $0x40] ss:$8 sps:$4 sm:$0xff]  }
 0x64c   :  { %5939 = vmatmul.mubr.msk.bf16.vlgmr.msra.gmra.mrb[36].mxu1 %vm2699_vm13, %v2002_v40  ;;  %5948 = vmatprep.subr.bf16.mxu0 %v7437_v10 }
 0x64d   :  { %3046 = vmatpush1.bf16.msra.mxu1 %v6416_v41 }
 0x64e   :  { %3047 = vmatprep.subr.bf16.mxu1 %v6421_v42 }
 0x64f   :  { %5949 = vmatpush3.bf16.msra.mxu0 %v6476_v16  ;;  %v6509_v16 = vld [vmem:[#allocation17 + $0x54] ss:$8 sps:$4 sm:$0xff]  }
 0x650   :  { %3420 = vmatprep.subr.bf16.mxu0 %v6494_v17  ;;  %v6489_v17 = vld [vmem:[#allocation14 + $0x170] ss:$8 sps:$4 sm:$0xff]  }
 0x651   :  { %3048 = vmatpush1.bf16.msra.mxu1 %v6419_v43 }
 0x652   :  { %3049 = vmatprep.subr.bf16.mxu1 %v6424_v44  ;;  %v6465_v44 = vld [vmem:[#allocation14 + $0x100] ss:$8 sps:$4 sm:$0xff]  }
 0x655   :  { %3050 = vmatpush1.bf16.msra.mxu1 %v6422_v47 }
 0x656   :  { %3051 = vmatprep.subr.bf16.mxu1 %v6427_v49  ;;  %v6471_v49 = vld [vmem:[#allocation14 + $0x114] ss:$8 sps:$4 sm:$0xff]  }
 0x659   :  { %3052 = vmatpush1.bf16.msra.mxu1 %v6425_v50  ;;  %v5495_v50 = vld [vmem:[#allocation37] ss:$0 sm:$0xff] }
 0x65a   :  { %3053 = vmatprep.subr.bf16.mxu1 %v6430_v51  ;;  %v6469_v51 = vld [vmem:[#allocation14 + $0x110] ss:$8 sps:$4 sm:$0xff]  }
 0x65d   :  { %3054 = vmatpush1.bf16.msra.mxu1 %v6428_v52  ;;  %v6475_v52 = vld [vmem:[#allocation14 + $0x124] ss:$8 sps:$4 sm:$0xff]  }
 0x65e   :  { %3055 = vmatprep.subr.bf16.mxu1 %v6433_v53 }
 0x661   :  { %3056 = vmatpush1.bf16.msra.mxu1 %v6431_v54 }
 0x662   :  { %3057 = vmatprep.subr.bf16.mxu1 %v6436_v55 }
 0x665   :  { %3058 = vmatpush1.bf16.msra.mxu1 %v6434_v56 }
 0x666   :  { %3059 = vmatprep.subr.bf16.mxu1 %v6439_v57  ;;  %v6473_v57 = vld [vmem:[#allocation14 + $0x120] ss:$8 sps:$4 sm:$0xff]  }
 0x669   :  { %3060 = vmatpush1.bf16.msra.mxu1 %v6437_v58 }
 0x66a   :  { %3061 = vmatprep.subr.bf16.mxu1 %v6442_v59 }
 0x66d   :  { %3062 = vmatpush1.bf16.msra.mxu1 %v6440_v60  ;;  %v6479_v60 = vld [vmem:[#allocation14 + $0x134] ss:$8 sps:$4 sm:$0xff]  }
 0x66e   :  { %3063 = vmatprep.subr.bf16.mxu1 %v6445_v61  ;;  %v6492_v61 = vld [vmem:[#allocation17] ss:$8 sps:$4 sm:$0xff]  }
 0x671   :  { %3064 = vmatpush1.bf16.msra.mxu1 %v6443_v62 }
 0x672   :  { %3065 = vmatprep.subr.bf16.mxu1 %v6448_v63  ;;  %v6497_v63 = vld [vmem:[#allocation17 + $0x14] ss:$8 sps:$4 sm:$0xff]  }
 0x675   :  { %3066 = vmatpush1.bf16.msra.mxu1 %v6446_v0  ;;  %v6477_v0 = vld [vmem:[#allocation14 + $0x130] ss:$8 sps:$4 sm:$0xff]  }
 0x676   :  { %3067 = vmatprep.subr.bf16.mxu1 %v6451_v1  ;;  %v6482_v1 = vld [vmem:[#allocation14 + $0x144] ss:$8 sps:$4 sm:$0xff]  }
 0x679   :  { %3068 = vmatpush1.bf16.msra.mxu1 %v6449_v2  ;;  %v6495_v2 = vld [vmem:[#allocation17 + $0x10] ss:$8 sps:$4 sm:$0xff]  }
 0x67a   :  { %3069 = vmatprep.subr.bf16.mxu1 %v6454_v3  ;;  %v6500_v3 = vld [vmem:[#allocation17 + $0x24] ss:$8 sps:$4 sm:$0xff]  }
 0x67d   :  { %3070 = vmatpush1.bf16.msra.mxu1 %v6452_v4  ;;  %v6480_v4 = vld [vmem:[#allocation14 + $0x140] ss:$8 sps:$4 sm:$0xff]  }
 0x67e   :  { %3071 = vmatprep.subr.bf16.mxu1 %v6457_v5  ;;  %v6485_v5 = vld [vmem:[#allocation14 + $0x154] ss:$8 sps:$4 sm:$0xff]  }
 0x681   :  { %3072 = vmatpush1.bf16.msra.mxu1 %v6455_v6  ;;  %v6498_v6 = vld [vmem:[#allocation17 + $0x20] ss:$8 sps:$4 sm:$0xff]  }
 0x682   :  { %3073 = vmatprep.subr.bf16.mxu1 %v6460_v7  ;;  %v6503_v7 = vld [vmem:[#allocation17 + $0x34] ss:$8 sps:$4 sm:$0xff]  }
 0x685   :  { %3074 = vmatpush1.bf16.msra.mxu1 %v6458_v8  ;;  %v6483_v8 = vld [vmem:[#allocation14 + $0x150] ss:$8 sps:$4 sm:$0xff]  }
 0x686   :  { %3075 = vmatprep.subr.bf16.mxu1 %v6463_v9  ;;  %v6488_v9 = vld [vmem:[#allocation14 + $0x164] ss:$8 sps:$4 sm:$0xff]  }
 0x689   :  { %3076 = vmatpush1.bf16.msra.mxu1 %v6461_v12  ;;  %v6506_v12 = vld [vmem:[#allocation17 + $0x44] ss:$8 sps:$4 sm:$0xff]  }
 0x68a   :  { %3086 = vmatprep.subr.bf16.mxu1 %v6467_v13  ;;  %v6486_v13 = vld [vmem:[#allocation14 + $0x160] ss:$8 sps:$4 sm:$0xff]  }
 0x6f3   :  { %v5834_v19 = vpop.f32.mrb[28].mxu1 }
 0x6f4   :  { %v5835_v20 = vpop.f32.mrb[29].mxu1 }
 0x6f5   :  { %v5836_v21 = vadd.f32 %v5835_v20, %v5834_v19  ;;  %v5837_v22 = vpop.f32.mrb[30].mxu1  ;;  %v6507_v20 = vld [vmem:[#allocation17 + $0x50] ss:$8 sps:$4 sm:$0xff]  }
 0x6f6   :  { %v5838_v23 = vpop.f32.mrb[31].mxu1  ;;  %v6510_v22 = vld [vmem:[%s8355_s8] sm:$0xff]  }
 0x6f7   :  { %v2617_v28 = vadd.f32 %v5836_v21, %v2112_v25  ;;  %v6513_v21 = vld [vmem:[#allocation17 + $0x64] ss:$8 sps:$4 sm:$0xff]   ;;  %v6517_v25 = vld [vmem:[#allocation17 + $0x74] ss:$8 sps:$4 sm:$0xff]  }
 0x713   :  { %v2575_v29 = vpop.f32.mrb[8].mxu0  ;;  %v2656_v30 = vpop.f32.mrb[32].mxu1 }
 0x714   :  { %v6020_v31 = vadd.f32 %v2575_v29, %v2104_v26  ;;  %v8039_v32 = vadd.f32 %v2656_v30, %v2617_v28  ;;  %v2577_v33 = vpop.f32.mrb[9].mxu0  ;;  %v5930_v34 = vpop.f32.mrb[33].mxu1  ;;  %v6514_v26 = vld [vmem:[%s8355_s8 + $0x8] sm:$0xff]   ;;  %v6518_v29 = vld [vmem:[%s8355_s8 + $0x10] sm:$0xff]   ;;  %v6519_v30 = vld [vmem:[#allocation17 + $0x80] ss:$8 sps:$4 sm:$0xff]  }
 0x715   :  { %v6021_v35 = vadd.f32 %v2577_v33, %v2108_v27  ;;  %v2579_v36 = vpop.f32.mrb[10].mxu0  ;;  %v2659_v37 = vpop.f32.mrb[34].mxu1  ;;  %v6515_v27 = vld [vmem:[#allocation17 + $0x70] ss:$8 sps:$4 sm:$0xff]   ;;  %v6521_v28 = vld [vmem:[#allocation17 + $0x84] ss:$8 sps:$4 sm:$0xff]  }
 0x716   :  { %v2662_v38 = vmax.f32 %v6020_v31, 0.0  ;;  %v2580_v40 = vpop.f32.mrb[11].mxu0  ;;  %v5931_v41 = vpop.f32.mrb[35].mxu1  ;;  %v2664_v19 = vmax.f32 %v8039_v32, 0.0  ;;  %v6522_v31 = vld [vmem:[%s8355_s8 + $0x18] sm:$0xff]  }
 0x717   :  { %v2663_v42 = vmax.f32 %v6021_v35, 0.0  ;;  %v6525_v32 = vld [vmem:[#allocation17 + $0x94] ss:$8 sps:$4 sm:$0xff]   ;;  %v6523_v33 = vld [vmem:[#allocation17 + $0x90] ss:$8 sps:$4 sm:$0xff]  }
 0x718   :  { %v2665_v47 = vpack.c.bf16 %v2662_v38, %v2662_v38  ;;  %v2667_v23 = vpack.c.bf16 %v2664_v19, %v2664_v19  ;;  %v6526_v34 = vld [vmem:[%s8355_s8 + $0x20] ss:$0 sps:$4 sm:$0xff]   ;;  %v6527_v36 = vld [vmem:[#allocation17 + $0xa0] ss:$8 sps:$4 sm:$0xff]   ;;  %v6532_v38 = vld [vmem:[#allocation17 + $0xb4] ss:$8 sps:$4 sm:$0xff]  }
 0x719   :  { %v2666_v43 = vpack.c.bf16 %v2663_v42, %v2663_v42  ;;  %v3512_v35 = vsel %vm1199_vm6, %v6526_v34, 0  ;;  %v6529_v37 = vld [vmem:[#allocation17 + $0xa4] ss:$8 sps:$4 sm:$0xff]   ;;  %v6530_v40 = vld [vmem:[#allocation17 + $0xb0] ss:$8 sps:$4 sm:$0xff]  }
 0x71a   :  { %v6535_v41 = vld [vmem:[#allocation17 + $0xc4] ss:$8 sps:$4 sm:$0xff]   ;;  %v6533_v42 = vld [vmem:[#allocation17 + $0xc0] ss:$8 sps:$4 sm:$0xff]  }
 0x71b   :  { %3077 = vmatprep.mubr.bf16.mxu1 %v2666_v43  ;;  %v6538_v43 = vld [vmem:[#allocation17 + $0xd4] ss:$8 sps:$4 sm:$0xff]  }
 0x71c   :  { %3078 = vmatmul.mubr.bf16.vlgmr.msra.gmra.mrb[40].mxu1 %v2665_v47  ;;  %v6541_v47 = vld [vmem:[#allocation17 + $0xe4] ss:$8 sps:$4 sm:$0xff]   ;;  %v6579_v34 = vld [vmem:[#allocation20 + $0x94] ss:$8 sps:$4 sm:$0xff]  }
 0x71d   :  { %3087 = vmatpush1.bf16.msra.mxu1 %v6465_v44  ;;  %3118 = vmatprep.mubr.bf16.mxu1 %v7440_v39  ;;  %v6536_v44 = vld [vmem:[#allocation17 + $0xd0] ss:$8 sps:$4 sm:$0xff]  }
 0x71e   :  { %3088 = vmatprep.subr.bf16.mxu1 %v6471_v49  ;;  %v6539_v49 = vld [vmem:[#allocation17 + $0xe0] ss:$8 sps:$4 sm:$0xff]  }
 0x71f   :  { %v2737_v53 = vpop.f32.mrb[36].mxu1 }
 0x720   :  { %v2738_v54 = vadd.f32 %v5495_v50, %v2737_v53  ;;  %v5940_v55 = vpop.f32.mrb[37].mxu1  ;;  %v6544_v50 = vld [vmem:[#allocation17 + $0xf4] ss:$8 sps:$4 sm:$0xff]   ;;  %v5548_v53 = vld [vmem:[#allocation38] ss:$0 sm:$0xff] }
 0x721   :  { %3089 = vmatpush1.bf16.msra.mxu1 %v6469_v51  ;;  %v2740_v56 = vpop.f32.mrb[38].mxu1  ;;  %v6542_v51 = vld [vmem:[#allocation17 + $0xf0] ss:$8 sps:$4 sm:$0xff]  }
 0x722   :  { %v2743_v58 = vmax.f32 %v2738_v54, 0.0  ;;  %v5941_v59 = vpop.f32.mrb[39].mxu1  ;;  %3090 = vmatprep.subr.bf16.mxu1 %v6475_v52  ;;  %v6547_v52 = vld [vmem:[#allocation20 + $0x4] ss:$8 sps:$4 sm:$0xff]  }
 0x724   :  { %v2744_v62 = vpack.c.bf16 %v2743_v58, %v2743_v58 }
 0x725   :  { %3091 = vmatpush1.bf16.msra.mxu1 %v6473_v57 }
 0x726   :  { %5951 = vmatmul.mubr.msk.bf16.vlgmr.msra.gmra.mrb[12].mxu0 %vm3170_vm14, %v2744_v62  ;;  %3092 = vmatprep.subr.bf16.mxu1 %v6479_v60  ;;  %v6545_v60 = vld [vmem:[#allocation20] ss:$8 sps:$4 sm:$0xff]   ;;  %v6550_v62 = vld [vmem:[#allocation20 + $0x14] ss:$8 sps:$4 sm:$0xff]  }
 0x727   :  { %3421 = vmatpush1.bf16.msra.mxu0 %v6492_v61 }
 0x728   :  { %3422 = vmatprep.subr.bf16.mxu0 %v6497_v63  ;;  %v6548_v63 = vld [vmem:[#allocation20 + $0x10] ss:$8 sps:$4 sm:$0xff]  }
 0x729   :  { %3093 = vmatpush1.bf16.msra.mxu1 %v6477_v0  ;;  %v6553_v0 = vld [vmem:[#allocation20 + $0x24] ss:$8 sps:$4 sm:$0xff]  }
 0x72a   :  { %3094 = vmatprep.subr.bf16.mxu1 %v6482_v1  ;;  %v6551_v1 = vld [vmem:[#allocation20 + $0x20] ss:$8 sps:$4 sm:$0xff]  }
 0x72b   :  { %3423 = vmatpush1.bf16.msra.mxu0 %v6495_v2  ;;  %v6556_v2 = vld [vmem:[#allocation20 + $0x34] ss:$8 sps:$4 sm:$0xff]  }
 0x72c   :  { %3424 = vmatprep.subr.bf16.mxu0 %v6500_v3  ;;  %v2793_v3 = vld [vmem:[#allocation16] sm:$0x3] }
 0x72d   :  { %3095 = vmatpush1.bf16.msra.mxu1 %v6480_v4  ;;  %v6554_v4 = vld [vmem:[#allocation20 + $0x30] ss:$8 sps:$4 sm:$0xff]  }
 0x72e   :  { %3096 = vmatprep.subr.bf16.mxu1 %v6485_v5  ;;  %v6559_v5 = vld [vmem:[#allocation20 + $0x44] ss:$8 sps:$4 sm:$0xff]  }
 0x72f   :  { %3425 = vmatpush1.bf16.msra.mxu0 %v6498_v6  ;;  %v2798_v6 = vrot.slane %v2793_v3, %v7881_v46 }
 0x730   :  { %3426 = vmatprep.subr.bf16.mxu0 %v6503_v7  ;;  %v2802_v7 = vrot.slane %v2793_v3, %v7885_v48  ;;  %v6605_v3 = vld [vmem:[%s8357_s12 + $0x20] ss:$8 sps:$4 sm:$0xff]  }
 0x731   :  { %3097 = vmatpush1.bf16.msra.mxu1 %v6483_v8  ;;  %v6557_v8 = vld [vmem:[#allocation20 + $0x40] ss:$8 sps:$4 sm:$0xff]  }
 0x732   :  { %3098 = vmatprep.subr.bf16.mxu1 %v6488_v9  ;;  %v6563_v9 = vld [vmem:[#allocation20 + $0x54] ss:$8 sps:$4 sm:$0xff]  }
 0x733   :  { %3427 = vmatpush1.bf16.msra.mxu0 %v6501_v11 }
 0x734   :  { %3428 = vmatprep.subr.bf16.mxu0 %v6506_v12 }
 0x735   :  { %3099 = vmatpush1.bf16.msra.mxu1 %v6486_v13 }
 0x736   :  { %3100 = vmatprep.subr.bf16.mxu1 %v6491_v14 }
 0x737   :  { %3429 = vmatpush1.bf16.msra.mxu0 %v6504_v15 }
 0x738   :  { %3430 = vmatprep.subr.bf16.mxu0 %v6509_v16  ;;  %v6561_v16 = vld [vmem:[#allocation20 + $0x50] ss:$8 sps:$4 sm:$0xff]  }
 0x739   :  { %3101 = vmatpush1.bf16.msra.mxu1 %v6489_v17 }
 0x73a   :  { %5954 = vmatprep.subr.bf16.mxu1 %v7437_v10 }
 0x73b   :  { %3431 = vmatpush1.bf16.msra.mxu0 %v6507_v20  ;;  %v6567_v20 = vld [vmem:[#allocation20 + $0x64] ss:$8 sps:$4 sm:$0xff]  }
 0x73c   :  { %3119 = vmatmul.mubr.bf16.vlgmr.msra.gmra.mrb[40].mxu1 %v2667_v23  ;;  %3432 = vmatprep.subr.bf16.mxu0 %v6513_v21  ;;  %v6560_v23 = vld [vmem:[%s8356_s26] sm:$0xff]  }
 0x73d   :  { %5955 = vmatpush3.bf16.msra.mxu1 %v6510_v22  ;;  %5964 = vmatprep.mubr.msk.bf16.mxu1 %vm7438_vm0, %v7437_v10 }
 0x73e   :  { %5956 = vmatprep.subr.bf16.mxu1 %v7437_v10 }
 0x73f   :  { %3433 = vmatpush1.bf16.msra.mxu0 %v6511_v24  ;;  %v6565_v24 = vld [vmem:[#allocation20 + $0x60] ss:$8 sps:$4 sm:$0xff]  }
 0x740   :  { %3434 = vmatprep.subr.bf16.mxu0 %v6517_v25 }
 0x741   :  { %5957 = vmatpush3.bf16.msra.mxu1 %v6514_v26  ;;  %v6571_v26 = vld [vmem:[#allocation20 + $0x74] ss:$8 sps:$4 sm:$0xff]  }
 0x742   :  { %5958 = vmatprep.subr.bf16.mxu1 %v7437_v10 }
 0x743   :  { %3435 = vmatpush1.bf16.msra.mxu0 %v6515_v27  ;;  %v6564_v27 = vld [vmem:[%s8356_s26 + $0x8] sm:$0xff]  }
 0x744   :  { %3436 = vmatprep.subr.bf16.mxu0 %v6521_v28  ;;  %v6569_v28 = vld [vmem:[#allocation20 + $0x70] ss:$8 sps:$4 sm:$0xff]  }
 0x745   :  { %5959 = vmatpush3.bf16.msra.mxu1 %v6518_v29  ;;  %v6568_v29 = vld [vmem:[%s8356_s26 + $0x10] sm:$0xff]  }
 0x746   :  { %5960 = vmatprep.subr.bf16.mxu1 %v7437_v10 }
 0x747   :  { %3437 = vmatpush1.bf16.msra.mxu0 %v6519_v30  ;;  %v6572_v30 = vld [vmem:[%s8356_s26 + $0x18] sm:$0xff]  }
 0x748   :  { %3438 = vmatprep.subr.bf16.mxu0 %v6525_v32  ;;  %v6576_v32 = vld [vmem:[%s8356_s26 + $0x20] sm:$0xff]  }
 0x749   :  { %5961 = vmatpush3.bf16.msra.mxu1 %v6522_v31  ;;  %v6575_v31 = vld [vmem:[#allocation20 + $0x84] ss:$8 sps:$4 sm:$0xff]  }
 0x74a   :  { %5962 = vmatprep.subr.bf16.mxu1 %v7437_v10 }
 0x74b   :  { %3439 = vmatpush1.bf16.msra.mxu0 %v6523_v33  ;;  %v6573_v33 = vld [vmem:[#allocation20 + $0x80] ss:$8 sps:$4 sm:$0xff]  }
 0x74c   :  { %3440 = vmatprep.subr.bf16.mxu0 %v6529_v37  ;;  %v6581_v37 = vld [vmem:[#allocation20 + $0xa0] ss:$8 sps:$4 sm:$0xff]  }
 0x74d   :  { %5963 = vmatpush3.bf16.msra.mxu1 %v3512_v35  ;;  %v6580_v35 = vld [vmem:[%s8356_s26 + $0x28] sm:$0xff]  }
 0x74e   :  { %3769 = vmatprep.subr.bf16.mxu1 %v6547_v52  ;;  %v6598_v52 = vld [vmem:[#allocation20 + $0xf0] ss:$8 sps:$4 sm:$0x1f]  }
 0x74f   :  { %3441 = vmatpush1.bf16.msra.mxu0 %v6527_v36  ;;  %v6577_v36 = vld [vmem:[#allocation20 + $0x90] ss:$8 sps:$4 sm:$0xff]  }
 0x750   :  { %3442 = vmatprep.subr.bf16.mxu0 %v6532_v38  ;;  %v6583_v38 = vld [vmem:[#allocation20 + $0xa4] ss:$8 sps:$4 sm:$0xff]  }
 0x753   :  { %3443 = vmatpush1.bf16.msra.mxu0 %v6530_v40  ;;  %v6586_v40 = vld [vmem:[#allocation20 + $0xb4] ss:$8 sps:$4 sm:$0xff]  }
 0x754   :  { %3444 = vmatprep.subr.bf16.mxu0 %v6535_v41  ;;  %v6584_v41 = vld [vmem:[#allocation20 + $0xb0] ss:$8 sps:$4 sm:$0xff]  }
 0x757   :  { %3445 = vmatpush1.bf16.msra.mxu0 %v6533_v42  ;;  %v6589_v42 = vld [vmem:[#allocation20 + $0xc4] ss:$8 sps:$4 sm:$0xff]  }
 0x758   :  { %3446 = vmatprep.subr.bf16.mxu0 %v6538_v43  ;;  %v6587_v43 = vld [vmem:[#allocation20 + $0xc0] ss:$8 sps:$4 sm:$0xff]  }
 0x75b   :  { %3447 = vmatpush1.bf16.msra.mxu0 %v6536_v44  ;;  %v6592_v44 = vld [vmem:[#allocation20 + $0xd4] ss:$8 sps:$4 sm:$0xff]  }
 0x75c   :  { %3448 = vmatprep.subr.bf16.mxu0 %v6541_v47  ;;  %v6590_v47 = vld [vmem:[#allocation20 + $0xd0] ss:$8 sps:$4 sm:$0xff]  }
 0x75f   :  { %3449 = vmatpush1.bf16.msra.mxu0 %v6539_v49  ;;  %v6595_v49 = vld [vmem:[#allocation20 + $0xe4] ss:$8 sps:$4 sm:$0xff]  }
 0x760   :  { %3450 = vmatprep.subr.bf16.mxu0 %v6544_v50  ;;  %v6593_v50 = vld [vmem:[#allocation20 + $0xe0] ss:$8 sps:$4 sm:$0xff]  }
 0x763   :  { %3451 = vmatpush1.bf16.msra.mxu0 %v6542_v51  ;;  %v6596_v51 = vld [vmem:[#allocation20 + $0xf4] ss:$8 sps:$4 sm:$0x1f]  }
 0x764   :  { %5968 = vmatprep.subr.bf16.mxu0 %v7437_v10 }
 0x7f9   :  { %v3208_v54 = vpop.f32.mrb[12].mxu0 }
 0x7fa   :  { %v3209_v55 = vadd.f32 %v5548_v53, %v3208_v54  ;;  %v5952_v56 = vpop.f32.mrb[13].mxu0  ;;  %v3764_v53 = vsel %vm3762_vm15, %v6598_v52, 0  ;;  %v6601_v54 = vld [vmem:[%s8357_s12 + $0x4] ss:$8 sps:$4 sm:$0xff]   ;;  %v6647_v52 = vld [vmem:[%s8357_s12 + $0xe0] ss:$8 sps:$4 sm:$0xff]  }
 0x7fb   :  { %v3211_v57 = vpop.f32.mrb[14].mxu0 }
 0x7fc   :  { %v3214_v58 = vmax.f32 %v3209_v55, 0.0  ;;  %v5953_v59 = vpop.f32.mrb[15].mxu0  ;;  %v5586_v55 = vld [vmem:[%s8358_s28] ss:$0 sm:$0xff] }
 0x7fe   :  { %v3215_v61 = vpack.c.bf16 %v3214_v58, %v3214_v58 }
 0x800   :  { %5965 = vmatmul.mubr.msk.bf16.vlgmr.msra.gmra.mrb[44].mxu1 %vm1195_vm8, %v3215_v61 }
 0x801   :  { %3770 = vmatpush1.bf16.msra.mxu1 %v6545_v60 }
 0x802   :  { %3771 = vmatprep.subr.bf16.mxu1 %v6550_v62  ;;  %v6599_v62 = vld [vmem:[%s8357_s12] ss:$8 sps:$4 sm:$0xff]  }
 0x805   :  { %3772 = vmatpush1.bf16.msra.mxu1 %v6548_v63 }
 0x806   :  { %3773 = vmatprep.subr.bf16.mxu1 %v6553_v0  ;;  %v6604_v0 = vld [vmem:[%s8357_s12 + $0x14] ss:$8 sps:$4 sm:$0xff]  }
 0x809   :  { %3774 = vmatpush1.bf16.msra.mxu1 %v6551_v1  ;;  %v6602_v1 = vld [vmem:[%s8357_s12 + $0x10] ss:$8 sps:$4 sm:$0xff]  }
 0x80a   :  { %3775 = vmatprep.subr.bf16.mxu1 %v6556_v2  ;;  %v6607_v2 = vld [vmem:[%s8357_s12 + $0x24] ss:$8 sps:$4 sm:$0xff]  }
 0x80d   :  { %3776 = vmatpush1.bf16.msra.mxu1 %v6554_v4  ;;  %v6610_v4 = vld [vmem:[%s8357_s12 + $0x34] ss:$8 sps:$4 sm:$0xff]  }
 0x80e   :  { %3777 = vmatprep.subr.bf16.mxu1 %v6559_v5  ;;  %v6608_v5 = vld [vmem:[%s8357_s12 + $0x30] ss:$8 sps:$4 sm:$0xff]  }
 0x80f   :  { %v3120_v11 = vpop.f32.mrb[40].mxu1 }
 0x810   :  { %v6022_v12 = vadd.f32 %v3120_v11, %v2798_v6  ;;  %v3122_v13 = vpop.f32.mrb[41].mxu1  ;;  %v6614_v6 = vld [vmem:[%s8357_s12 + $0x44] ss:$8 sps:$4 sm:$0xff]   ;;  %v6618_v11 = vld [vmem:[%s8357_s12 + $0x54] ss:$8 sps:$4 sm:$0xff]  }
 0x811   :  { %v6023_v14 = vadd.f32 %v3122_v13, %v2802_v7  ;;  %v3124_v15 = vpop.f32.mrb[42].mxu1  ;;  %3778 = vmatpush1.bf16.msra.mxu1 %v6557_v8  ;;  %v3248_v7 = vld [vmem:[#allocation19] sm:$0x3]  ;;  %v6612_v8 = vld [vmem:[%s8357_s12 + $0x40] ss:$8 sps:$4 sm:$0xff]  }
 0x812   :  { %v3127_v17 = vmax.f32 %v6022_v12, 0.0  ;;  %v3125_v19 = vpop.f32.mrb[43].mxu1  ;;  %3779 = vmatprep.subr.bf16.mxu1 %v6563_v9  ;;  %v3253_v9 = vrot.slane %v3248_v7, %v7881_v46  ;;  %v3257_v12 = vrot.slane %v3248_v7, %v7885_v48  ;;  %v6673_v7 = vld [vmem:[%s7640_s6 + $0x270] ss:$20 sps:$4 sm:$0xff]  }
 0x813   :  { %v3128_v21 = vmax.f32 %v6023_v14, 0.0  ;;  %v6616_v14 = vld [vmem:[%s8357_s12 + $0x50] ss:$8 sps:$4 sm:$0xff]  }
 0x814   :  { %v3129_v25 = vpack.c.bf16 %v3127_v17, %v3127_v17  ;;  %v6622_v17 = vld [vmem:[%s8357_s12 + $0x64] ss:$8 sps:$4 sm:$0xff]  }
 0x815   :  { %v3130_v22 = vpack.c.bf16 %v3128_v21, %v3128_v21  ;;  %3780 = vmatpush1.bf16.msra.mxu1 %v6561_v16 }
 0x816   :  { %3781 = vmatprep.subr.bf16.mxu1 %v6567_v20 }
 0x817   :  { %3452 = vmatprep.mubr.bf16.mxu0 %v3130_v22 }
 0x818   :  { %3453 = vmatmul.mubr.bf16.vlgmr.msra.gmra.mrb[16].mxu0 %v3129_v25  ;;  %v6626_v25 = vld [vmem:[%s8357_s12 + $0x74] ss:$8 sps:$4 sm:$0xff]  }
 0x819   :  { %5969 = vmatpush3.bf16.msra.mxu0 %v6560_v23  ;;  %3782 = vmatpush1.bf16.msra.mxu1 %v6565_v24  ;;  %v6620_v24 = vld [vmem:[%s8357_s12 + $0x60] ss:$8 sps:$4 sm:$0xff]  }
 0x81a   :  { %5970 = vmatprep.subr.bf16.mxu0 %v7437_v10  ;;  %3783 = vmatprep.subr.bf16.mxu1 %v6571_v26 }
 0x81b   :  { %5980 = vmatprep.mubr.msk.bf16.mxu0 %vm7438_vm0, %v7437_v10 }
 0x81d   :  { %5971 = vmatpush3.bf16.msra.mxu0 %v6564_v27  ;;  %3784 = vmatpush1.bf16.msra.mxu1 %v6569_v28  ;;  %v6611_v27 = vld [vmem:[%s8359_s3] sm:$0xff]  }
 0x81e   :  { %5972 = vmatprep.subr.bf16.mxu0 %v7437_v10  ;;  %3785 = vmatprep.subr.bf16.mxu1 %v6575_v31  ;;  %v6619_v31 = vld [vmem:[%s8359_s3 + $0x10] sm:$0xff]  }
 0x821   :  { %5973 = vmatpush3.bf16.msra.mxu0 %v6568_v29  ;;  %3786 = vmatpush1.bf16.msra.mxu1 %v6573_v33  ;;  %v6624_v29 = vld [vmem:[%s8357_s12 + $0x70] ss:$8 sps:$4 sm:$0xff]   ;;  %v6627_v33 = vld [vmem:[%s8359_s3 + $0x20] sm:$0xff]  }
 0x822   :  { %5974 = vmatprep.subr.bf16.mxu0 %v7437_v10  ;;  %3787 = vmatprep.subr.bf16.mxu1 %v6579_v34  ;;  %v6630_v34 = vld [vmem:[%s8357_s12 + $0x84] ss:$8 sps:$4 sm:$0xff]  }
 0x825   :  { %5975 = vmatpush3.bf16.msra.mxu0 %v6572_v30  ;;  %3788 = vmatpush1.bf16.msra.mxu1 %v6577_v36  ;;  %v6615_v30 = vld [vmem:[%s8359_s3 + $0x8] sm:$0xff]  }
 0x826   :  { %5976 = vmatprep.subr.bf16.mxu0 %v7437_v10  ;;  %3789 = vmatprep.subr.bf16.mxu1 %v6583_v38  ;;  %v6631_v36 = vld [vmem:[%s8359_s3 + $0x28] sm:$0xff]   ;;  %v6634_v38 = vld [vmem:[%s8357_s12 + $0x94] ss:$8 sps:$4 sm:$0xff]  }
 0x829   :  { %5977 = vmatpush3.bf16.msra.mxu0 %v6576_v32  ;;  %3790 = vmatpush1.bf16.msra.mxu1 %v6581_v37  ;;  %v6623_v32 = vld [vmem:[%s8359_s3 + $0x18] sm:$0xff]  }
 0x82a   :  { %5978 = vmatprep.subr.bf16.mxu0 %v7437_v10  ;;  %3791 = vmatprep.subr.bf16.mxu1 %v6586_v40  ;;  %v6632_v37 = vld [vmem:[%s8357_s12 + $0x90] ss:$8 sps:$4 sm:$0xff]   ;;  %v6637_v40 = vld [vmem:[%s8357_s12 + $0xa4] ss:$8 sps:$4 sm:$0xff]  }
 0x82d   :  { %5979 = vmatpush3.bf16.msra.mxu0 %v6580_v35  ;;  %3792 = vmatpush1.bf16.msra.mxu1 %v6584_v41  ;;  %v6628_v35 = vld [vmem:[%s8357_s12 + $0x80] ss:$8 sps:$4 sm:$0xff]  }
 0x82e   :  { %3793 = vmatprep.subr.bf16.mxu1 %v6589_v42  ;;  %4126 = vmatprep.subr.bf16.mxu0 %v6601_v54  ;;  %v6635_v41 = vld [vmem:[%s8357_s12 + $0xa0] ss:$8 sps:$4 sm:$0xff]   ;;  %v6640_v42 = vld [vmem:[%s8357_s12 + $0xb4] ss:$8 sps:$4 sm:$0xff]  }
 0x82f   :  { %v6652_v54 = vld [vmem:[%s8357_s12 + $0xf0] ss:$8 sps:$4 sm:$0x1f]  }
 0x831   :  { %3794 = vmatpush1.bf16.msra.mxu1 %v6587_v43  ;;  %v6638_v43 = vld [vmem:[%s8357_s12 + $0xb0] ss:$8 sps:$4 sm:$0xff]  }
 0x832   :  { %3795 = vmatprep.subr.bf16.mxu1 %v6592_v44  ;;  %v6643_v44 = vld [vmem:[%s8357_s12 + $0xc4] ss:$8 sps:$4 sm:$0xff]  }
 0x835   :  { %3796 = vmatpush1.bf16.msra.mxu1 %v6590_v47  ;;  %v6641_v47 = vld [vmem:[%s8357_s12 + $0xc0] ss:$8 sps:$4 sm:$0xff]  }
 0x836   :  { %3797 = vmatprep.subr.bf16.mxu1 %v6595_v49  ;;  %v6646_v49 = vld [vmem:[%s8357_s12 + $0xd4] ss:$8 sps:$4 sm:$0xff]  }
 0x839   :  { %3798 = vmatpush1.bf16.msra.mxu1 %v6593_v50  ;;  %v6644_v50 = vld [vmem:[%s8357_s12 + $0xd0] ss:$8 sps:$4 sm:$0xff]  }
 0x83a   :  { %5625 = vmatprep.subr.msk.bf16.mxu1 %vm3762_vm15, %v6596_v51  ;;  %v6649_v51 = vld [vmem:[%s8357_s12 + $0xe4] ss:$8 sps:$4 sm:$0xff]  }
 0x83d   :  { %3800 = vmatpush1.bf16.msra.mxu1 %v3764_v53  ;;  %v6650_v53 = vld [vmem:[%s8357_s12 + $0xf4] ss:$8 sps:$4 sm:$0x1f]  }
 0x83e   :  { %5984 = vmatprep.subr.bf16.mxu1 %v7437_v10 }
 0x8d3   :  { %v3548_v56 = vpop.f32.mrb[44].mxu1 }
 0x8d4   :  { %v3549_v57 = vadd.f32 %v5586_v55, %v3548_v56  ;;  %v5966_v58 = vpop.f32.mrb[45].mxu1  ;;  %v4121_v55 = vsel %vm3762_vm15, %v6652_v54, 0  ;;  %v6655_v56 = vld [vmem:[%s7640_s6 + $0x1f8] ss:$20 sps:$4 sm:$0xff]  }
 0x8d5   :  { %v3551_v59 = vpop.f32.mrb[46].mxu1  ;;  %v5627_v58 = vld [vmem:[%s8360_s0] ss:$0 sm:$0xff] }
 0x8d6   :  { %v3554_v60 = vmax.f32 %v3549_v57, 0.0  ;;  %v5967_v61 = vpop.f32.mrb[47].mxu1  ;;  %v6658_v57 = vld [vmem:[%s7640_s6 + $0x200] ss:$20 sps:$4 sm:$0xff]  }
 0x8d8   :  { %v3555_v63 = vpack.c.bf16 %v3554_v60, %v3554_v60 }
 0x8da   :  { %5981 = vmatmul.mubr.msk.bf16.vlgmr.msra.gmra.mrb[20].mxu0 %vm3869_vm1, %v3555_v63 }
 0x8db   :  { %4127 = vmatpush1.bf16.msra.mxu0 %v6599_v62 }
 0x8dc   :  { %4128 = vmatprep.subr.bf16.mxu0 %v6604_v0 }
 0x8df   :  { %4129 = vmatpush1.bf16.msra.mxu0 %v6602_v1  ;;  %v6653_v1 = vld [vmem:[%s7640_s6 + $0x1f4] ss:$20 sps:$4 sm:$0xff]  }
 0x8e0   :  { %4130 = vmatprep.subr.bf16.mxu0 %v6607_v2 }
 0x8e3   :  { %4131 = vmatpush1.bf16.msra.mxu0 %v6605_v3  ;;  %v6661_v3 = vld [vmem:[%s7640_s6 + $0x220] ss:$20 sps:$4 sm:$0xff]  }
 0x8e4   :  { %4132 = vmatprep.subr.bf16.mxu0 %v6610_v4  ;;  %v6659_v4 = vld [vmem:[%s7640_s6 + $0x21c] ss:$20 sps:$4 sm:$0xff]  }
 0x8e7   :  { %4133 = vmatpush1.bf16.msra.mxu0 %v6608_v5  ;;  %v6667_v5 = vld [vmem:[%s7640_s6 + $0x248] ss:$20 sps:$4 sm:$0xff]  }
 0x8e8   :  { %4134 = vmatprep.subr.bf16.mxu0 %v6614_v6  ;;  %v6665_v6 = vld [vmem:[%s7640_s6 + $0x244] ss:$20 sps:$4 sm:$0xff]  }
 0x8eb   :  { %v3454_v13 = vpop.f32.mrb[16].mxu0  ;;  %4135 = vmatpush1.bf16.msra.mxu0 %v6612_v8  ;;  %v6671_v8 = vld [vmem:[%s7640_s6 + $0x26c] ss:$20 sps:$4 sm:$0xff]  }
 0x8ec   :  { %v3455_v15 = vadd.f32 %v3454_v13, %v3253_v9  ;;  %v3456_v16 = vpop.f32.mrb[17].mxu0  ;;  %4136 = vmatprep.subr.bf16.mxu0 %v6618_v11  ;;  %v6679_v9 = vld [vmem:[%s7640_s6 + $0x298] ss:$20 sps:$4 sm:$0xff]   ;;  %v3588_v11 = vld [vmem:[#allocation22] sm:$0x3] }
 0x8ed   :  { %v3457_v19 = vadd.f32 %v3456_v16, %v3257_v12  ;;  %v3458_v20 = vpop.f32.mrb[18].mxu0  ;;  %v6677_v12 = vld [vmem:[%s7640_s6 + $0x294] ss:$20 sps:$4 sm:$0xff]   ;;  %v6683_v16 = vld [vmem:[%s7640_s6 + $0x2bc] ss:$20 sps:$4 sm:$0xff]  }
 0x8ee   :  { %v3461_v21 = vmax.f32 %v3455_v15, 0.0  ;;  %v3459_v22 = vpop.f32.mrb[19].mxu0  ;;  %v6685_v13 = vld [vmem:[%s7640_s6 + $0x2c0] ss:$20 sps:$4 sm:$0xff]   ;;  %v3597_v15 = vrot.slane %v3588_v11, %v7885_v48 }
 0x8ef   :  { %v3462_v23 = vmax.f32 %v3457_v19, 0.0  ;;  %4137 = vmatpush1.bf16.msra.mxu0 %v6616_v14  ;;  %v3593_v14 = vrot.slane %v3588_v11, %v7881_v46  ;;  %v6715_v11 = vld [vmem:[%s7640_s6 + $0xcc] ss:$20 sps:$4 sm:$0xff]  }
 0x8f0   :  { %4138 = vmatprep.subr.bf16.mxu0 %v6622_v17  ;;  %v3463_v28 = vpack.c.bf16 %v3461_v21, %v3461_v21 }
 0x8f1   :  { %v3464_v26 = vpack.c.bf16 %v3462_v23, %v3462_v23 }
 0x8f3   :  { %5626 = vmatprep.mubr.msk.bf16.mxu1 %vm3758_vm3, %v3464_v26  ;;  %4139 = vmatpush1.bf16.msra.mxu0 %v6620_v24 }
 0x8f4   :  { %3802 = vmatmul.mubr.bf16.vlgmr.msra.gmra.mrb[48].mxu1 %v3463_v28  ;;  %4140 = vmatprep.subr.bf16.mxu0 %v6626_v25 }
 0x8f5   :  { %5985 = vmatpush3.bf16.msra.mxu1 %v6611_v27  ;;  %5996 = vmatprep.mubr.msk.bf16.mxu1 %vm7438_vm0, %v7437_v10  ;;  %v6656_v27 = vld [vmem:[%s7640_s6 + $0x1fc] ss:$20 sps:$4 sm:$0xff]  }
 0x8f6   :  { %5986 = vmatprep.subr.bf16.mxu1 %v7437_v10 }
 0x8f7   :  { %4141 = vmatpush1.bf16.msra.mxu0 %v6624_v29  ;;  %v6664_v29 = vld [vmem:[%s7640_s6 + $0x228] ss:$20 sps:$4 sm:$0xff]  }
 0x8f8   :  { %4142 = vmatprep.subr.bf16.mxu0 %v6630_v34  ;;  %v6674_v34 = vld [vmem:[%s7640_s6 + $0x274] ss:$20 sps:$4 sm:$0xff]  }
 0x8f9   :  { %5987 = vmatpush3.bf16.msra.mxu1 %v6615_v30  ;;  %v6662_v30 = vld [vmem:[%s7640_s6 + $0x224] ss:$20 sps:$4 sm:$0xff]  }
 0x8fa   :  { %5988 = vmatprep.subr.bf16.mxu1 %v7437_v10 }
 0x8fb   :  { %4143 = vmatpush1.bf16.msra.mxu0 %v6628_v35  ;;  %v6682_v35 = vld [vmem:[%s7640_s6 + $0x2a0] ss:$20 sps:$4 sm:$0xff]  }
 0x8fc   :  { %4144 = vmatprep.subr.bf16.mxu0 %v6634_v38  ;;  %v6686_v38 = vld [vmem:[%s7640_s6 + $0x2c4] ss:$20 sps:$4 sm:$0xff]  }
 0x8fd   :  { %5989 = vmatpush3.bf16.msra.mxu1 %v6619_v31  ;;  %v6670_v31 = vld [vmem:[%s7640_s6 + $0x250] ss:$20 sps:$4 sm:$0xff]  }
 0x8fe   :  { %5990 = vmatprep.subr.bf16.mxu1 %v7437_v10 }
 0x8ff   :  { %4145 = vmatpush1.bf16.msra.mxu0 %v6632_v37  ;;  %v6688_v37 = vld [vmem:[%s7640_s6 + $0x2c8] ss:$20 sps:$4 sm:$0xff]  }
 0x900   :  { %4146 = vmatprep.subr.bf16.mxu0 %v6637_v40  ;;  %v4382_v40 = vld [vmem:[%s7640_s6 + $0x2e4] sm:$0x33] }
 0x901   :  { %5991 = vmatpush3.bf16.msra.mxu1 %v6623_v32  ;;  %v6668_v32 = vld [vmem:[%s7640_s6 + $0x24c] ss:$20 sps:$4 sm:$0xff]  }
 0x902   :  { %5992 = vmatprep.subr.bf16.mxu1 %v7437_v10 }
 0x903   :  { %4147 = vmatpush1.bf16.msra.mxu0 %v6635_v41  ;;  %v4383_v41 = vld [vmem:[%s7640_s6 + $0x2ec] sm:$0x33] }
 0x904   :  { %4148 = vmatprep.subr.bf16.mxu0 %v6640_v42  ;;  %v5708_v42 = vcombine.high %v4382_v40, %v4382_v40 }
 0x905   :  { %5993 = vmatpush3.bf16.msra.mxu1 %v6627_v33  ;;  %v6676_v33 = vld [vmem:[%s7640_s6 + $0x278] ss:$20 sps:$4 sm:$0xff]  }
 0x906   :  { %5994 = vmatprep.subr.bf16.mxu1 %v7437_v10 }
 0x907   :  { %4149 = vmatpush1.bf16.msra.mxu0 %v6638_v43  ;;  %v5710_v43 = vcombine.high %v4383_v41, %v4383_v41 }
 0x908   :  { %4150 = vmatprep.subr.bf16.mxu0 %v6643_v44  ;;  %v5707_v44 = vcombine.low %v4382_v40, %v4382_v40  ;;  %v6741_v40 = vld [vmem:[%s7640_s6 + $0x194] ss:$20 sps:$4 sm:$0xff]  }
 0x909   :  { %5995 = vmatpush3.bf16.msra.mxu1 %v6631_v36  ;;  %v6680_v36 = vld [vmem:[%s7640_s6 + $0x29c] ss:$20 sps:$4 sm:$0xff]  }
 0x90a   :  { %4572 = vmatprep.subr.bf16.mxu1 %v6655_v56 }
 0x90b   :  { %4151 = vmatpush1.bf16.msra.mxu0 %v6641_v47  ;;  %v5709_v47 = vcombine.low %v4383_v41, %v4383_v41  ;;  %v6744_v41 = vld [vmem:[%s7640_s6 + $0x84] ss:$20 sps:$4 sm:$0xff]  }
 0x90c   :  { %4152 = vmatprep.subr.bf16.mxu0 %v6646_v49  ;;  %v4558_v49 = vsel %vm1040_vm2, %v5707_v44, 0  ;;  %v6742_v44 = vld [vmem:[%s7640_s6 + $0x80] ss:$20 sps:$4 sm:$0xff]  }
 0x90f   :  { %4153 = vmatpush1.bf16.msra.mxu0 %v6644_v50  ;;  %v4564_v50 = vsel %vm1040_vm2, %v5709_v47, 0  ;;  %v6747_v47 = vld [vmem:[%s7640_s6 + $0x1bc] ss:$20 sps:$4 sm:$0xff]  }
 0x910   :  { %4154 = vmatprep.subr.bf16.mxu0 %v6649_v51  ;;  %v6695_v51 = vld [vmem:[%s7640_s6 + $0x4] ss:$20 sps:$4 sm:$0xff]  }
 0x913   :  { %4155 = vmatpush1.bf16.msra.mxu0 %v6647_v52  ;;  %v5669_v52 = vld [vmem:[%s7635_s4] ss:$0 sm:$0xff] }
 0x914   :  { %5667 = vmatprep.subr.msk.bf16.mxu0 %vm3762_vm15, %v6650_v53 }
 0x917   :  { %4157 = vmatpush1.bf16.msra.mxu0 %v4121_v55 }
 0x918   :  { %4613 = vmatprep.subr.bf16.mxu0 %v6658_v57 }
 0x9ad   :  { %v3907_v59 = vpop.f32.mrb[20].mxu0 }
 0x9ae   :  { %v3908_v60 = vadd.f32 %v5627_v58, %v3907_v59  ;;  %v5982_v61 = vpop.f32.mrb[21].mxu0  ;;  %v6693_v59 = vld [vmem:[%s7640_s6] ss:$20 sps:$4 sm:$0xff]  }
 0x9af   :  { %v3910_v62 = vpop.f32.mrb[22].mxu0 }
 0x9b0   :  { %v3913_v63 = vmax.f32 %v3908_v60, 0.0  ;;  %v5983_v0 = vpop.f32.mrb[23].mxu0  ;;  %v6696_v60 = vld [vmem:[%s7640_s6 + $0x204] ss:$20 sps:$4 sm:$0xff]   ;;  %v6699_v62 = vld [vmem:[%s7640_s6 + $0x2c] ss:$20 sps:$4 sm:$0xff]  }
 0x9b1   :  { %v6700_v0 = vld [vmem:[%s7640_s6 + $0x22c] ss:$20 sps:$4 sm:$0xff]  }
 0x9b2   :  { %v3914_v2 = vpack.c.bf16 %v3913_v63, %v3913_v63  ;;  %v6697_v63 = vld [vmem:[%s7640_s6 + $0x28] ss:$20 sps:$4 sm:$0xff]  }
 0x9b4   :  { %5997 = vmatmul.mubr.msk.bf16.vlgmr.msra.gmra.mrb[52].mxu1 %vm3869_vm1, %v3914_v2  ;;  %v6701_v2 = vld [vmem:[%s7640_s6 + $0x50] ss:$20 sps:$4 sm:$0xff]  }
 0x9b5   :  { %4573 = vmatpush1.bf16.msra.mxu1 %v6653_v1  ;;  %4604 = vmatprep.mubr.bf16.mxu1 %v7440_v39  ;;  %v6703_v1 = vld [vmem:[%s7640_s6 + $0x54] ss:$20 sps:$4 sm:$0xff]  }
 0x9b6   :  { %4574 = vmatprep.subr.bf16.mxu1 %v6661_v3  ;;  %v6704_v3 = vld [vmem:[%s7640_s6 + $0x254] ss:$20 sps:$4 sm:$0xff]  }
 0x9b9   :  { %4575 = vmatpush1.bf16.msra.mxu1 %v6659_v4  ;;  %v6707_v4 = vld [vmem:[%s7640_s6 + $0x7c] ss:$20 sps:$4 sm:$0xff]  }
 0x9ba   :  { %4576 = vmatprep.subr.bf16.mxu1 %v6667_v5  ;;  %v6705_v5 = vld [vmem:[%s7640_s6 + $0x78] ss:$20 sps:$4 sm:$0xff]  }
 0x9bd   :  { %4577 = vmatpush1.bf16.msra.mxu1 %v6665_v6  ;;  %v6708_v6 = vld [vmem:[%s7640_s6 + $0x27c] ss:$20 sps:$4 sm:$0xff]  }
 0x9be   :  { %4578 = vmatprep.subr.bf16.mxu1 %v6673_v7  ;;  %v6711_v7 = vld [vmem:[%s7640_s6 + $0xa4] ss:$20 sps:$4 sm:$0xff]  }
 0x9c1   :  { %4579 = vmatpush1.bf16.msra.mxu1 %v6671_v8  ;;  %v6709_v8 = vld [vmem:[%s7640_s6 + $0xa0] ss:$20 sps:$4 sm:$0xff]  }
 0x9c2   :  { %4580 = vmatprep.subr.bf16.mxu1 %v6679_v9  ;;  %v6712_v9 = vld [vmem:[%s7640_s6 + $0x2a4] ss:$20 sps:$4 sm:$0xff]  }
 0x9c5   :  { %4581 = vmatpush1.bf16.msra.mxu1 %v6677_v12  ;;  %v8195_v12 = vld [vmem:[#allocation23] sm:$0x3] }
 0x9c6   :  { %4582 = vmatprep.subr.bf16.mxu1 %v6685_v13  ;;  %v6713_v13 = vld [vmem:[%s7640_s6 + $0xc8] ss:$20 sps:$4 sm:$0xff]  }
 0x9c7   :  { %v3803_v17 = vpop.f32.mrb[48].mxu1 }
 0x9c8   :  { %v3804_v19 = vadd.f32 %v3803_v17, %v3593_v14  ;;  %v3805_v20 = vpop.f32.mrb[49].mxu1  ;;  %v6716_v14 = vld [vmem:[%s7640_s6 + $0x2cc] ss:$20 sps:$4 sm:$0xff]   ;;  %v3956_v17 = vrot.slane %v8195_v12, %v7885_v48 }
 0x9c9   :  { %v3806_v21 = vadd.f32 %v3805_v20, %v3597_v15  ;;  %v3807_v22 = vpop.f32.mrb[50].mxu1  ;;  %4583 = vmatpush1.bf16.msra.mxu1 %v6683_v16  ;;  %v6719_v15 = vld [vmem:[%s7640_s6 + $0xf4] ss:$20 sps:$4 sm:$0xff]   ;;  %v6717_v20 = vld [vmem:[%s7640_s6 + $0xf0] ss:$20 sps:$4 sm:$0xff]  }
 0x9ca   :  { %v3810_v23 = vmax.f32 %v3804_v19, 0.0  ;;  %v3808_v24 = vpop.f32.mrb[51].mxu1  ;;  %5712 = vmatprep.subr.msk.bf16.mxu1 %vm1040_vm2, %v5708_v42  ;;  %v6720_v16 = vld [vmem:[%s7640_s6 + $0x2f4] ss:$0 sps:$4 sm:$0x33]  }
 0x9cb   :  { %v3811_v25 = vmax.f32 %v3806_v21, 0.0  ;;  %v4570_v22 = vsel %vm1040_vm2, %v6720_v16, 0  ;;  %v6726_v24 = vld [vmem:[%s7640_s6 + $0xc] ss:$20 sps:$4 sm:$0xff]   ;;  %v6739_v42 = vld [vmem:[%s7640_s6 + $0x190] ss:$20 sps:$4 sm:$0xff]  }
 0x9cc   :  { %v3812_v28 = vpack.c.bf16 %v3810_v23, %v3810_v23  ;;  %v6723_v23 = vld [vmem:[%s7640_s6 + $0x11c] ss:$20 sps:$4 sm:$0xff]   ;;  %v6776_v16 = vld [vmem:[%s7640_s6 + $0x1c0] ss:$20 sps:$4 sm:$0xff]  }
 0x9cd   :  { %v3813_v26 = vpack.c.bf16 %v3811_v25, %v3811_v25  ;;  %4585 = vmatpush1.bf16.msra.mxu1 %v4558_v49  ;;  %v6750_v49 = vld [vmem:[%s7640_s6 + $0xac] ss:$20 sps:$4 sm:$0xff]  }
 0x9ce   :  { %6000 = vmatprep.subr.bf16.mxu1 %v7437_v10 }
 0x9cf   :  { %5668 = vmatprep.mubr.msk.bf16.mxu0 %vm3758_vm3, %v3813_v26 }
 0x9d0   :  { %4159 = vmatmul.mubr.bf16.vlgmr.msra.gmra.mrb[24].mxu0 %v3812_v28 }
 0x9d1   :  { %4614 = vmatpush1.bf16.msra.mxu0 %v6656_v27  ;;  %4645 = vmatprep.mubr.bf16.mxu0 %v7440_v39 }
 0x9d2   :  { %4615 = vmatprep.subr.bf16.mxu0 %v6664_v29  ;;  %v6721_v29 = vld [vmem:[%s7640_s6 + $0x118] ss:$20 sps:$4 sm:$0xff]  }
 0x9d5   :  { %4616 = vmatpush1.bf16.msra.mxu0 %v6662_v30 }
 0x9d6   :  { %4617 = vmatprep.subr.bf16.mxu0 %v6670_v31  ;;  %v6729_v31 = vld [vmem:[%s7640_s6 + $0x144] ss:$20 sps:$4 sm:$0xff]  }
 0x9d9   :  { %4618 = vmatpush1.bf16.msra.mxu0 %v6668_v32  ;;  %v6732_v32 = vld [vmem:[%s7640_s6 + $0x34] ss:$20 sps:$4 sm:$0xff]  }
 0x9da   :  { %4619 = vmatprep.subr.bf16.mxu0 %v6676_v33  ;;  %v6727_v33 = vld [vmem:[%s7640_s6 + $0x140] ss:$20 sps:$4 sm:$0xff]  }
 0x9dd   :  { %4620 = vmatpush1.bf16.msra.mxu0 %v6674_v34  ;;  %v6730_v34 = vld [vmem:[%s7640_s6 + $0x30] ss:$20 sps:$4 sm:$0xff]  }
 0x9de   :  { %4621 = vmatprep.subr.bf16.mxu0 %v6682_v35  ;;  %v6735_v35 = vld [vmem:[%s7640_s6 + $0x16c] ss:$20 sps:$4 sm:$0xff]  }
 0x9e1   :  { %4622 = vmatpush1.bf16.msra.mxu0 %v6680_v36  ;;  %v6738_v36 = vld [vmem:[%s7640_s6 + $0x5c] ss:$20 sps:$4 sm:$0xff]  }
 0x9e2   :  { %4623 = vmatprep.subr.bf16.mxu0 %v6688_v37  ;;  %v6733_v37 = vld [vmem:[%s7640_s6 + $0x168] ss:$20 sps:$4 sm:$0xff]  }
 0x9e5   :  { %4624 = vmatpush1.bf16.msra.mxu0 %v6686_v38  ;;  %v6736_v38 = vld [vmem:[%s7640_s6 + $0x58] ss:$20 sps:$4 sm:$0xff]  }
 0x9e6   :  { %5714 = vmatprep.subr.msk.bf16.mxu0 %vm1040_vm2, %v5710_v43  ;;  %v3952_v43 = vrot.slane %v8195_v12, %v7881_v46  ;;  %v6772_v12 = vld [vmem:[%s7640_s6 + $0x198] ss:$20 sps:$4 sm:$0xff]  }
 0x9e9   :  { %4626 = vmatpush1.bf16.msra.mxu0 %v4564_v50  ;;  %v4343_v50 = vld [vmem:[%s7640_s6 + $0x1e0] sm:$0xff] }
 0x9ea   :  { %5037 = vmatprep.subr.bf16.mxu0 %v6695_v51  ;;  %v6745_v51 = vld [vmem:[%s7640_s6 + $0x1b8] ss:$20 sps:$4 sm:$0xff]  }
 0xa87   :  { %v4263_v53 = vpop.f32.mrb[52].mxu1 }
 0xa88   :  { %v4264_v54 = vadd.f32 %v5669_v52, %v4263_v53  ;;  %v5998_v55 = vpop.f32.mrb[53].mxu1  ;;  %v6748_v53 = vld [vmem:[%s7640_s6 + $0xa8] ss:$20 sps:$4 sm:$0xff]  }
 0xa89   :  { %v4266_v56 = vpop.f32.mrb[54].mxu1  ;;  %v5777_v55 = vcombine.low %v4343_v50, %v4343_v50 }
 0xa8a   :  { %v4269_v57 = vmax.f32 %v4264_v54, 0.0  ;;  %v5999_v58 = vpop.f32.mrb[55].mxu1  ;;  %v5778_v54 = vcombine.high %v4343_v50, %v4343_v50  ;;  %v6754_v56 = vld [vmem:[%s7640_s6 + $0xd4] ss:$20 sps:$4 sm:$0xff]  }
 0xa8b   :  { %v6752_v58 = vld [vmem:[%s7640_s6 + $0xd0] ss:$20 sps:$4 sm:$0xff]  }
 0xa8c   :  { %v8170_v61 = vpack.c.bf16 %v4269_v57, %v4269_v57 }
 0xa8e   :  { %5713 = vmatmul.mubr.msk.bf16.vlgmr.msra.gmra.mrb[56].mxu1 %vm1393_vm10, %v8170_v61  ;;  %5715 = vmatmul.mubr.msk.bf16.vlgmr.msra.gmra.mrb[28].mxu0 %vm1393_vm10, %v8170_v61 }
 0xa8f   :  { %6001 = vmatpush3.bf16.msra.mxu1 %v6696_v60  ;;  %5038 = vmatpush1.bf16.msra.mxu0 %v6693_v59  ;;  %v5023_v59 = vsel %vm1199_vm6, %v5777_v55, 0  ;;  %v6758_v60 = vld [vmem:[%s7640_s6 + $0xfc] ss:$20 sps:$4 sm:$0xff]  }
 0xa90   :  { %6002 = vmatprep.subr.bf16.mxu1 %v7437_v10  ;;  %5039 = vmatprep.subr.bf16.mxu0 %v6699_v62 }
 0xa91   :  { %6014 = vmatprep.mubr.msk.bf16.mxu1 %vm7438_vm0, %v7437_v10 }
 0xa93   :  { %6003 = vmatpush3.bf16.msra.mxu1 %v6700_v0  ;;  %5040 = vmatpush1.bf16.msra.mxu0 %v6697_v63  ;;  %v6756_v63 = vld [vmem:[%s7640_s6 + $0xf8] ss:$20 sps:$4 sm:$0xff]  }
 0xa94   :  { %6004 = vmatprep.subr.bf16.mxu1 %v7437_v10  ;;  %5041 = vmatprep.subr.bf16.mxu0 %v6703_v1  ;;  %v6762_v0 = vld [vmem:[%s7640_s6 + $0x124] ss:$20 sps:$4 sm:$0xff]  }
 0xa95   :  { %v6763_v1 = vld [vmem:[%s7640_s6 + $0x38] ss:$20 sps:$4 sm:$0xff]  }
 0xa97   :  { %6005 = vmatpush3.bf16.msra.mxu1 %v6704_v3  ;;  %5042 = vmatpush1.bf16.msra.mxu0 %v6701_v2  ;;  %v6760_v2 = vld [vmem:[%s7640_s6 + $0x120] ss:$20 sps:$4 sm:$0xff]  }
 0xa98   :  { %6006 = vmatprep.subr.bf16.mxu1 %v7437_v10  ;;  %5043 = vmatprep.subr.bf16.mxu0 %v6707_v4  ;;  %v6766_v3 = vld [vmem:[%s7640_s6 + $0x14c] ss:$20 sps:$4 sm:$0xff]  }
 0xa99   :  { %v6767_v4 = vld [vmem:[%s7640_s6 + $0x60] ss:$20 sps:$4 sm:$0xff]  }
 0xa9b   :  { %6007 = vmatpush3.bf16.msra.mxu1 %v6708_v6  ;;  %5044 = vmatpush1.bf16.msra.mxu0 %v6705_v5  ;;  %v6764_v5 = vld [vmem:[%s7640_s6 + $0x148] ss:$20 sps:$4 sm:$0xff]  }
 0xa9c   :  { %6008 = vmatprep.subr.bf16.mxu1 %v7437_v10  ;;  %5045 = vmatprep.subr.bf16.mxu0 %v6711_v7  ;;  %v6770_v6 = vld [vmem:[%s7640_s6 + $0x174] ss:$20 sps:$4 sm:$0xff]  }
 0xa9d   :  { %v6771_v7 = vld [vmem:[%s7640_s6 + $0x88] ss:$20 sps:$4 sm:$0xff]  }
 0xa9f   :  { %6009 = vmatpush3.bf16.msra.mxu1 %v6712_v9  ;;  %5046 = vmatpush1.bf16.msra.mxu0 %v6709_v8  ;;  %v6768_v8 = vld [vmem:[%s7640_s6 + $0x170] ss:$20 sps:$4 sm:$0xff]  }
 0xaa0   :  { %6010 = vmatprep.subr.bf16.mxu1 %v7437_v10  ;;  %5047 = vmatprep.subr.bf16.mxu0 %v6715_v11  ;;  %v6774_v9 = vld [vmem:[%s7640_s6 + $0x19c] ss:$20 sps:$4 sm:$0xff]  }
 0xaa1   :  { %v6775_v11 = vld [vmem:[%s7640_s6 + $0xb0] ss:$20 sps:$4 sm:$0xff]  }
 0xaa3   :  { %v4160_v19 = vpop.f32.mrb[24].mxu0  ;;  %6011 = vmatpush3.bf16.msra.mxu1 %v6716_v14  ;;  %5048 = vmatpush1.bf16.msra.mxu0 %v6713_v13  ;;  %v6778_v13 = vld [vmem:[%s7640_s6 + $0x1c4] ss:$20 sps:$4 sm:$0xff]   ;;  %v4344_v14 = vld [vmem:[%s7640_s6 + $0x1e8] sm:$0xff] }
 0xaa4   :  { %v4162_v21 = vpop.f32.mrb[25].mxu0  ;;  %6012 = vmatprep.subr.bf16.mxu1 %v7437_v10  ;;  %5049 = vmatprep.subr.bf16.mxu0 %v6719_v15  ;;  %v6724_v10 = vld [vmem:[%s7640_s6 + $0x8] ss:$20 sps:$4 sm:$0xff]   ;;  %v4161_v52 = vadd.f32 %v4160_v19, %v3952_v43  ;;  %v6779_v15 = vld [vmem:[%s7640_s6 + $0xd8] ss:$20 sps:$4 sm:$0xff]   ;;  %v5779_v19 = vcombine.low %v4344_v14, %v4344_v14 }
 0xaa5   :  { %v4163_v25 = vadd.f32 %v4162_v21, %v3956_v17  ;;  %v4164_v26 = vpop.f32.mrb[26].mxu0  ;;  %v5780_v17 = vcombine.high %v4344_v14, %v4344_v14 }
 0xaa6   :  { %v4165_v27 = vpop.f32.mrb[27].mxu0  ;;  %v4167_v57 = vmax.f32 %v4161_v52, 0.0  ;;  %v5029_v21 = vsel %vm1199_vm6, %v5779_v19, 0  ;;  %v6787_v26 = vld [vmem:[%s7640_s6 + $0x1c8] ss:$20 sps:$4 sm:$0xff]  }
 0xaa7   :  { %v4168_v28 = vmax.f32 %v4163_v25, 0.0  ;;  %6013 = vmatpush3.bf16.msra.mxu1 %v4570_v22  ;;  %5050 = vmatpush1.bf16.msra.mxu0 %v6717_v20  ;;  %v6782_v20 = vld [vmem:[%s7640_s6 + $0x100] ss:$20 sps:$4 sm:$0xff]   ;;  %v6783_v22 = vld [vmem:[%s7640_s6 + $0x128] ss:$20 sps:$4 sm:$0xff]  }
 0xaa8   :  { %5051 = vmatprep.subr.bf16.mxu0 %v6723_v23  ;;  %5078 = vmatprep.subr.bf16.mxu1 %v6726_v24  ;;  %v8240_v62 = vpack.c.bf16 %v4167_v57, %v4167_v57  ;;  %v6784_v23 = vld [vmem:[%s7640_s6 + $0x150] ss:$20 sps:$4 sm:$0xff]   ;;  %v6785_v24 = vld [vmem:[%s7640_s6 + $0x178] ss:$20 sps:$4 sm:$0xff]   ;;  %v6786_v25 = vld [vmem:[%s7640_s6 + $0x1a0] ss:$20 sps:$4 sm:$0xff]  }
 0xaa9   :  { %v4170_v30 = vpack.c.bf16 %v4168_v28, %v4168_v28  ;;  %v6788_v27 = vld [vmem:[%s7640_s6 + $0x1f0] ss:$0 sps:$4 sm:$0xff]  }
 0xaaa   :  { %6015 = vmatmul.mubr.msk.bf16.vlgmr.msra.gmra.mrb[60].mxu1 %vm1393_vm10, %v8170_v61  ;;  %v6759_v61 = vld [vmem:[%s7640_s6 + $0x10] ss:$20 sps:$4 sm:$0xff]   ;;  %v5035_v28 = vsel %vm1199_vm6, %v6788_v27, 0  ;;  %s7441_s6 = smov [#allocation40]  }
 0xaab   :  { %5052 = vmatpush1.bf16.msra.mxu0 %v6721_v29  ;;  %5783 = vmatprep.mubr.msk.bf16.mxu0 %vm1195_vm8, %v4170_v30 }
 0xaac   :  { %5079 = vmatpush1.bf16.msra.mxu1 %v6724_v10  ;;  %5785 = vmatprep.mubr.msk.bf16.mxu1 %vm1195_vm8, %v4170_v30 }
 0xaad   :  { %5053 = vmatprep.subr.bf16.mxu0 %v6729_v31  ;;  %5080 = vmatprep.subr.bf16.mxu1 %v6732_v32 }
 0xaaf   :  { %5054 = vmatpush1.bf16.msra.mxu0 %v6727_v33 }
 0xab0   :  { %5081 = vmatpush1.bf16.msra.mxu1 %v6730_v34  ;;  %5055 = vmatprep.subr.bf16.mxu0 %v6735_v35 }
 0xab1   :  { %5082 = vmatprep.subr.bf16.mxu1 %v6738_v36 }
 0xab3   :  { %5056 = vmatpush1.bf16.msra.mxu0 %v6733_v37 }
 0xab4   :  { %5083 = vmatpush1.bf16.msra.mxu1 %v6736_v38  ;;  %5057 = vmatprep.subr.bf16.mxu0 %v6741_v40 }
 0xab5   :  { %5084 = vmatprep.subr.bf16.mxu1 %v6744_v41  ;;  %v5159_v41 = vld [vmem:[%s7645_s20] sm:$0x1f]  ;;  %s5202_s20 = sshll.u32 %s7441_s6, 4  ;;  %s5203_s20 = int_to_ptr.vmem [resolvable:$true] %s5202_s20 }
 0xab6   :  { %v5168_v43 = vrot.slane %v5159_v41, %v7885_v48  ;;  %v5172_v55 = vrot.slane %v5159_v41, %v8002_v18  ;;  %s7317_s4 = scalar_lea.vmem %s5203_s20, 640  ;;  %p7322_p11 = scmp.lt.s32.totalorder %s5203_s20, %s5203_s20 }
 0xab7   :  { %5058 = vmatpush1.bf16.msra.mxu0 %v6739_v42  ;;  %p7318_p10 = scmp.ne.s32.totalorder %s5203_s20, %s7317_s4  ;;  %p7323_p12 = scmp.lt.s32.totalorder %s7317_s4, %s7317_s4 }
 0xab8   :  { %5085 = vmatpush1.bf16.msra.mxu1 %v6742_v44  ;;  %5059 = vmatprep.subr.bf16.mxu0 %v6747_v47 }
 0xab9   :  { %5086 = vmatprep.subr.bf16.mxu1 %v6750_v49  ;;  %p7324_p13 = por %p7323_p12, %p7322_p11 }
 0xabb   :  { %5060 = vmatpush1.bf16.msra.mxu0 %v6745_v51  ;;  %p7325_p0 = pnand %p7324_p13, %p7318_p10 }
 0xabc   :  { %5087 = vmatpush1.bf16.msra.mxu1 %v6748_v53  ;;  %5782 = vmatprep.subr.msk.bf16.mxu0 %vm1199_vm6, %v5778_v54  ;;  %v5175_v54 = vsub.s32 3, %v7878_v45 }
 0xabd   :  { %5088 = vmatprep.subr.bf16.mxu1 %v6754_v56 }
 0xabe   :  { %v5176_v57 = vrot.slane %v5159_v41, %v5175_v54 }
 0xabf   :  { %5062 = vmatpush1.bf16.msra.mxu0 %v5023_v59 }
 0xac0   :  { %5089 = vmatpush1.bf16.msra.mxu1 %v6752_v58  ;;  %5119 = vmatprep.subr.bf16.mxu0 %v7440_v39 }
 0xac1   :  { %5090 = vmatprep.subr.bf16.mxu1 %v6758_v60 }
 0xac2   :  { %5070 = vmatmul.mubr.bf16.vlgmr.msra.gmra.mrb[32].mxu0 %v8240_v62 }
 0xac3   :  { %5120 = vmatpush1.bf16.msra.mxu0 %v6759_v61  ;;  %5786 = vmatprep.mubr.msk.bf16.mxu0 %vm1195_vm8, %v4170_v30 }
 0xac4   :  { %5091 = vmatpush1.bf16.msra.mxu1 %v6756_v63  ;;  %5121 = vmatprep.subr.bf16.mxu0 %v7440_v39  ;;  %v5179_v63 = vsub.s32 4, %v7878_v45 }
 0xac5   :  { %5092 = vmatprep.subr.bf16.mxu1 %v6762_v0 }
 0xac6   :  { %v5180_v0 = vrot.slane %v5159_v41, %v5179_v63 }
 0xac7   :  { %5122 = vmatpush1.bf16.msra.mxu0 %v6763_v1 }
 0xac8   :  { %5093 = vmatpush1.bf16.msra.mxu1 %v6760_v2  ;;  %5123 = vmatprep.subr.bf16.mxu0 %v7440_v39 }
 0xac9   :  { %5094 = vmatprep.subr.bf16.mxu1 %v6766_v3 }
 0xacb   :  { %5124 = vmatpush1.bf16.msra.mxu0 %v6767_v4 }
 0xacc   :  { %5095 = vmatpush1.bf16.msra.mxu1 %v6764_v5  ;;  %5125 = vmatprep.subr.bf16.mxu0 %v7440_v39 }
 0xacd   :  { %5096 = vmatprep.subr.bf16.mxu1 %v6770_v6 }
 0xacf   :  { %5126 = vmatpush1.bf16.msra.mxu0 %v6771_v7 }
 0xad0   :  { %5097 = vmatpush1.bf16.msra.mxu1 %v6768_v8  ;;  %5127 = vmatprep.subr.bf16.mxu0 %v7440_v39 }
 0xad1   :  { %5098 = vmatprep.subr.bf16.mxu1 %v6774_v9 }
 0xad3   :  { %5128 = vmatpush1.bf16.msra.mxu0 %v6775_v11 }
 0xad4   :  { %5099 = vmatpush1.bf16.msra.mxu1 %v6772_v12  ;;  %5129 = vmatprep.subr.bf16.mxu0 %v7440_v39 }
 0xad5   :  { %5100 = vmatprep.subr.bf16.mxu1 %v6778_v13 }
 0xad7   :  { %5130 = vmatpush1.bf16.msra.mxu0 %v6779_v15 }
 0xad8   :  { %5101 = vmatpush1.bf16.msra.mxu1 %v6776_v16  ;;  %5131 = vmatprep.subr.bf16.mxu0 %v7440_v39 }
 0xad9   :  { %5784 = vmatprep.subr.msk.bf16.mxu1 %vm1199_vm6, %v5780_v17 }
 0xadb   :  { %5132 = vmatpush1.bf16.msra.mxu0 %v6782_v20 }
 0xadc   :  { %5103 = vmatpush1.bf16.msra.mxu1 %v5029_v21  ;;  %5133 = vmatprep.subr.bf16.mxu0 %v7440_v39 }
 0xadf   :  { %5111 = vmatmul.mubr.bf16.vlgmr.msra.gmra.mrb[64].mxu1 %v8240_v62  ;;  %5134 = vmatpush1.bf16.msra.mxu0 %v6783_v22 }
 0xae0   :  { %5135 = vmatprep.subr.bf16.mxu0 %v7440_v39 }
 0xae3   :  { %5136 = vmatpush1.bf16.msra.mxu0 %v6784_v23 }
 0xae4   :  { %5137 = vmatprep.subr.bf16.mxu0 %v7440_v39 }
 0xae7   :  { %5138 = vmatpush1.bf16.msra.mxu0 %v6785_v24 }
 0xae8   :  { %5139 = vmatprep.subr.bf16.mxu0 %v7440_v39 }
 0xaeb   :  { %5140 = vmatpush1.bf16.msra.mxu0 %v6786_v25 }
 0xaec   :  { %5141 = vmatprep.subr.bf16.mxu0 %v7440_v39 }
 0xaef   :  { %5142 = vmatpush1.bf16.msra.mxu0 %v6787_v26 }
 0xaf0   :  { %5143 = vmatprep.subr.bf16.mxu0 %v7440_v39  ;;  %v5164_v39 = vrot.slane %v5159_v41, %v7881_v46 }
 0xaf3   :  { %5144 = vmatpush1.bf16.msra.mxu0 %v5035_v28 }
 0xaf6   :  { %5152 = vmatmul.mubr.bf16.vlgmr.msra.gmra.mrb[36].mxu0 %v8240_v62 }
 0xb61   :  { %v4606_v29 = vpop.f32.mrb[56].mxu1  ;;  %v4647_v10 = vpop.f32.mrb[28].mxu0 }
 0xb62   :  { %v4608_v30 = vpop.f32.mrb[57].mxu1  ;;  %v4649_v31 = vpop.f32.mrb[29].mxu0 }
 0xb63   :  { %v4610_v32 = vpop.f32.mrb[58].mxu1  ;;  %v4651_v33 = vpop.f32.mrb[30].mxu0 }
 0xb64   :  { %v4611_v34 = vpop.f32.mrb[59].mxu1  ;;  %v4652_v35 = vpop.f32.mrb[31].mxu0 }
 0xb7d   :  { %v4688_v36 = vpop.f32.mrb[60].mxu1 }
 0xb7e   :  { %v6016_v37 = vpop.f32.mrb[61].mxu1 }
 0xb7f   :  { %v4691_v38 = vpop.f32.mrb[62].mxu1 }
 0xb80   :  { %v6017_v40 = vpop.f32.mrb[63].mxu1 }
 0xb95   :  { %v5071_v42 = vpop.f32.mrb[32].mxu0 }
 0xb96   :  { %v5072_v44 = vadd.f32 %v5071_v42, %v4606_v29  ;;  %v5073_v47 = vpop.f32.mrb[33].mxu0 }
 0xb97   :  { %v5074_v49 = vadd.f32 %v5073_v47, %v4608_v30  ;;  %v5075_v50 = vpop.f32.mrb[34].mxu0 }
 0xb98   :  { %v5186_v51 = vadd.f32 %v5164_v39, %v5072_v44  ;;  %v5076_v52 = vpop.f32.mrb[35].mxu0 }
 0xb99   :  { %v5187_v53 = vadd.f32 %v5168_v43, %v5074_v49 }
 0xb9a   :  { %5191 = vst [vmem:[#allocation40] sm:$0xff] %v5186_v51 }
 0xb9b   :  { %5192 = vst [vmem:[#allocation40 + $0x8] sm:$0xff] %v5187_v53 }
 0xbb2   :  { %v5112_v56 = vpop.f32.mrb[64].mxu1 }
 0xbb3   :  { %v5113_v58 = vadd.f32 %v5112_v56, %v4647_v10  ;;  %v5114_v46 = vpop.f32.mrb[65].mxu1 }
 0xbb4   :  { %v5115_v59 = vadd.f32 %v5114_v46, %v4649_v31  ;;  %v5116_v60 = vpop.f32.mrb[66].mxu1 }
 0xbb5   :  { %v5188_v48 = vadd.f32 %v5172_v55, %v5113_v58  ;;  %v5117_v61 = vpop.f32.mrb[67].mxu1 }
 0xbb6   :  { %v5189_v62 = vadd.f32 %v5176_v57, %v5115_v59 }
 0xbb7   :  { %5193 = vst [vmem:[#allocation40 + $0x10] sm:$0xff] %v5188_v48 }
 0xbb8   :  { %5194 = vst [vmem:[#allocation40 + $0x18] sm:$0xff] %v5189_v62 }
 0xbc9   :  { %v5153_v1 = vpop.f32.mrb[36].mxu0 }
 0xbca   :  { %v5154_v2 = vadd.f32 %v5153_v1, %v4688_v36  ;;  %v5155_v3 = vpop.f32.mrb[37].mxu0 }
 0xbcb   :  { %v5156_v18 = vpop.f32.mrb[38].mxu0 }
 0xbcc   :  { %v5190_v4 = vadd.f32 %v5180_v0, %v5154_v2  ;;  %v5157_v5 = vpop.f32.mrb[39].mxu0 }
 0xbce   :  { %5195 = vst [vmem:[#allocation40 + $0x20] sm:$0xff] %v5190_v4 }
 0xbcf   :  { %7328 = shalt.err (!%p7325_p0)
}
 0xbd0   :  { %s7329_s19 = scalar_lea.hbm %s7650_s24, 640 }
 0xbd1   :  { %p7330_p1 = scmp.ne.s32.totalorder %s7650_s24, %s7329_s19  ;;  %p7333_p2 = scmp.lt.u32.totalorder %s7329_s19, %s7650_s24 }
 0xbd3   :  { %p7335_p3 = pnand %p7333_p2, %p7330_p1 }
 0xbd5   :  { %7338 = shalt.err (!%p7335_p3)
}
 0xbd6   :  { %5205 = dma.vmem_to_hbm [thread:$0]  %s5203_s20, 640, %s7650_s24, [#allocation4]  }
 0xbd7   :  { %7365 = dma.done.wait [#allocation4], 640  }
 0xbd8   :  { %7366 = vsyncadd [#allocation4], 4294966656 }
 0xbd9   :  { %5209 = vsyncpa [#allocation3], 1 }
 0xbda   :  { %5210 = vsyncpa [#allocation6], 1 }
 0xbdb   :  { %5211 = vsyncpa [#allocation9], 1 }
 0xbdc   :  { %5212 = vsyncpa [#allocation12], 1 }
 0xbdd   :  { %5213 = vsyncpa [#allocation15], 1 }
 0xbde   :  { %5214 = vsyncpa [#allocation18], 1 }
 0xbdf   :  { %5215 = vsyncpa [#allocation21], 1 }
 0xbe0   :  { %5216 = vsyncpa [#allocation24], 1 }
 0xbe1   :  { %5217 = vsyncpa [#allocation27], 1 }
 0xbe2   :  { %5218 = vsyncpa [#allocation30], 1 }
 0xbe3   :  { %5219 = vsyncpa [#allocation33], 1 }
 0xbe4   :  { %5220 = vsyncpa [#allocation36], 1 }
 0xbe5   :  { %5221 = vsyncpa [#allocation39], 1 }
 0xbe6   :  { %5222 = vsyncpa [#allocation4], 1 }

</bundles_post_ra>
